<compile_context>
chip_gen: v6e
topology: v6e:2x2x1
jax: 0.10.0
libtpu: 0.0.40
codegen_flags: <defaults>
</compile_context>

<pallas_src>
import functools

import jax
import jax.numpy as jnp
from jax import lax
from jax.experimental import pallas as pl
from jax.experimental.pallas import tpu as pltpu


def _nbytes_f32(*shapes):
    total = 0
    for s in shapes:
        n = 1
        for d in s:
            n *= int(d)
        total += 4 * n
    return total


def _mosaic_params(vmem_need_bytes):
    # Explicit scoped-VMEM limit derived from the real tile sizes (4x covers
    # double buffering + (8,128) layout padding at small C); floor/cap keep it
    # within every generation's defaults/physical VMEM (v7x: 64 MiB).
    limit = int(min(32 << 20, max(8 << 20, 4 * vmem_need_bytes)))
    return pltpu.CompilerParams(dimension_semantics=("parallel",),
                                vmem_limit_bytes=limit)


# ------------------- kernel A: maxpool + conv1 + BN1 partials ----------------
def _pool_conv1_kernel(xr_ref, w_ref, y_ref, s_ref, xp_ref,
                       *, nb, Ho, Wo, Cin, Cmid):
    # xr_ref: (nb, Ho, 2, Wo, 2*Cin)  free row-major view of nb NHWC images, so
    #         the 2x2 pool window is {row pair} x {lane half}
    # w_ref : (9*Cin, Cmid)           flattened HWIO conv1 weight (single-buffered)
    # y_ref : (nb, Cmid, Ho*Wo)       conv1 pre-BN output, channel-major (lane-dense)
    # s_ref : (1, 2, Cmid)            per-block BN1 partials [sum; sum_sq]
    # xp_ref: (nb, Ho+2, Wo+2, Cin)   VMEM scratch: zero-padded pooled images
    M1 = Ho * Wo

    r0 = xr_ref[:, :, 0, :, :]                                 # (nb, Ho, Wo, 2*Cin)
    r1 = xr_ref[:, :, 1, :, :]
    rm = jnp.maximum(r0, r1)
    pooled = jnp.maximum(rm[..., :Cin], rm[..., Cin:])         # (nb, Ho, Wo, Cin)

    # Zero halo + interior via direct stores (no concatenate temporaries).
    xp_ref[...] = jnp.zeros_like(xp_ref)
    for i in range(nb):
        xp_ref[i, pl.ds(1, Ho), pl.ds(1, Wo), :] = pooled[i]

    # im2col with all nb images folded into the MXU M dimension -> one matmul.
    # TODO(synk): for Cin >= 128 switch to 9x shift-accumulate matmuls to keep
    # transient VMEM ~1x the activation tile (matters for v7x's 64 MiB VMEM).
    blocks = []
    for i in range(nb):
        cols = [xp_ref[i, pl.ds(dy, Ho), pl.ds(dx, Wo), :]
                for dy in range(3) for dx in range(3)]
        blocks.append(jnp.concatenate(cols, axis=2).reshape(M1, 9 * Cin))
    patches = jnp.concatenate(blocks, axis=0)                  # (nb*Ho*Wo, 9*Cin)
    y = jnp.dot(patches, w_ref[...], preferred_element_type=jnp.float32)

    # Coalesced per-channel BN1 partials: one (2, Cmid) store.
    s_ref[0] = jnp.concatenate([jnp.sum(y, axis=0, keepdims=True),
                                jnp.sum(y * y, axis=0, keepdims=True)], axis=0)

    # Lane-dense channel-major store: rows of Ho*Wo lanes instead of Cmid-lane
    # masked stores (Cmid << 128 at small widths).
    y_t = jnp.transpose(y)                                     # (Cmid, nb*Ho*Wo)
    for i in range(nb):
        y_ref[i] = y_t[:, i * M1:(i + 1) * M1]


# -------------- kernel B: BN1 + ReLU + conv2 + BN2 partials -------------------
def _bn_relu_conv2_kernel(y1_ref, sc_ref, sh_ref, w_ref, y2_ref, s_ref, xp_ref,
                          *, nb, Ho, Wo, Cmid, Cout):
    # y1_ref: (nb, Cmid, Ho*Wo) channel-major conv1 output
    # sc/sh : (Cmid, 1)         BN1 scale/shift precomputed in the wrapper
    # w_ref : (9*Cmid, Cout)
    # y2_ref: (nb, Cout, Ho*Wo) channel-major conv2 output
    # s_ref : (1, 2, Cout)      BN2 partials
    # xp_ref: (nb, Ho+2, Wo+2, Cmid) VMEM scratch
    M1 = Ho * Wo
    sc = sc_ref[...]
    sh = sh_ref[...]

    xp_ref[...] = jnp.zeros_like(xp_ref)
    for i in range(nb):
        a_i = jnp.maximum(y1_ref[i] * sc + sh, 0.0)            # BN1+ReLU (Cmid, M1)
        xp_ref[i, pl.ds(1, Ho), pl.ds(1, Wo), :] = (
            jnp.transpose(a_i).reshape(Ho, Wo, Cmid))

    blocks = []
    for i in range(nb):
        cols = [xp_ref[i, pl.ds(dy, Ho), pl.ds(dx, Wo), :]
                for dy in range(3) for dx in range(3)]
        blocks.append(jnp.concatenate(cols, axis=2).reshape(M1, 9 * Cmid))
    patches = jnp.concatenate(blocks, axis=0)                  # (nb*Ho*Wo, 9*Cmid)
    y = jnp.dot(patches, w_ref[...], preferred_element_type=jnp.float32)

    s_ref[0] = jnp.concatenate([jnp.sum(y, axis=0, keepdims=True),
                                jnp.sum(y * y, axis=0, keepdims=True)], axis=0)

    y_t = jnp.transpose(y)                                     # (Cout, nb*Ho*Wo)
    for i in range(nb):
        y2_ref[i] = y_t[:, i * M1:(i + 1) * M1]


# ------------------------- kernel C: BN2 + ReLU -------------------------------
def _bn_relu_kernel(y_ref, sc_ref, sh_ref, o_ref, *, nb):
    sc = sc_ref[...]
    sh = sh_ref[...]
    for i in range(nb):
        o_ref[i] = jnp.maximum(y_ref[i] * sc + sh, 0.0).astype(o_ref.dtype)


# ---------------- wrapper-side (tiny) BN scale/shift from partials -----------
def _bn_scale_shift(s_blocks, gamma, beta, inv_cnt, eps):
    # s_blocks: (num_blocks, 2, C) of [sum; sum_sq]; one tiny batch-wide reduce
    # here instead of a redundant per-grid-step reduce inside the kernels.
    sums = jnp.sum(s_blocks, axis=0)                           # (2, C)
    mean = sums[0] * inv_cnt
    var = sums[1] * inv_cnt - mean * mean
    scale = gamma * lax.rsqrt(var + eps)
    shift = beta - mean * scale
    return scale.reshape(-1, 1), shift.reshape(-1, 1)          # (C, 1) each


# ------------------------------ Down.forward ----------------------------------
def down_forward(x_nchw, params, eps=1e-5):
    N, Cin, H, W = x_nchw.shape
    assert H % 2 == 0 and W % 2 == 0, "MaxPool2d(2) path assumes even H, W"
    Ho, Wo = H // 2, W // 2
    assert Wo % 8 == 0, "tile-preserving in-kernel reshapes require Wo % 8 == 0"
    Cmid = params["w1"].shape[-1]
    Cout = params["w2"].shape[-1]
    M1 = Ho * Wo
    inv_cnt = 1.0 / float(N * M1)

    # Fold a sub-batch into the MXU M dimension: largest divisor of N with
    # nb*Ho*Wo <= 1024 (feeds the 128/256-wide MXU, amortizes per-step overhead).
    nb = 1
    for cand in range(1, N + 1):
        if N % cand == 0 and cand * M1 <= 1024:
            nb = cand
    G = N // nb

    # TODO(synk): read the NCHW input directly (in-kernel HWC transpose) to drop
    # this input-side HBM pass too; the output-side pass is already eliminated
    # (kernels emit channel-major (C, Ho*Wo) blocks == NCHW).
    x = jnp.transpose(x_nchw, (0, 2, 3, 1))                # NCHW -> NHWC
    xr = x.reshape(N, Ho, 2, Wo, 2 * Cin)                  # free row-major view
    w1r = params["w1"].reshape(9 * Cin, Cmid)              # HWIO -> (9*Cin, Cmid)
    w2r = params["w2"].reshape(9 * Cmid, Cout)

    def const_spec(shape):
        # Constant-index operand: single-buffered (no pointless double buffer).
        return pl.BlockSpec(shape, lambda g: tuple(0 for _ in shape),
                            pipeline_mode=pl.Buffered(1))

    # ---- A) maxpool + conv1 + per-block BN1 partial sums --------------------
    vmem_a = _nbytes_f32((nb, Ho, 2, Wo, 2 * Cin), (9 * Cin, Cmid),
                         (nb, Cmid, M1), (1, 2, Cmid),
                         (nb, Ho + 2, Wo + 2, Cin), (nb * M1, 9 * Cin))
    y1, s1 = pl.pallas_call(
        functools.partial(_pool_conv1_kernel, nb=nb, Ho=Ho, Wo=Wo, Cin=Cin,
                          Cmid=Cmid),
        out_shape=(jax.ShapeDtypeStruct((N, Cmid, M1), jnp.float32),
                   jax.ShapeDtypeStruct((G, 2, Cmid), jnp.float32)),
        grid=(G,),
        in_specs=[pl.BlockSpec((nb, Ho, 2, Wo, 2 * Cin),
                               lambda g: (g, 0, 0, 0, 0)),
                  const_spec((9 * Cin, Cmid))],
        out_specs=(pl.BlockSpec((nb, Cmid, M1), lambda g: (g, 0, 0)),
                   pl.BlockSpec((1, 2, Cmid), lambda g: (g, 0, 0))),
        scratch_shapes=[pltpu.VMEM((nb, Ho + 2, Wo + 2, Cin), jnp.float32)],
        compiler_params=_mosaic_params(vmem_a),
    )(xr, w1r)

    scale1, shift1 = _bn_scale_shift(s1, params["g1"], params["b1"], inv_cnt, eps)

    # ---- B) BN1+ReLU folded into conv2's input + conv2 + BN2 partials -------
    vmem_b = _nbytes_f32((nb, Cmid, M1), (Cmid, 1), (Cmid, 1), (9 * Cmid, Cout),
                         (nb, Cout, M1), (1, 2, Cout),
                         (nb, Ho + 2, Wo + 2, Cmid), (nb * M1, 9 * Cmid))
    y2, s2 = pl.pallas_call(
        functools.partial(_bn_relu_conv2_kernel, nb=nb, Ho=Ho, Wo=Wo, Cmid=Cmid,
                          Cout=Cout),
        out_shape=(jax.ShapeDtypeStruct((N, Cout, M1), jnp.float32),
                   jax.ShapeDtypeStruct((G, 2, Cout), jnp.float32)),
        grid=(G,),
        in_specs=[pl.BlockSpec((nb, Cmid, M1), lambda g: (g, 0, 0)),
                  const_spec((Cmid, 1)),
                  const_spec((Cmid, 1)),
                  const_spec((9 * Cmid, Cout))],
        out_specs=(pl.BlockSpec((nb, Cout, M1), lambda g: (g, 0, 0)),
                   pl.BlockSpec((1, 2, Cout), lambda g: (g, 0, 0))),
        scratch_shapes=[pltpu.VMEM((nb, Ho + 2, Wo + 2, Cmid), jnp.float32)],
        compiler_params=_mosaic_params(vmem_b),
    )(y1, scale1, shift1, w2r)

    scale2, shift2 = _bn_scale_shift(s2, params["g2"], params["b2"], inv_cnt, eps)

    # ---- C) BN2 + ReLU (lane-dense channel-major blocks == NCHW) ------------
    vmem_c = _nbytes_f32((nb, Cout, M1), (Cout, 1), (Cout, 1), (nb, Cout, M1))
    out_flat = pl.pallas_call(
        functools.partial(_bn_relu_kernel, nb=nb),
        out_shape=jax.ShapeDtypeStruct((N, Cout, M1), jnp.float32),
        grid=(G,),
        in_specs=[pl.BlockSpec((nb, Cout, M1), lambda g: (g, 0, 0)),
                  const_spec((Cout, 1)),
                  const_spec((Cout, 1))],
        out_specs=pl.BlockSpec((nb, Cout, M1), lambda g: (g, 0, 0)),
        compiler_params=_mosaic_params(vmem_c),
    )(y2, scale2, shift2)

    return out_flat.reshape(N, Cout, Ho, Wo)               # free view; NCHW out


# ------------------------- pure-JAX reference check ---------------------------
def down_reference(x_nchw, params, eps=1e-5):
    x = jnp.transpose(x_nchw, (0, 2, 3, 1))
    x = lax.reduce_window(x, -jnp.inf, lax.max, (1, 2, 2, 1), (1, 2, 2, 1), "VALID")

    def conv_bn_relu(x, w, g, b):
        y = lax.conv_general_dilated(x, w, (1, 1), "SAME",
                                     dimension_numbers=("NHWC", "HWIO", "NHWC"))
        mean = jnp.mean(y, axis=(0, 1, 2))
        var = jnp.mean(y * y, axis=(0, 1, 2)) - mean * mean
        y = (y - mean) * lax.rsqrt(var + eps) * g + b
        return jnp.maximum(y, 0.0)

    x = conv_bn_relu(x, params["w1"], params["g1"], params["b1"])
    x = conv_bn_relu(x, params["w2"], params["g2"], params["b2"])
    return jnp.transpose(x, (0, 3, 1, 2))


if __name__ == "__main__":
    N, Cin, H, W = 2, 4, 16, 16
    Cout = 8  # Down(in_channels=4, out_channels=8); mid_channels == out_channels

    key = jax.random.PRNGKey(0)
    k0, k1, k2, k3, k4, k5, k6 = jax.random.split(key, 7)
    x = jax.random.normal(k0, (N, Cin, H, W), jnp.float32)

    params = {
        "w1": 0.2 * jax.random.normal(k1, (3, 3, Cin, Cout), jnp.float32),   # HWIO
        "w2": 0.2 * jax.random.normal(k2, (3, 3, Cout, Cout), jnp.float32),  # HWIO
        "g1": 1.0 + 0.1 * jax.random.normal(k3, (Cout,), jnp.float32),
        "b1": 0.1 * jax.random.normal(k4, (Cout,), jnp.float32),
        "g2": 1.0 + 0.1 * jax.random.normal(k5, (Cout,), jnp.float32),
        "b2": 0.1 * jax.random.normal(k6, (Cout,), jnp.float32),
    }

    out = jax.block_until_ready(jax.jit(down_forward)(x, params))
    ref = jax.block_until_ready(down_reference(x, params))

    assert out.shape == (N, Cout, H // 2, W // 2), out.shape
    assert jnp.allclose(out, ref, atol=1e-4, rtol=1e-4), \
        float(jnp.max(jnp.abs(out - ref)))
    print("KERNEL_OK")
</pallas_src>

<mosaic_0001>
module attributes {stable_mosaic.version = 11 : i64} {
  func.func @_pool_conv1_kernel(%arg0: i32, %arg1: memref<2x8x2x8x8xf32, #tpu.memory_space<vmem>>, %arg2: memref<36x8xf32, #tpu.memory_space<vmem>>, %arg3: memref<2x8x64xf32, #tpu.memory_space<vmem>>, %arg4: memref<1x2x8xf32, #tpu.memory_space<vmem>>, %arg5: memref<2x10x10x4xf32, #tpu.memory_space<vmem>>) attributes {dimension_semantics = [#tpu.dimension_semantics<parallel>], iteration_bounds = array<i64: 1>, scalar_prefetch = 0 : i64, scratch_operands = 1 : i64, tpu.core_type = #tpu.core_type<tc>, window_params = [{transform_indices = @transform_0, window_bounds = array<i64: 2, 8, 2, 8, 8>}, {pipeline_mode = #tpu.pipeline_mode<synchronous>, transform_indices = @transform_1, window_bounds = array<i64: 36, 8>}, {transform_indices = @transform_2, window_bounds = array<i64: 2, 8, 64>}, {transform_indices = @transform_3, window_bounds = array<i64: 1, 2, 8>}]} {
    %c0 = arith.constant 0 : index
    %c0_0 = arith.constant 0 : index
    %c0_1 = arith.constant 0 : index
    %c0_2 = arith.constant 0 : index
    %c0_3 = arith.constant 0 : index
    %0 = vector.load %arg1[%c0, %c0_0, %c0_1, %c0_2, %c0_3] : memref<2x8x2x8x8xf32, #tpu.memory_space<vmem>>, vector<2x8x1x8x8xf32>
    %1 = vector.shape_cast %0 : vector<2x8x1x8x8xf32> to vector<2x8x8x8xf32>
    %c0_4 = arith.constant 0 : index
    %c0_5 = arith.constant 0 : index
    %c1 = arith.constant 1 : index
    %c0_6 = arith.constant 0 : index
    %c0_7 = arith.constant 0 : index
    %2 = vector.load %arg1[%c0_4, %c0_5, %c1, %c0_6, %c0_7] : memref<2x8x2x8x8xf32, #tpu.memory_space<vmem>>, vector<2x8x1x8x8xf32>
    %3 = vector.shape_cast %2 : vector<2x8x1x8x8xf32> to vector<2x8x8x8xf32>
    %4 = arith.maximumf %1, %3 : vector<2x8x8x8xf32>
    %5 = vector.extract_strided_slice %4 {offsets = [0, 0, 0, 0], sizes = [2, 8, 8, 4], strides = [1, 1, 1, 1]} : vector<2x8x8x8xf32> to vector<2x8x8x4xf32>
    %6 = vector.extract_strided_slice %4 {offsets = [0, 0, 0, 4], sizes = [2, 8, 8, 4], strides = [1, 1, 1, 1]} : vector<2x8x8x8xf32> to vector<2x8x8x4xf32>
    %7 = arith.maximumf %5, %6 : vector<2x8x8x4xf32>
    %cst = arith.constant 0.000000e+00 : f32
    %8 = vector.broadcast %cst : f32 to vector<2x10x10x4xf32>
    %c0_8 = arith.constant 0 : index
    %c0_9 = arith.constant 0 : index
    %c0_10 = arith.constant 0 : index
    %c0_11 = arith.constant 0 : index
    %9 = vector.load %arg5[%c0_8, %c0_9, %c0_10, %c0_11] : memref<2x10x10x4xf32, #tpu.memory_space<vmem>>, vector<2x10x10x4xf32>
    tpu.vector_store %arg5[%c0_8, %c0_9, %c0_10, %c0_11], %8 {strides = array<i32>} : memref<2x10x10x4xf32, #tpu.memory_space<vmem>>, vector<2x10x10x4xf32>,
    %10 = vector.extract_strided_slice %7 {offsets = [0, 0, 0, 0], sizes = [1, 8, 8, 4], strides = [1, 1, 1, 1]} : vector<2x8x8x4xf32> to vector<1x8x8x4xf32>
    %11 = vector.shape_cast %10 : vector<1x8x8x4xf32> to vector<8x8x4xf32>
    %c0_12 = arith.constant 0 : index
    %c1_13 = arith.constant 1 : index
    %c1_14 = arith.constant 1 : index
    %c0_15 = arith.constant 0 : index
    %12 = vector.load %arg5[%c0_12, %c1_13, %c1_14, %c0_15] : memref<2x10x10x4xf32, #tpu.memory_space<vmem>>, vector<1x8x8x4xf32>
    %13 = vector.shape_cast %12 : vector<1x8x8x4xf32> to vector<8x8x4xf32>
    %14 = vector.shape_cast %11 : vector<8x8x4xf32> to vector<1x8x8x4xf32>
    tpu.vector_store %arg5[%c0_12, %c1_13, %c1_14, %c0_15], %14 {strides = array<i32>} : memref<2x10x10x4xf32, #tpu.memory_space<vmem>>, vector<1x8x8x4xf32>,
    %15 = vector.extract_strided_slice %7 {offsets = [1, 0, 0, 0], sizes = [1, 8, 8, 4], strides = [1, 1, 1, 1]} : vector<2x8x8x4xf32> to vector<1x8x8x4xf32>
    %16 = vector.shape_cast %15 : vector<1x8x8x4xf32> to vector<8x8x4xf32>
    %c1_16 = arith.constant 1 : index
    %c1_17 = arith.constant 1 : index
    %c1_18 = arith.constant 1 : index
    %c0_19 = arith.constant 0 : index
    %17 = vector.load %arg5[%c1_16, %c1_17, %c1_18, %c0_19] : memref<2x10x10x4xf32, #tpu.memory_space<vmem>>, vector<1x8x8x4xf32>
    %18 = vector.shape_cast %17 : vector<1x8x8x4xf32> to vector<8x8x4xf32>
    %19 = vector.shape_cast %16 : vector<8x8x4xf32> to vector<1x8x8x4xf32>
    tpu.vector_store %arg5[%c1_16, %c1_17, %c1_18, %c0_19], %19 {strides = array<i32>} : memref<2x10x10x4xf32, #tpu.memory_space<vmem>>, vector<1x8x8x4xf32>,
    %c0_20 = arith.constant 0 : index
    %c0_21 = arith.constant 0 : index
    %c0_22 = arith.constant 0 : index
    %c0_23 = arith.constant 0 : index
    %20 = vector.load %arg5[%c0_20, %c0_21, %c0_22, %c0_23] : memref<2x10x10x4xf32, #tpu.memory_space<vmem>>, vector<1x8x8x4xf32>
    %21 = vector.shape_cast %20 : vector<1x8x8x4xf32> to vector<8x8x4xf32>
    %c0_24 = arith.constant 0 : index
    %c0_25 = arith.constant 0 : index
    %c1_26 = arith.constant 1 : index
    %c0_27 = arith.constant 0 : index
    %22 = vector.load %arg5[%c0_24, %c0_25, %c1_26, %c0_27] : memref<2x10x10x4xf32, #tpu.memory_space<vmem>>, vector<1x8x8x4xf32>
    %23 = vector.shape_cast %22 : vector<1x8x8x4xf32> to vector<8x8x4xf32>
    %c0_28 = arith.constant 0 : index
    %c0_29 = arith.constant 0 : index
    %c2 = arith.constant 2 : index
    %c0_30 = arith.constant 0 : index
    %24 = vector.load %arg5[%c0_28, %c0_29, %c2, %c0_30] : memref<2x10x10x4xf32, #tpu.memory_space<vmem>>, vector<1x8x8x4xf32>
    %25 = vector.shape_cast %24 : vector<1x8x8x4xf32> to vector<8x8x4xf32>
    %c0_31 = arith.constant 0 : index
    %c1_32 = arith.constant 1 : index
    %c0_33 = arith.constant 0 : index
    %c0_34 = arith.constant 0 : index
    %26 = vector.load %arg5[%c0_31, %c1_32, %c0_33, %c0_34] : memref<2x10x10x4xf32, #tpu.memory_space<vmem>>, vector<1x8x8x4xf32>
    %27 = vector.shape_cast %26 : vector<1x8x8x4xf32> to vector<8x8x4xf32>
    %c0_35 = arith.constant 0 : index
    %c1_36 = arith.constant 1 : index
    %c1_37 = arith.constant 1 : index
    %c0_38 = arith.constant 0 : index
    %28 = vector.load %arg5[%c0_35, %c1_36, %c1_37, %c0_38] : memref<2x10x10x4xf32, #tpu.memory_space<vmem>>, vector<1x8x8x4xf32>
    %29 = vector.shape_cast %28 : vector<1x8x8x4xf32> to vector<8x8x4xf32>
    %c0_39 = arith.constant 0 : index
    %c1_40 = arith.constant 1 : index
    %c2_41 = arith.constant 2 : index
    %c0_42 = arith.constant 0 : index
    %30 = vector.load %arg5[%c0_39, %c1_40, %c2_41, %c0_42] : memref<2x10x10x4xf32, #tpu.memory_space<vmem>>, vector<1x8x8x4xf32>
    %31 = vector.shape_cast %30 : vector<1x8x8x4xf32> to vector<8x8x4xf32>
    %c0_43 = arith.constant 0 : index
    %c2_44 = arith.constant 2 : index
    %c0_45 = arith.constant 0 : index
    %c0_46 = arith.constant 0 : index
    %32 = vector.load %arg5[%c0_43, %c2_44, %c0_45, %c0_46] : memref<2x10x10x4xf32, #tpu.memory_space<vmem>>, vector<1x8x8x4xf32>
    %33 = vector.shape_cast %32 : vector<1x8x8x4xf32> to vector<8x8x4xf32>
    %c0_47 = arith.constant 0 : index
    %c2_48 = arith.constant 2 : index
    %c1_49 = arith.constant 1 : index
    %c0_50 = arith.constant 0 : index
    %34 = vector.load %arg5[%c0_47, %c2_48, %c1_49, %c0_50] : memref<2x10x10x4xf32, #tpu.memory_space<vmem>>, vector<1x8x8x4xf32>
    %35 = vector.shape_cast %34 : vector<1x8x8x4xf32> to vector<8x8x4xf32>
    %c0_51 = arith.constant 0 : index
    %c2_52 = arith.constant 2 : index
    %c2_53 = arith.constant 2 : index
    %c0_54 = arith.constant 0 : index
    %36 = vector.load %arg5[%c0_51, %c2_52, %c2_53, %c0_54] : memref<2x10x10x4xf32, #tpu.memory_space<vmem>>, vector<1x8x8x4xf32>
    %37 = vector.shape_cast %36 : vector<1x8x8x4xf32> to vector<8x8x4xf32>
    %38 = tpu.concatenate %21, %23, %25, %27, %29, %31, %33, %35, %37 in 2 : vector<8x8x4xf32>, vector<8x8x4xf32>, vector<8x8x4xf32>, vector<8x8x4xf32>, vector<8x8x4xf32>, vector<8x8x4xf32>, vector<8x8x4xf32>, vector<8x8x4xf32>, vector<8x8x4xf32> -> vector<8x8x36xf32>
    %39 = vector.shape_cast %38 : vector<8x8x36xf32> to vector<64x36xf32>
    %c1_55 = arith.constant 1 : index
    %c0_56 = arith.constant 0 : index
    %c0_57 = arith.constant 0 : index
    %c0_58 = arith.constant 0 : index
    %40 = vector.load %arg5[%c1_55, %c0_56, %c0_57, %c0_58] : memref<2x10x10x4xf32, #tpu.memory_space<vmem>>, vector<1x8x8x4xf32>
    %41 = vector.shape_cast %40 : vector<1x8x8x4xf32> to vector<8x8x4xf32>
    %c1_59 = arith.constant 1 : index
    %c0_60 = arith.constant 0 : index
    %c1_61 = arith.constant 1 : index
    %c0_62 = arith.constant 0 : index
    %42 = vector.load %arg5[%c1_59, %c0_60, %c1_61, %c0_62] : memref<2x10x10x4xf32, #tpu.memory_space<vmem>>, vector<1x8x8x4xf32>
    %43 = vector.shape_cast %42 : vector<1x8x8x4xf32> to vector<8x8x4xf32>
    %c1_63 = arith.constant 1 : index
    %c0_64 = arith.constant 0 : index
    %c2_65 = arith.constant 2 : index
    %c0_66 = arith.constant 0 : index
    %44 = vector.load %arg5[%c1_63, %c0_64, %c2_65, %c0_66] : memref<2x10x10x4xf32, #tpu.memory_space<vmem>>, vector<1x8x8x4xf32>
    %45 = vector.shape_cast %44 : vector<1x8x8x4xf32> to vector<8x8x4xf32>
    %c1_67 = arith.constant 1 : index
    %c1_68 = arith.constant 1 : index
    %c0_69 = arith.constant 0 : index
    %c0_70 = arith.constant 0 : index
    %46 = vector.load %arg5[%c1_67, %c1_68, %c0_69, %c0_70] : memref<2x10x10x4xf32, #tpu.memory_space<vmem>>, vector<1x8x8x4xf32>
    %47 = vector.shape_cast %46 : vector<1x8x8x4xf32> to vector<8x8x4xf32>
    %c1_71 = arith.constant 1 : index
    %c1_72 = arith.constant 1 : index
    %c1_73 = arith.constant 1 : index
    %c0_74 = arith.constant 0 : index
    %48 = vector.load %arg5[%c1_71, %c1_72, %c1_73, %c0_74] : memref<2x10x10x4xf32, #tpu.memory_space<vmem>>, vector<1x8x8x4xf32>
    %49 = vector.shape_cast %48 : vector<1x8x8x4xf32> to vector<8x8x4xf32>
    %c1_75 = arith.constant 1 : index
    %c1_76 = arith.constant 1 : index
    %c2_77 = arith.constant 2 : index
    %c0_78 = arith.constant 0 : index
    %50 = vector.load %arg5[%c1_75, %c1_76, %c2_77, %c0_78] : memref<2x10x10x4xf32, #tpu.memory_space<vmem>>, vector<1x8x8x4xf32>
    %51 = vector.shape_cast %50 : vector<1x8x8x4xf32> to vector<8x8x4xf32>
    %c1_79 = arith.constant 1 : index
    %c2_80 = arith.constant 2 : index
    %c0_81 = arith.constant 0 : index
    %c0_82 = arith.constant 0 : index
    %52 = vector.load %arg5[%c1_79, %c2_80, %c0_81, %c0_82] : memref<2x10x10x4xf32, #tpu.memory_space<vmem>>, vector<1x8x8x4xf32>
    %53 = vector.shape_cast %52 : vector<1x8x8x4xf32> to vector<8x8x4xf32>
    %c1_83 = arith.constant 1 : index
    %c2_84 = arith.constant 2 : index
    %c1_85 = arith.constant 1 : index
    %c0_86 = arith.constant 0 : index
    %54 = vector.load %arg5[%c1_83, %c2_84, %c1_85, %c0_86] : memref<2x10x10x4xf32, #tpu.memory_space<vmem>>, vector<1x8x8x4xf32>
    %55 = vector.shape_cast %54 : vector<1x8x8x4xf32> to vector<8x8x4xf32>
    %c1_87 = arith.constant 1 : index
    %c2_88 = arith.constant 2 : index
    %c2_89 = arith.constant 2 : index
    %c0_90 = arith.constant 0 : index
    %56 = vector.load %arg5[%c1_87, %c2_88, %c2_89, %c0_90] : memref<2x10x10x4xf32, #tpu.memory_space<vmem>>, vector<1x8x8x4xf32>
    %57 = vector.shape_cast %56 : vector<1x8x8x4xf32> to vector<8x8x4xf32>
    %58 = tpu.concatenate %41, %43, %45, %47, %49, %51, %53, %55, %57 in 2 : vector<8x8x4xf32>, vector<8x8x4xf32>, vector<8x8x4xf32>, vector<8x8x4xf32>, vector<8x8x4xf32>, vector<8x8x4xf32>, vector<8x8x4xf32>, vector<8x8x4xf32>, vector<8x8x4xf32> -> vector<8x8x36xf32>
    %59 = vector.shape_cast %58 : vector<8x8x36xf32> to vector<64x36xf32>
    %60 = tpu.concatenate %39, %59 in 0 : vector<64x36xf32>, vector<64x36xf32> -> vector<128x36xf32>
    %c0_91 = arith.constant 0 : index
    %c0_92 = arith.constant 0 : index
    %61 = vector.load %arg2[%c0_91, %c0_92] : memref<36x8xf32, #tpu.memory_space<vmem>>, vector<36x8xf32>
    %cst_93 = arith.constant dense<0.000000e+00> : vector<128x8xf32>
    %62 = tpu.matmul %60, %61, %cst_93 {dimension_numbers = #tpu.dot_dimension_numbers<[1], [0], [0], [1], [0, 0, 1, 1], [], []>} : vector<128x36xf32>, vector<36x8xf32>, vector<128x8xf32> -> vector<128x8xf32>
    %cst_94 = arith.constant dense<0.000000e+00> : vector<8xf32>
    %63 = vector.multi_reduction <add>, %62, %cst_94 [0] : vector<128x8xf32> to vector<8xf32>
    %64 = vector.shape_cast %63 : vector<8xf32> to vector<1x8xf32>
    %65 = arith.mulf %62, %62 : vector<128x8xf32>
    %cst_95 = arith.constant dense<0.000000e+00> : vector<8xf32>
    %66 = vector.multi_reduction <add>, %65, %cst_95 [0] : vector<128x8xf32> to vector<8xf32>
    %67 = vector.shape_cast %66 : vector<8xf32> to vector<1x8xf32>
    %68 = tpu.concatenate %64, %67 in 0 : vector<1x8xf32>, vector<1x8xf32> -> vector<2x8xf32>
    %c0_96 = arith.constant 0 : index
    %c0_97 = arith.constant 0 : index
    %c0_98 = arith.constant 0 : index
    %69 = vector.load %arg4[%c0_96, %c0_97, %c0_98] : memref<1x2x8xf32, #tpu.memory_space<vmem>>, vector<1x2x8xf32>
    %70 = vector.shape_cast %69 : vector<1x2x8xf32> to vector<2x8xf32>
    %71 = vector.shape_cast %68 : vector<2x8xf32> to vector<1x2x8xf32>
    tpu.vector_store %arg4[%c0_96, %c0_97, %c0_98], %71 {strides = array<i32>} : memref<1x2x8xf32, #tpu.memory_space<vmem>>, vector<1x2x8xf32>,
    %72 = tpu.transpose %62, [1, 0] : vector<128x8xf32> -> vector<8x128xf32>
    %73 = vector.extract_strided_slice %72 {offsets = [0, 0], sizes = [8, 64], strides = [1, 1]} : vector<8x128xf32> to vector<8x64xf32>
    %c0_99 = arith.constant 0 : index
    %c0_100 = arith.constant 0 : index
    %c0_101 = arith.constant 0 : index
    %74 = vector.load %arg3[%c0_99, %c0_100, %c0_101] : memref<2x8x64xf32, #tpu.memory_space<vmem>>, vector<1x8x64xf32>
    %75 = vector.shape_cast %74 : vector<1x8x64xf32> to vector<8x64xf32>
    %76 = vector.shape_cast %73 : vector<8x64xf32> to vector<1x8x64xf32>
    tpu.vector_store %arg3[%c0_99, %c0_100, %c0_101], %76 {strides = array<i32>} : memref<2x8x64xf32, #tpu.memory_space<vmem>>, vector<1x8x64xf32>,
    %77 = vector.extract_strided_slice %72 {offsets = [0, 64], sizes = [8, 64], strides = [1, 1]} : vector<8x128xf32> to vector<8x64xf32>
    %c1_102 = arith.constant 1 : index
    %c0_103 = arith.constant 0 : index
    %c0_104 = arith.constant 0 : index
    %78 = vector.load %arg3[%c1_102, %c0_103, %c0_104] : memref<2x8x64xf32, #tpu.memory_space<vmem>>, vector<1x8x64xf32>
    %79 = vector.shape_cast %78 : vector<1x8x64xf32> to vector<8x64xf32>
    %80 = vector.shape_cast %77 : vector<8x64xf32> to vector<1x8x64xf32>
    tpu.vector_store %arg3[%c1_102, %c0_103, %c0_104], %80 {strides = array<i32>} : memref<2x8x64xf32, #tpu.memory_space<vmem>>, vector<1x8x64xf32>,
    return
  }
  func.func @transform_0(%arg0: i32) -> (i32, i32, i32, i32, i32) {
    %c0_i32 = arith.constant 0 : i32
    %c0_i32_0 = arith.constant 0 : i32
    %c0_i32_1 = arith.constant 0 : i32
    %c0_i32_2 = arith.constant 0 : i32
    %c0_i32_3 = arith.constant 0 : i32
    return %arg0, %c0_i32, %c0_i32_0, %c0_i32_1, %c0_i32_2 : i32, i32, i32, i32, i32
  }
  func.func @transform_1(%arg0: i32) -> (i32, i32) {
    %c0_i32 = arith.constant 0 : i32
    %c0_i32_0 = arith.constant 0 : i32
    %c0_i32_1 = arith.constant 0 : i32
    return %c0_i32, %c0_i32_0 : i32, i32
  }
  func.func @transform_2(%arg0: i32) -> (i32, i32, i32) {
    %c0_i32 = arith.constant 0 : i32
    %c0_i32_0 = arith.constant 0 : i32
    %c0_i32_1 = arith.constant 0 : i32
    return %arg0, %c0_i32, %c0_i32_0 : i32, i32, i32
  }
  func.func @transform_3(%arg0: i32) -> (i32, i32, i32) {
    %c0_i32 = arith.constant 0 : i32
    %c0_i32_0 = arith.constant 0 : i32
    %c0_i32_1 = arith.constant 0 : i32
    return %arg0, %c0_i32, %c0_i32_0 : i32, i32, i32
  }
}

module attributes {stable_mosaic.version = 11 : i64} {
  func.func @_bn_relu_kernel(%arg0: i32, %arg1: memref<2x8x64xf32, #tpu.memory_space<vmem>>, %arg2: memref<8x1xf32, #tpu.memory_space<vmem>>, %arg3: memref<8x1xf32, #tpu.memory_space<vmem>>, %arg4: memref<2x8x64xf32, #tpu.memory_space<vmem>>) attributes {dimension_semantics = [#tpu.dimension_semantics<parallel>], iteration_bounds = array<i64: 1>, scalar_prefetch = 0 : i64, scratch_operands = 0 : i64, tpu.core_type = #tpu.core_type<tc>, window_params = [{transform_indices = @transform_0, window_bounds = array<i64: 2, 8, 64>}, {pipeline_mode = #tpu.pipeline_mode<synchronous>, transform_indices = @transform_1, window_bounds = array<i64: 8, 1>}, {pipeline_mode = #tpu.pipeline_mode<synchronous>, transform_indices = @transform_2, window_bounds = array<i64: 8, 1>}, {transform_indices = @transform_3, window_bounds = array<i64: 2, 8, 64>}]} {
    %c0 = arith.constant 0 : index
    %c0_0 = arith.constant 0 : index
    %0 = vector.load %arg2[%c0, %c0_0] : memref<8x1xf32, #tpu.memory_space<vmem>>, vector<8x1xf32>
    %c0_1 = arith.constant 0 : index
    %c0_2 = arith.constant 0 : index
    %1 = vector.load %arg3[%c0_1, %c0_2] : memref<8x1xf32, #tpu.memory_space<vmem>>, vector<8x1xf32>
    %c0_3 = arith.constant 0 : index
    %c0_4 = arith.constant 0 : index
    %c0_5 = arith.constant 0 : index
    %2 = vector.load %arg1[%c0_3, %c0_4, %c0_5] : memref<2x8x64xf32, #tpu.memory_space<vmem>>, vector<1x8x64xf32>
    %3 = vector.shape_cast %2 : vector<1x8x64xf32> to vector<8x64xf32>
    %4 = vector.broadcast %0 : vector<8x1xf32> to vector<8x64xf32>
    %5 = arith.mulf %3, %4 : vector<8x64xf32>
    %6 = vector.broadcast %1 : vector<8x1xf32> to vector<8x64xf32>
    %7 = arith.addf %5, %6 : vector<8x64xf32>
    %cst = arith.constant 0.000000e+00 : f32
    %8 = vector.broadcast %cst : f32 to vector<8x64xf32>
    %9 = arith.maximumf %7, %8 : vector<8x64xf32>
    %c0_6 = arith.constant 0 : index
    %c0_7 = arith.constant 0 : index
    %c0_8 = arith.constant 0 : index
    %10 = vector.load %arg4[%c0_6, %c0_7, %c0_8] : memref<2x8x64xf32, #tpu.memory_space<vmem>>, vector<1x8x64xf32>
    %11 = vector.shape_cast %10 : vector<1x8x64xf32> to vector<8x64xf32>
    %12 = vector.shape_cast %9 : vector<8x64xf32> to vector<1x8x64xf32>
    tpu.vector_store %arg4[%c0_6, %c0_7, %c0_8], %12 {strides = array<i32>} : memref<2x8x64xf32, #tpu.memory_space<vmem>>, vector<1x8x64xf32>,
    %c1 = arith.constant 1 : index
    %c0_9 = arith.constant 0 : index
    %c0_10 = arith.constant 0 : index
    %13 = vector.load %arg1[%c1, %c0_9, %c0_10] : memref<2x8x64xf32, #tpu.memory_space<vmem>>, vector<1x8x64xf32>
    %14 = vector.shape_cast %13 : vector<1x8x64xf32> to vector<8x64xf32>
    %15 = vector.broadcast %0 : vector<8x1xf32> to vector<8x64xf32>
    %16 = arith.mulf %14, %15 : vector<8x64xf32>
    %17 = vector.broadcast %1 : vector<8x1xf32> to vector<8x64xf32>
    %18 = arith.addf %16, %17 : vector<8x64xf32>
    %cst_11 = arith.constant 0.000000e+00 : f32
    %19 = vector.broadcast %cst_11 : f32 to vector<8x64xf32>
    %20 = arith.maximumf %18, %19 : vector<8x64xf32>
    %c1_12 = arith.constant 1 : index
    %c0_13 = arith.constant 0 : index
    %c0_14 = arith.constant 0 : index
    %21 = vector.load %arg4[%c1_12, %c0_13, %c0_14] : memref<2x8x64xf32, #tpu.memory_space<vmem>>, vector<1x8x64xf32>
    %22 = vector.shape_cast %21 : vector<1x8x64xf32> to vector<8x64xf32>
    %23 = vector.shape_cast %20 : vector<8x64xf32> to vector<1x8x64xf32>
    tpu.vector_store %arg4[%c1_12, %c0_13, %c0_14], %23 {strides = array<i32>} : memref<2x8x64xf32, #tpu.memory_space<vmem>>, vector<1x8x64xf32>,
    return
  }
  func.func @transform_0(%arg0: i32) -> (i32, i32, i32) {
    %c0_i32 = arith.constant 0 : i32
    %c0_i32_0 = arith.constant 0 : i32
    %c0_i32_1 = arith.constant 0 : i32
    return %arg0, %c0_i32, %c0_i32_0 : i32, i32, i32
  }
  func.func @transform_1(%arg0: i32) -> (i32, i32) {
    %c0_i32 = arith.constant 0 : i32
    %c0_i32_0 = arith.constant 0 : i32
    %c0_i32_1 = arith.constant 0 : i32
    return %c0_i32, %c0_i32_0 : i32, i32
  }
  func.func @transform_2(%arg0: i32) -> (i32, i32) {
    %c0_i32 = arith.constant 0 : i32
    %c0_i32_0 = arith.constant 0 : i32
    %c0_i32_1 = arith.constant 0 : i32
    return %c0_i32, %c0_i32_0 : i32, i32
  }
  func.func @transform_3(%arg0: i32) -> (i32, i32, i32) {
    %c0_i32 = arith.constant 0 : i32
    %c0_i32_0 = arith.constant 0 : i32
    %c0_i32_1 = arith.constant 0 : i32
    return %arg0, %c0_i32, %c0_i32_0 : i32, i32, i32
  }
}

module attributes {stable_mosaic.version = 11 : i64} {
  func.func @_bn_relu_conv2_kernel(%arg0: i32, %arg1: memref<2x8x64xf32, #tpu.memory_space<vmem>>, %arg2: memref<8x1xf32, #tpu.memory_space<vmem>>, %arg3: memref<8x1xf32, #tpu.memory_space<vmem>>, %arg4: memref<72x8xf32, #tpu.memory_space<vmem>>, %arg5: memref<2x8x64xf32, #tpu.memory_space<vmem>>, %arg6: memref<1x2x8xf32, #tpu.memory_space<vmem>>, %arg7: memref<2x10x10x8xf32, #tpu.memory_space<vmem>>) attributes {dimension_semantics = [#tpu.dimension_semantics<parallel>], iteration_bounds = array<i64: 1>, scalar_prefetch = 0 : i64, scratch_operands = 1 : i64, tpu.core_type = #tpu.core_type<tc>, window_params = [{transform_indices = @transform_0, window_bounds = array<i64: 2, 8, 64>}, {pipeline_mode = #tpu.pipeline_mode<synchronous>, transform_indices = @transform_1, window_bounds = array<i64: 8, 1>}, {pipeline_mode = #tpu.pipeline_mode<synchronous>, transform_indices = @transform_2, window_bounds = array<i64: 8, 1>}, {pipeline_mode = #tpu.pipeline_mode<synchronous>, transform_indices = @transform_3, window_bounds = array<i64: 72, 8>}, {transform_indices = @transform_4, window_bounds = array<i64: 2, 8, 64>}, {transform_indices = @transform_5, window_bounds = array<i64: 1, 2, 8>}]} {
    %c0 = arith.constant 0 : index
    %c0_0 = arith.constant 0 : index
    %0 = vector.load %arg2[%c0, %c0_0] : memref<8x1xf32, #tpu.memory_space<vmem>>, vector<8x1xf32>
    %c0_1 = arith.constant 0 : index
    %c0_2 = arith.constant 0 : index
    %1 = vector.load %arg3[%c0_1, %c0_2] : memref<8x1xf32, #tpu.memory_space<vmem>>, vector<8x1xf32>
    %cst = arith.constant 0.000000e+00 : f32
    %2 = vector.broadcast %cst : f32 to vector<2x10x10x8xf32>
    %c0_3 = arith.constant 0 : index
    %c0_4 = arith.constant 0 : index
    %c0_5 = arith.constant 0 : index
    %c0_6 = arith.constant 0 : index
    %3 = vector.load %arg7[%c0_3, %c0_4, %c0_5, %c0_6] : memref<2x10x10x8xf32, #tpu.memory_space<vmem>>, vector<2x10x10x8xf32>
    tpu.vector_store %arg7[%c0_3, %c0_4, %c0_5, %c0_6], %2 {strides = array<i32>} : memref<2x10x10x8xf32, #tpu.memory_space<vmem>>, vector<2x10x10x8xf32>,
    %c0_7 = arith.constant 0 : index
    %c0_8 = arith.constant 0 : index
    %c0_9 = arith.constant 0 : index
    %4 = vector.load %arg1[%c0_7, %c0_8, %c0_9] : memref<2x8x64xf32, #tpu.memory_space<vmem>>, vector<1x8x64xf32>
    %5 = vector.shape_cast %4 : vector<1x8x64xf32> to vector<8x64xf32>
    %6 = vector.broadcast %0 : vector<8x1xf32> to vector<8x64xf32>
    %7 = arith.mulf %5, %6 : vector<8x64xf32>
    %8 = vector.broadcast %1 : vector<8x1xf32> to vector<8x64xf32>
    %9 = arith.addf %7, %8 : vector<8x64xf32>
    %cst_10 = arith.constant 0.000000e+00 : f32
    %10 = vector.broadcast %cst_10 : f32 to vector<8x64xf32>
    %11 = arith.maximumf %9, %10 : vector<8x64xf32>
    %12 = tpu.transpose %11, [1, 0] : vector<8x64xf32> -> vector<64x8xf32>
    %13 = vector.shape_cast %12 : vector<64x8xf32> to vector<8x8x8xf32>
    %c0_11 = arith.constant 0 : index
    %c1 = arith.constant 1 : index
    %c1_12 = arith.constant 1 : index
    %c0_13 = arith.constant 0 : index
    %14 = vector.load %arg7[%c0_11, %c1, %c1_12, %c0_13] : memref<2x10x10x8xf32, #tpu.memory_space<vmem>>, vector<1x8x8x8xf32>
    %15 = vector.shape_cast %14 : vector<1x8x8x8xf32> to vector<8x8x8xf32>
    %16 = vector.shape_cast %13 : vector<8x8x8xf32> to vector<1x8x8x8xf32>
    tpu.vector_store %arg7[%c0_11, %c1, %c1_12, %c0_13], %16 {strides = array<i32>} : memref<2x10x10x8xf32, #tpu.memory_space<vmem>>, vector<1x8x8x8xf32>,
    %c1_14 = arith.constant 1 : index
    %c0_15 = arith.constant 0 : index
    %c0_16 = arith.constant 0 : index
    %17 = vector.load %arg1[%c1_14, %c0_15, %c0_16] : memref<2x8x64xf32, #tpu.memory_space<vmem>>, vector<1x8x64xf32>
    %18 = vector.shape_cast %17 : vector<1x8x64xf32> to vector<8x64xf32>
    %19 = vector.broadcast %0 : vector<8x1xf32> to vector<8x64xf32>
    %20 = arith.mulf %18, %19 : vector<8x64xf32>
    %21 = vector.broadcast %1 : vector<8x1xf32> to vector<8x64xf32>
    %22 = arith.addf %20, %21 : vector<8x64xf32>
    %cst_17 = arith.constant 0.000000e+00 : f32
    %23 = vector.broadcast %cst_17 : f32 to vector<8x64xf32>
    %24 = arith.maximumf %22, %23 : vector<8x64xf32>
    %25 = tpu.transpose %24, [1, 0] : vector<8x64xf32> -> vector<64x8xf32>
    %26 = vector.shape_cast %25 : vector<64x8xf32> to vector<8x8x8xf32>
    %c1_18 = arith.constant 1 : index
    %c1_19 = arith.constant 1 : index
    %c1_20 = arith.constant 1 : index
    %c0_21 = arith.constant 0 : index
    %27 = vector.load %arg7[%c1_18, %c1_19, %c1_20, %c0_21] : memref<2x10x10x8xf32, #tpu.memory_space<vmem>>, vector<1x8x8x8xf32>
    %28 = vector.shape_cast %27 : vector<1x8x8x8xf32> to vector<8x8x8xf32>
    %29 = vector.shape_cast %26 : vector<8x8x8xf32> to vector<1x8x8x8xf32>
    tpu.vector_store %arg7[%c1_18, %c1_19, %c1_20, %c0_21], %29 {strides = array<i32>} : memref<2x10x10x8xf32, #tpu.memory_space<vmem>>, vector<1x8x8x8xf32>,
    %c0_22 = arith.constant 0 : index
    %c0_23 = arith.constant 0 : index
    %c0_24 = arith.constant 0 : index
    %c0_25 = arith.constant 0 : index
    %30 = vector.load %arg7[%c0_22, %c0_23, %c0_24, %c0_25] : memref<2x10x10x8xf32, #tpu.memory_space<vmem>>, vector<1x8x8x8xf32>
    %31 = vector.shape_cast %30 : vector<1x8x8x8xf32> to vector<8x8x8xf32>
    %c0_26 = arith.constant 0 : index
    %c0_27 = arith.constant 0 : index
    %c1_28 = arith.constant 1 : index
    %c0_29 = arith.constant 0 : index
    %32 = vector.load %arg7[%c0_26, %c0_27, %c1_28, %c0_29] : memref<2x10x10x8xf32, #tpu.memory_space<vmem>>, vector<1x8x8x8xf32>
    %33 = vector.shape_cast %32 : vector<1x8x8x8xf32> to vector<8x8x8xf32>
    %c0_30 = arith.constant 0 : index
    %c0_31 = arith.constant 0 : index
    %c2 = arith.constant 2 : index
    %c0_32 = arith.constant 0 : index
    %34 = vector.load %arg7[%c0_30, %c0_31, %c2, %c0_32] : memref<2x10x10x8xf32, #tpu.memory_space<vmem>>, vector<1x8x8x8xf32>
    %35 = vector.shape_cast %34 : vector<1x8x8x8xf32> to vector<8x8x8xf32>
    %c0_33 = arith.constant 0 : index
    %c1_34 = arith.constant 1 : index
    %c0_35 = arith.constant 0 : index
    %c0_36 = arith.constant 0 : index
    %36 = vector.load %arg7[%c0_33, %c1_34, %c0_35, %c0_36] : memref<2x10x10x8xf32, #tpu.memory_space<vmem>>, vector<1x8x8x8xf32>
    %37 = vector.shape_cast %36 : vector<1x8x8x8xf32> to vector<8x8x8xf32>
    %c0_37 = arith.constant 0 : index
    %c1_38 = arith.constant 1 : index
    %c1_39 = arith.constant 1 : index
    %c0_40 = arith.constant 0 : index
    %38 = vector.load %arg7[%c0_37, %c1_38, %c1_39, %c0_40] : memref<2x10x10x8xf32, #tpu.memory_space<vmem>>, vector<1x8x8x8xf32>
    %39 = vector.shape_cast %38 : vector<1x8x8x8xf32> to vector<8x8x8xf32>
    %c0_41 = arith.constant 0 : index
    %c1_42 = arith.constant 1 : index
    %c2_43 = arith.constant 2 : index
    %c0_44 = arith.constant 0 : index
    %40 = vector.load %arg7[%c0_41, %c1_42, %c2_43, %c0_44] : memref<2x10x10x8xf32, #tpu.memory_space<vmem>>, vector<1x8x8x8xf32>
    %41 = vector.shape_cast %40 : vector<1x8x8x8xf32> to vector<8x8x8xf32>
    %c0_45 = arith.constant 0 : index
    %c2_46 = arith.constant 2 : index
    %c0_47 = arith.constant 0 : index
    %c0_48 = arith.constant 0 : index
    %42 = vector.load %arg7[%c0_45, %c2_46, %c0_47, %c0_48] : memref<2x10x10x8xf32, #tpu.memory_space<vmem>>, vector<1x8x8x8xf32>
    %43 = vector.shape_cast %42 : vector<1x8x8x8xf32> to vector<8x8x8xf32>
    %c0_49 = arith.constant 0 : index
    %c2_50 = arith.constant 2 : index
    %c1_51 = arith.constant 1 : index
    %c0_52 = arith.constant 0 : index
    %44 = vector.load %arg7[%c0_49, %c2_50, %c1_51, %c0_52] : memref<2x10x10x8xf32, #tpu.memory_space<vmem>>, vector<1x8x8x8xf32>
    %45 = vector.shape_cast %44 : vector<1x8x8x8xf32> to vector<8x8x8xf32>
    %c0_53 = arith.constant 0 : index
    %c2_54 = arith.constant 2 : index
    %c2_55 = arith.constant 2 : index
    %c0_56 = arith.constant 0 : index
    %46 = vector.load %arg7[%c0_53, %c2_54, %c2_55, %c0_56] : memref<2x10x10x8xf32, #tpu.memory_space<vmem>>, vector<1x8x8x8xf32>
    %47 = vector.shape_cast %46 : vector<1x8x8x8xf32> to vector<8x8x8xf32>
    %48 = tpu.concatenate %31, %33, %35, %37, %39, %41, %43, %45, %47 in 2 : vector<8x8x8xf32>, vector<8x8x8xf32>, vector<8x8x8xf32>, vector<8x8x8xf32>, vector<8x8x8xf32>, vector<8x8x8xf32>, vector<8x8x8xf32>, vector<8x8x8xf32>, vector<8x8x8xf32> -> vector<8x8x72xf32>
    %49 = vector.shape_cast %48 : vector<8x8x72xf32> to vector<64x72xf32>
    %c1_57 = arith.constant 1 : index
    %c0_58 = arith.constant 0 : index
    %c0_59 = arith.constant 0 : index
    %c0_60 = arith.constant 0 : index
    %50 = vector.load %arg7[%c1_57, %c0_58, %c0_59, %c0_60] : memref<2x10x10x8xf32, #tpu.memory_space<vmem>>, vector<1x8x8x8xf32>
    %51 = vector.shape_cast %50 : vector<1x8x8x8xf32> to vector<8x8x8xf32>
    %c1_61 = arith.constant 1 : index
    %c0_62 = arith.constant 0 : index
    %c1_63 = arith.constant 1 : index
    %c0_64 = arith.constant 0 : index
    %52 = vector.load %arg7[%c1_61, %c0_62, %c1_63, %c0_64] : memref<2x10x10x8xf32, #tpu.memory_space<vmem>>, vector<1x8x8x8xf32>
    %53 = vector.shape_cast %52 : vector<1x8x8x8xf32> to vector<8x8x8xf32>
    %c1_65 = arith.constant 1 : index
    %c0_66 = arith.constant 0 : index
    %c2_67 = arith.constant 2 : index
    %c0_68 = arith.constant 0 : index
    %54 = vector.load %arg7[%c1_65, %c0_66, %c2_67, %c0_68] : memref<2x10x10x8xf32, #tpu.memory_space<vmem>>, vector<1x8x8x8xf32>
    %55 = vector.shape_cast %54 : vector<1x8x8x8xf32> to vector<8x8x8xf32>
    %c1_69 = arith.constant 1 : index
    %c1_70 = arith.constant 1 : index
    %c0_71 = arith.constant 0 : index
    %c0_72 = arith.constant 0 : index
    %56 = vector.load %arg7[%c1_69, %c1_70, %c0_71, %c0_72] : memref<2x10x10x8xf32, #tpu.memory_space<vmem>>, vector<1x8x8x8xf32>
    %57 = vector.shape_cast %56 : vector<1x8x8x8xf32> to vector<8x8x8xf32>
    %c1_73 = arith.constant 1 : index
    %c1_74 = arith.constant 1 : index
    %c1_75 = arith.constant 1 : index
    %c0_76 = arith.constant 0 : index
    %58 = vector.load %arg7[%c1_73, %c1_74, %c1_75, %c0_76] : memref<2x10x10x8xf32, #tpu.memory_space<vmem>>, vector<1x8x8x8xf32>
    %59 = vector.shape_cast %58 : vector<1x8x8x8xf32> to vector<8x8x8xf32>
    %c1_77 = arith.constant 1 : index
    %c1_78 = arith.constant 1 : index
    %c2_79 = arith.constant 2 : index
    %c0_80 = arith.constant 0 : index
    %60 = vector.load %arg7[%c1_77, %c1_78, %c2_79, %c0_80] : memref<2x10x10x8xf32, #tpu.memory_space<vmem>>, vector<1x8x8x8xf32>
    %61 = vector.shape_cast %60 : vector<1x8x8x8xf32> to vector<8x8x8xf32>
    %c1_81 = arith.constant 1 : index
    %c2_82 = arith.constant 2 : index
    %c0_83 = arith.constant 0 : index
    %c0_84 = arith.constant 0 : index
    %62 = vector.load %arg7[%c1_81, %c2_82, %c0_83, %c0_84] : memref<2x10x10x8xf32, #tpu.memory_space<vmem>>, vector<1x8x8x8xf32>
    %63 = vector.shape_cast %62 : vector<1x8x8x8xf32> to vector<8x8x8xf32>
    %c1_85 = arith.constant 1 : index
    %c2_86 = arith.constant 2 : index
    %c1_87 = arith.constant 1 : index
    %c0_88 = arith.constant 0 : index
    %64 = vector.load %arg7[%c1_85, %c2_86, %c1_87, %c0_88] : memref<2x10x10x8xf32, #tpu.memory_space<vmem>>, vector<1x8x8x8xf32>
    %65 = vector.shape_cast %64 : vector<1x8x8x8xf32> to vector<8x8x8xf32>
    %c1_89 = arith.constant 1 : index
    %c2_90 = arith.constant 2 : index
    %c2_91 = arith.constant 2 : index
    %c0_92 = arith.constant 0 : index
    %66 = vector.load %arg7[%c1_89, %c2_90, %c2_91, %c0_92] : memref<2x10x10x8xf32, #tpu.memory_space<vmem>>, vector<1x8x8x8xf32>
    %67 = vector.shape_cast %66 : vector<1x8x8x8xf32> to vector<8x8x8xf32>
    %68 = tpu.concatenate %51, %53, %55, %57, %59, %61, %63, %65, %67 in 2 : vector<8x8x8xf32>, vector<8x8x8xf32>, vector<8x8x8xf32>, vector<8x8x8xf32>, vector<8x8x8xf32>, vector<8x8x8xf32>, vector<8x8x8xf32>, vector<8x8x8xf32>, vector<8x8x8xf32> -> vector<8x8x72xf32>
    %69 = vector.shape_cast %68 : vector<8x8x72xf32> to vector<64x72xf32>
    %70 = tpu.concatenate %49, %69 in 0 : vector<64x72xf32>, vector<64x72xf32> -> vector<128x72xf32>
    %c0_93 = arith.constant 0 : index
    %c0_94 = arith.constant 0 : index
    %71 = vector.load %arg4[%c0_93, %c0_94] : memref<72x8xf32, #tpu.memory_space<vmem>>, vector<72x8xf32>
    %cst_95 = arith.constant dense<0.000000e+00> : vector<128x8xf32>
    %72 = tpu.matmul %70, %71, %cst_95 {dimension_numbers = #tpu.dot_dimension_numbers<[1], [0], [0], [1], [0, 0, 1, 1], [], []>} : vector<128x72xf32>, vector<72x8xf32>, vector<128x8xf32> -> vector<128x8xf32>
    %cst_96 = arith.constant dense<0.000000e+00> : vector<8xf32>
    %73 = vector.multi_reduction <add>, %72, %cst_96 [0] : vector<128x8xf32> to vector<8xf32>
    %74 = vector.shape_cast %73 : vector<8xf32> to vector<1x8xf32>
    %75 = arith.mulf %72, %72 : vector<128x8xf32>
    %cst_97 = arith.constant dense<0.000000e+00> : vector<8xf32>
    %76 = vector.multi_reduction <add>, %75, %cst_97 [0] : vector<128x8xf32> to vector<8xf32>
    %77 = vector.shape_cast %76 : vector<8xf32> to vector<1x8xf32>
    %78 = tpu.concatenate %74, %77 in 0 : vector<1x8xf32>, vector<1x8xf32> -> vector<2x8xf32>
    %c0_98 = arith.constant 0 : index
    %c0_99 = arith.constant 0 : index
    %c0_100 = arith.constant 0 : index
    %79 = vector.load %arg6[%c0_98, %c0_99, %c0_100] : memref<1x2x8xf32, #tpu.memory_space<vmem>>, vector<1x2x8xf32>
    %80 = vector.shape_cast %79 : vector<1x2x8xf32> to vector<2x8xf32>
    %81 = vector.shape_cast %78 : vector<2x8xf32> to vector<1x2x8xf32>
    tpu.vector_store %arg6[%c0_98, %c0_99, %c0_100], %81 {strides = array<i32>} : memref<1x2x8xf32, #tpu.memory_space<vmem>>, vector<1x2x8xf32>,
    %82 = tpu.transpose %72, [1, 0] : vector<128x8xf32> -> vector<8x128xf32>
    %83 = vector.extract_strided_slice %82 {offsets = [0, 0], sizes = [8, 64], strides = [1, 1]} : vector<8x128xf32> to vector<8x64xf32>
    %c0_101 = arith.constant 0 : index
    %c0_102 = arith.constant 0 : index
    %c0_103 = arith.constant 0 : index
    %84 = vector.load %arg5[%c0_101, %c0_102, %c0_103] : memref<2x8x64xf32, #tpu.memory_space<vmem>>, vector<1x8x64xf32>
    %85 = vector.shape_cast %84 : vector<1x8x64xf32> to vector<8x64xf32>
    %86 = vector.shape_cast %83 : vector<8x64xf32> to vector<1x8x64xf32>
    tpu.vector_store %arg5[%c0_101, %c0_102, %c0_103], %86 {strides = array<i32>} : memref<2x8x64xf32, #tpu.memory_space<vmem>>, vector<1x8x64xf32>,
    %87 = vector.extract_strided_slice %82 {offsets = [0, 64], sizes = [8, 64], strides = [1, 1]} : vector<8x128xf32> to vector<8x64xf32>
    %c1_104 = arith.constant 1 : index
    %c0_105 = arith.constant 0 : index
    %c0_106 = arith.constant 0 : index
    %88 = vector.load %arg5[%c1_104, %c0_105, %c0_106] : memref<2x8x64xf32, #tpu.memory_space<vmem>>, vector<1x8x64xf32>
    %89 = vector.shape_cast %88 : vector<1x8x64xf32> to vector<8x64xf32>
    %90 = vector.shape_cast %87 : vector<8x64xf32> to vector<1x8x64xf32>
    tpu.vector_store %arg5[%c1_104, %c0_105, %c0_106], %90 {strides = array<i32>} : memref<2x8x64xf32, #tpu.memory_space<vmem>>, vector<1x8x64xf32>,
    return
  }
  func.func @transform_0(%arg0: i32) -> (i32, i32, i32) {
    %c0_i32 = arith.constant 0 : i32
    %c0_i32_0 = arith.constant 0 : i32
    %c0_i32_1 = arith.constant 0 : i32
    return %arg0, %c0_i32, %c0_i32_0 : i32, i32, i32
  }
  func.func @transform_1(%arg0: i32) -> (i32, i32) {
    %c0_i32 = arith.constant 0 : i32
    %c0_i32_0 = arith.constant 0 : i32
    %c0_i32_1 = arith.constant 0 : i32
    return %c0_i32, %c0_i32_0 : i32, i32
  }
  func.func @transform_2(%arg0: i32) -> (i32, i32) {
    %c0_i32 = arith.constant 0 : i32
    %c0_i32_0 = arith.constant 0 : i32
    %c0_i32_1 = arith.constant 0 : i32
    return %c0_i32, %c0_i32_0 : i32, i32
  }
  func.func @transform_3(%arg0: i32) -> (i32, i32) {
    %c0_i32 = arith.constant 0 : i32
    %c0_i32_0 = arith.constant 0 : i32
    %c0_i32_1 = arith.constant 0 : i32
    return %c0_i32, %c0_i32_0 : i32, i32
  }
  func.func @transform_4(%arg0: i32) -> (i32, i32, i32) {
    %c0_i32 = arith.constant 0 : i32
    %c0_i32_0 = arith.constant 0 : i32
    %c0_i32_1 = arith.constant 0 : i32
    return %arg0, %c0_i32, %c0_i32_0 : i32, i32, i32
  }
  func.func @transform_5(%arg0: i32) -> (i32, i32, i32) {
    %c0_i32 = arith.constant 0 : i32
    %c0_i32_0 = arith.constant 0 : i32
    %c0_i32_1 = arith.constant 0 : i32
    return %arg0, %c0_i32, %c0_i32_0 : i32, i32, i32
  }
}

</mosaic_0001>

<bundles_post_ra>
// kernel: down_forward.5
= control target key start
LH: loop header
LB: loop body
LE: loop exit
PB: predicated region body
PF: predicated region fallthrough
CT: control target
= control target key end

     0   :  { %v47_v0 = vmov 0   ;;  %vm30_vm0 = vcmask 523264   ;;  %s86_s1 = inlined_call_operand.vmem [shape: f32[8,1], index: 1, kind: input, shape index: {}]   ;;  %s87_s2 = inlined_call_operand.vmem [shape: f32[8,1], index: 2, kind: input, shape index: {}]   ;;  %s88_s0 = inlined_call_operand.vmem [shape: f32[2,8,64], index: 0, kind: input, shape index: {}]   ;;  %s89_s3 = inlined_call_operand.vmem [shape: f32[2,8,64], index: 3, kind: output, shape index: {}]  }
   0x1   :  { %46 = vset.pattern.permute.xlu0 %v47_v0  ;;  %v14_v1 = vld [vmem:[%s86_s1] sm:$0xff]  ;;  %v43_v5 = vld [vmem:[%s88_s0 + $0x8] sm:$0xff] }
   0x2   :  { %19 = vperm.xlu0 %46, %v14_v1   ;;  %v15_v2 = vld [vmem:[%s87_s2] sm:$0xff] }
   0x3   :  { %v16_v4 = vld [vmem:[%s88_s0] sm:$0xff] }
   0x6   :  { %25 = vperm.xlu0 %46, %v15_v2  }
  0x7d   :  { %v20_v3 = vpop.permute.xlu0 %19 }
  0x7e   :  { %v22_v6 = vmul.f32 %v20_v3, %v16_v4  ;;  %v34_v7 = vmul.f32 %v43_v5, %v20_v3 }
  0x81   :  { %v26_v8 = vpop.permute.xlu0 %25 }
  0x82   :  { %v28_v9 = vadd.f32 %v26_v8, %v22_v6  ;;  %v35_v10 = vadd.f32 %v34_v7, %v26_v8 }
  0x84   :  { %v29_v11 = vmax.f32 %v28_v9, 0.0  ;;  %v36_v12 = vmax.f32 %v35_v10, 0.0 }
  0x86   :  { %31 = vst.msk [vmem:[%s89_s3] sm:$0xff] %vm30_vm0, %v29_v11  ;;  %44 = vst.msk [vmem:[%s89_s3 + $0x8] sm:$0xff] %vm30_vm0, %v36_v12 }

// kernel: down_forward.3
= control target key start
LH: loop header
LB: loop body
LE: loop exit
PB: predicated region body
PF: predicated region fallthrough
CT: control target
= control target key end

     0   :  { %vm142_vm0 = vcmask 31744   ;;  %vm144_vm1 = vcmask 25600   ;;  %v1451_v3 = vmov 0.0   ;;  %s1452_s28 = smov 124   ;;  %s1453_s24 = smov 4   ;;  %vm1050_vm2 = vcmask 1043456   ;;  %s2198_s0 = inlined_call_operand.vmem [shape: f32[2,8,2,8,8], index: 0, kind: input, shape index: {}]   ;;  %s2199_s1 = inlined_call_operand.vmem [shape: f32[36,8], index: 1, kind: input, shape index: {}]   ;;  %s2200_s3 = inlined_call_operand.vmem [shape: f32[1,2,8], index: 3, kind: output, shape index: {1}]   ;;  %s2201_s2 = inlined_call_operand.vmem [shape: f32[2,8,64], index: 2, kind: output, shape index: {0}]  }
   0x1   :  { %v13_v0 = vld [vmem:[%s2198_s0] sm:$0xff]  ;;  %v1341_v1 = vld [vmem:[%s2198_s0 + $0x8] sm:$0xff]  ;;  %v14_v2 = vld [vmem:[%s2198_s0 + $0x10] sm:$0xff]  ;;  %146 = vst.msk [vmem:[#allocation2 + $0x10] sm:$0xff] %vm142_vm0, %v1451_v3  ;;  %s1456_s25 = smov 16   ;;  %s1457_s26 = smov 20  }
   0x2   :  { %147 = vst.msk [vmem:[#allocation2 + $0x18] sm:$0x3] %vm144_vm1, %v1451_v3  ;;  %145 = vst.msk [vmem:[#allocation2 + $0x8] sm:$0x3] %vm144_vm1, %v1451_v3  ;;  %v1531_v4 = vmax.f32 %v13_v0, %v1341_v1  ;;  %v1342_v5 = vld [vmem:[%s2198_s0 + $0x18] sm:$0xff]  ;;  %v15_v6 = vld [vmem:[%s2198_s0 + $0x20] sm:$0xff] }
   0x3   :  { %143 = vst.msk [vmem:[#allocation2] sm:$0xff] %vm142_vm0, %v1451_v3  ;;  %148 = vst.msk [vmem:[#allocation2 + $0x20] sm:$0xff] %vm142_vm0, %v1451_v3  ;;  %v1343_v7 = vld [vmem:[%s2198_s0 + $0x28] sm:$0xff]  ;;  %v16_v9 = vld [vmem:[%s2198_s0 + $0x30] sm:$0xff]  ;;  %v1552_v11 = vmax.f32 %v14_v2, %v1342_v5  ;;  %s1458_s27 = smov 24   ;;  %s1459_s10 = smov 28  }
   0x4   :  { %149 = vst.msk [vmem:[#allocation2 + $0x28] sm:$0x3] %vm144_vm1, %v1451_v3  ;;  %151 = vst.msk [vmem:[#allocation2 + $0x38] sm:$0x3] %vm144_vm1, %v1451_v3  ;;  %v1542_v8 = vmax.f32 %v15_v6, %v1343_v7  ;;  %v1344_v10 = vld [vmem:[%s2198_s0 + $0x38] sm:$0xff]  ;;  %78 = vrot.lane.b32.xlu0 %v1531_v4, %s1452_s28  ;;  %v17_v13 = vld [vmem:[%s2198_s0 + $0x40] sm:$0xff] }
   0x5   :  { %150 = vst.msk [vmem:[#allocation2 + $0x30] sm:$0xff] %vm142_vm0, %v1451_v3  ;;  %152 = vst.msk [vmem:[#allocation2 + $0x40] sm:$0xff] %vm142_vm0, %v1451_v3  ;;  %v1556_v12 = vmax.f32 %v16_v9, %v1344_v10  ;;  %v1345_v14 = vld [vmem:[%s2198_s0 + $0x48] sm:$0xff]  ;;  %v18_v15 = vld [vmem:[%s2198_s0 + $0x50] sm:$0xff]  ;;  %s1460_s13 = smov 32   ;;  %vm539_vm3 = vcmask 64512  }
   0x6   :  { %153 = vst.msk [vmem:[#allocation2 + $0x48] sm:$0x3] %vm144_vm1, %v1451_v3  ;;  %155 = vst.msk [vmem:[#allocation2 + $0x58] sm:$0x3] %vm144_vm1, %v1451_v3  ;;  %82 = vrot.lane.b32.xlu1 %v1542_v8, %s1452_s28  ;;  %v1346_v16 = vld [vmem:[%s2198_s0 + $0x58] sm:$0xff]  ;;  %v1572_v17 = vmax.f32 %v17_v13, %v1345_v14  ;;  %v19_v19 = vld [vmem:[%s2198_s0 + $0x60] sm:$0xff] }
   0x7   :  { %154 = vst.msk [vmem:[#allocation2 + $0x50] sm:$0xff] %vm142_vm0, %v1451_v3  ;;  %156 = vst.msk [vmem:[#allocation2 + $0x60] sm:$0xff] %vm142_vm0, %v1451_v3  ;;  %v1576_v18 = vmax.f32 %v18_v15, %v1346_v16  ;;  %v1347_v20 = vld [vmem:[%s2198_s0 + $0x68] sm:$0xff]  ;;  %v20_v21 = vld [vmem:[%s2198_s0 + $0x70] sm:$0xff]  ;;  %vm548_vm4 = vcmask 97280   ;;  %vm557_vm5 = vcmask 130048  }
   0x8   :  { %157 = vst.msk [vmem:[#allocation2 + $0x68] sm:$0x3] %vm144_vm1, %v1451_v3  ;;  %159 = vst.msk [vmem:[#allocation2 + $0x78] sm:$0x3] %vm144_vm1, %v1451_v3  ;;  %80 = vrot.lane.b32.xlu0 %v1552_v11, %s1452_s28  ;;  %v1348_v22 = vld [vmem:[%s2198_s0 + $0x78] sm:$0xff]  ;;  %v1592_v23 = vmax.f32 %v19_v19, %v1347_v20  ;;  %v21_v25 = vld [vmem:[%s2198_s0 + $0x80] sm:$0xff] }
   0x9   :  { %158 = vst.msk [vmem:[#allocation2 + $0x70] sm:$0xff] %vm142_vm0, %v1451_v3  ;;  %160 = vst.msk [vmem:[#allocation2 + $0x80] sm:$0xff] %vm142_vm0, %v1451_v3  ;;  %v1596_v24 = vmax.f32 %v20_v21, %v1348_v22  ;;  %v1349_v26 = vld [vmem:[%s2198_s0 + $0x88] sm:$0xff]  ;;  %v22_v27 = vld [vmem:[%s2198_s0 + $0x90] sm:$0xff]  ;;  %vm566_vm6 = vcmask 162816   ;;  %vm575_vm7 = vcmask 195584  }
   0xa   :  { %161 = vst.msk [vmem:[#allocation2 + $0x88] sm:$0x3] %vm144_vm1, %v1451_v3  ;;  %163 = vst.msk [vmem:[#allocation2 + $0x98] sm:$0x3] %vm144_vm1, %v1451_v3  ;;  %84 = vrot.lane.b32.xlu1 %v1556_v12, %s1452_s28  ;;  %v1350_v28 = vld [vmem:[%s2198_s0 + $0x98] sm:$0xff]  ;;  %v1612_v29 = vmax.f32 %v21_v25, %v1349_v26  ;;  %v23_v30 = vld [vmem:[%s2198_s0 + $0xa0] sm:$0xff] }
   0xb   :  { %162 = vst.msk [vmem:[#allocation2 + $0x90] sm:$0xff] %vm142_vm0, %v1451_v3  ;;  %164 = vst.msk [vmem:[#allocation2 + $0xa0] sm:$0xff] %vm142_vm0, %v1451_v3  ;;  %v1351_v31 = vld [vmem:[%s2198_s0 + $0xa8] sm:$0xff]  ;;  %v1622_v32 = vmax.f32 %v22_v27, %v1350_v28  ;;  %v24_v33 = vld [vmem:[%s2198_s0 + $0xb0] sm:$0xff]  ;;  %vm584_vm8 = vcmask 228352   ;;  %vm593_vm9 = vcmask 261120  }
   0xc   :  { %165 = vst.msk [vmem:[#allocation2 + $0xa8] sm:$0x3] %vm144_vm1, %v1451_v3  ;;  %167 = vst.msk [vmem:[#allocation2 + $0xb8] sm:$0x3] %vm144_vm1, %v1451_v3  ;;  %86 = vrot.lane.b32.xlu0 %v1572_v17, %s1452_s28  ;;  %v1352_v34 = vld [vmem:[%s2198_s0 + $0xb8] sm:$0xff]  ;;  %v1632_v35 = vmax.f32 %v23_v30, %v1351_v31  ;;  %v25_v36 = vld [vmem:[%s2198_s0 + $0xc0] sm:$0xff] }
   0xd   :  { %166 = vst.msk [vmem:[#allocation2 + $0xb0] sm:$0xff] %vm142_vm0, %v1451_v3  ;;  %168 = vst.msk [vmem:[#allocation2 + $0xc0] sm:$0xff] %vm142_vm0, %v1451_v3  ;;  %v1353_v37 = vld [vmem:[%s2198_s0 + $0xc8] sm:$0xff]  ;;  %v1642_v38 = vmax.f32 %v24_v33, %v1352_v34  ;;  %v26_v39 = vld [vmem:[%s2198_s0 + $0xd0] sm:$0xff]  ;;  %vm1001_vm10 = vcmask 293888   ;;  %vm1289_vm11 = vcmask 1040384  }
   0xe   :  { %169 = vst.msk [vmem:[#allocation2 + $0xc8] sm:$0x3] %vm144_vm1, %v1451_v3  ;;  %171 = vst.msk [vmem:[#allocation2 + $0xd8] sm:$0x3] %vm144_vm1, %v1451_v3  ;;  %88 = vrot.lane.b32.xlu1 %v1576_v18, %s1452_s28  ;;  %v1354_v40 = vld [vmem:[%s2198_s0 + $0xd8] sm:$0xff]  ;;  %v1652_v41 = vmax.f32 %v25_v36, %v1353_v37  ;;  %v27_v42 = vld [vmem:[%s2198_s0 + $0xe0] sm:$0xff] }
   0xf   :  { %170 = vst.msk [vmem:[#allocation2 + $0xd0] sm:$0xff] %vm142_vm0, %v1451_v3  ;;  %172 = vst.msk [vmem:[#allocation2 + $0xe0] sm:$0xff] %vm142_vm0, %v1451_v3  ;;  %v1355_v43 = vld [vmem:[%s2198_s0 + $0xe8] sm:$0xff]  ;;  %v1662_v44 = vmax.f32 %v26_v39, %v1354_v40  ;;  %v28_v45 = vld [vmem:[%s2198_s0 + $0xf0] sm:$0xff]  ;;  %vm1291_vm12 = vcmask 58368   ;;  %vm1325_vm13 = vcmask 523264  }
  0x10   :  { %173 = vst.msk [vmem:[#allocation2 + $0xe8] sm:$0x3] %vm144_vm1, %v1451_v3  ;;  %175 = vst.msk [vmem:[#allocation2 + $0xf8] sm:$0x3] %vm144_vm1, %v1451_v3  ;;  %90 = vrot.lane.b32.xlu0 %v1592_v23, %s1452_s28  ;;  %v1356_v46 = vld [vmem:[%s2198_s0 + $0xf8] sm:$0xff]  ;;  %v1672_v47 = vmax.f32 %v27_v42, %v1355_v43  ;;  %v210_v49 = vld [vmem:[#allocation2 + $0x1] sm:$0xff] }
  0x11   :  { %174 = vst.msk [vmem:[#allocation2 + $0xf0] sm:$0xff] %vm142_vm0, %v1451_v3  ;;  %176 = vst.msk [vmem:[#allocation2 + $0x100] sm:$0xff] %vm142_vm0, %v1451_v3  ;;  %v1676_v48 = vmax.f32 %v28_v45, %v1356_v46  ;;  %v218_v50 = vld [vmem:[#allocation2 + $0x2] sm:$0xff]  ;;  %s1454_s0 = smov 8   ;;  %v999_v30 = vld [vmem:[%s2199_s1 + $0x18] sm:$0xff]  ;;  %s1461_s17 = smov 64  }
  0x12   :  { %177 = vst.msk [vmem:[#allocation2 + $0x108] sm:$0x3] %vm144_vm1, %v1451_v3  ;;  %179 = vst.msk [vmem:[#allocation2 + $0x118] sm:$0x3] %vm144_vm1, %v1451_v3  ;;  %92 = vrot.lane.b32.xlu1 %v1596_v24, %s1452_s28  ;;  %v998_v31 = vld [vmem:[%s2199_s1 + $0x10] sm:$0xff]  ;;  %v996_v34 = vld [vmem:[%s2199_s1] sm:$0xff] }
  0x13   :  { %178 = vst.msk [vmem:[#allocation2 + $0x110] sm:$0xff] %vm142_vm0, %v1451_v3  ;;  %180 = vst.msk [vmem:[#allocation2 + $0x120] sm:$0xff] %vm142_vm0, %v1451_v3 }
  0x14   :  { %181 = vst.msk [vmem:[#allocation2 + $0x128] sm:$0x3] %vm144_vm1, %v1451_v3  ;;  %183 = vst.msk [vmem:[#allocation2 + $0x138] sm:$0x3] %vm144_vm1, %v1451_v3  ;;  %94 = vrot.lane.b32.xlu0 %v1612_v29, %s1452_s28 }
  0x15   :  { %182 = vst.msk [vmem:[#allocation2 + $0x130] sm:$0xff] %vm142_vm0, %v1451_v3 }
  0x16   :  { %96 = vrot.lane.b32.xlu1 %v1622_v32, %s1452_s28 }
  0x18   :  { %98 = vrot.lane.b32.xlu0 %v1632_v35, %s1452_s28 }
  0x1a   :  { %100 = vrot.lane.b32.xlu1 %v1642_v38, %s1452_s28 }
  0x1c   :  { %102 = vrot.lane.b32.xlu0 %v1652_v41, %s1452_s28 }
  0x1e   :  { %104 = vrot.lane.b32.xlu1 %v1662_v44, %s1452_s28 }
  0x20   :  { %106 = vrot.lane.b32.xlu0 %v1672_v47, %s1452_s28 }
  0x22   :  { %108 = vrot.lane.b32.xlu1 %v1676_v48, %s1452_s28  ;;  %s1455_s28 = smov 12  }
  0x24   :  { %283 = vrot.lane.b32.xlu0 %v210_v49, %s1453_s24 }
  0x28   :  { %315 = vrot.lane.b32.xlu0 %v218_v50, %s1454_s0  ;;  %v611_v50 = vld [vmem:[#allocation2 + $0xa1] sm:$0xff] }
  0x76   :  { %v79_v51 = vpop.permute.xlu0 %78 }
  0x77   :  { %v126_v52 = vmax.f32 %v1531_v4, %v79_v51 }
  0x78   :  { %v83_v53 = vpop.permute.xlu1 %82 }
  0x79   :  { %v128_v54 = vmax.f32 %v1542_v8, %v83_v53  ;;  %185 = vst.msk [vmem:[#allocation2 + $0x11] sm:$0xff] %vm142_vm0, %v126_v52  ;;  %v258_v52 = vld [vmem:[#allocation2 + $0x90] sm:$0xff] }
  0x7a   :  { %v81_v55 = vpop.permute.xlu0 %80 }
  0x7b   :  { %187 = vst.msk [vmem:[#allocation2 + $0x31] sm:$0xff] %vm142_vm0, %v128_v54  ;;  %v127_v56 = vmax.f32 %v1552_v11, %v81_v55  ;;  %v619_v55 = vld [vmem:[#allocation2 + $0xa2] sm:$0xff] }
  0x7c   :  { %v85_v57 = vpop.permute.xlu1 %84 }
  0x7d   :  { %v129_v58 = vmax.f32 %v1556_v12, %v85_v57  ;;  %186 = vst.msk [vmem:[#allocation2 + $0x21] sm:$0xff] %vm142_vm0, %v127_v56 }
  0x7e   :  { %v87_v59 = vpop.permute.xlu0 %86 }
  0x7f   :  { %188 = vst.msk [vmem:[#allocation2 + $0x41] sm:$0xff] %vm142_vm0, %v129_v58  ;;  %v130_v60 = vmax.f32 %v1572_v17, %v87_v59  ;;  %v266_v59 = vld [vmem:[#allocation2 + $0x91] sm:$0xff] }
  0x80   :  { %v89_v61 = vpop.permute.xlu1 %88  ;;  %v1693_v62 = vld [vmem:[#allocation2 + $0x10] sm:$0xff] }
  0x81   :  { %v211_v63 = vld [vmem:[#allocation2 + $0x11] sm:$0xff]  ;;  %v131_v0 = vmax.f32 %v1576_v18, %v89_v61  ;;  %347 = vrot.lane.b32.xlu0 %v1693_v62, %s1455_s28  ;;  %189 = vst.msk [vmem:[#allocation2 + $0x51] sm:$0xff] %vm142_vm0, %v130_v60 }
  0x82   :  { %285 = vrot.lane.b32.xlu1 %v211_v63, %s1453_s24  ;;  %v91_v1 = vpop.permute.xlu0 %90  ;;  %v219_v4 = vld [vmem:[#allocation2 + $0x12] sm:$0xff] }
  0x83   :  { %190 = vst.msk [vmem:[#allocation2 + $0x61] sm:$0xff] %vm142_vm0, %v131_v0  ;;  %v132_v2 = vmax.f32 %v1592_v23, %v91_v1  ;;  %v1718_v12 = vld [vmem:[#allocation2 + $0x31] sm:$0xff] }
  0x84   :  { %v93_v3 = vpop.permute.xlu1 %92  ;;  %v1706_v6 = vld [vmem:[#allocation2 + $0x21] sm:$0xff]  ;;  %v221_v22 = vld [vmem:[#allocation2 + $0x32] sm:$0xff] }
  0x85   :  { %v133_v5 = vmax.f32 %v1596_v24, %v93_v3  ;;  %379 = vrot.lane.b32.xlu0 %v211_v63, %s1456_s25  ;;  %191 = vst.msk [vmem:[#allocation2 + $0x71] sm:$0xff] %vm142_vm0, %v132_v2  ;;  %v1708_v7 = vld [vmem:[#allocation2 + $0x20] sm:$0xff]  ;;  %v1741_v27 = vld [vmem:[#allocation2 + $0x30] sm:$0xff] }
  0x86   :  { %317 = vrot.lane.b32.xlu1 %v219_v4, %s1454_s0  ;;  %v95_v8 = vpop.permute.xlu0 %94  ;;  %v243_v20 = vld [vmem:[#allocation2 + $0x22] sm:$0xff]  ;;  %v274_v3 = vld [vmem:[#allocation2 + $0x92] sm:$0xff] }
  0x87   :  { %192 = vst.msk [vmem:[#allocation2 + $0x81] sm:$0xff] %vm142_vm0, %v133_v5  ;;  %v134_v9 = vmax.f32 %v1612_v29, %v95_v8  ;;  %v1747_v28 = vld [vmem:[#allocation2 + $0x40] sm:$0xff] }
  0x88   :  { %v97_v10 = vpop.permute.xlu1 %96  ;;  %v1000_v29 = vld [vmem:[%s2199_s1 + $0x20] sm:$0xf]  ;;  %v223_v37 = vld [vmem:[#allocation2 + $0x52] sm:$0xff] }
  0x89   :  { %v135_v11 = vmax.f32 %v1622_v32, %v97_v10  ;;  %381 = vrot.lane.b32.xlu0 %v1706_v6, %s1456_s25  ;;  %194 = vst.msk [vmem:[#allocation2 + $0xb1] sm:$0xff] %vm142_vm0, %v134_v9  ;;  %1396 = vmatprep.subr.msk.mxu0 %vm1050_vm2, %v1000_v29  ;;  %v997_v32 = vld [vmem:[%s2199_s1 + $0x8] sm:$0xff] }
  0x8a   :  { %349 = vrot.lane.b32.xlu1 %v1708_v7, %s1455_s28  ;;  %v99_v13 = vpop.permute.xlu0 %98  ;;  %1430 = vmatprep.subr.msk.mxu1 %vm1050_vm2, %v1000_v29  ;;  %v214_v33 = vld [vmem:[#allocation2 + $0x41] sm:$0xff] }
  0x8b   :  { %195 = vst.msk [vmem:[#allocation2 + $0xc1] sm:$0xff] %vm142_vm0, %v135_v11  ;;  %v136_v14 = vmax.f32 %v1632_v35, %v99_v13  ;;  %1397 = vmatpush3.msk.msra.mxu0 %vm1050_vm2, %v1000_v29  ;;  %1435 = vmatpush3.msk.msra.mxu1 %vm1050_vm2, %v1000_v29  ;;  %v215_v35 = vld [vmem:[#allocation2 + $0x51] sm:$0xff]  ;;  %v245_v36 = vld [vmem:[#allocation2 + $0x42] sm:$0xff] }
  0x8c   :  { %v101_v15 = vpop.permute.xlu1 %100  ;;  %1398 = vmatprep.subr.mxu0 %v999_v30  ;;  %1431 = vmatprep.subr.mxu1 %v999_v30  ;;  %v1789_v39 = vld [vmem:[#allocation2 + $0x60] sm:$0xff]  ;;  %v225_v43 = vld [vmem:[#allocation2 + $0x72] sm:$0xff] }
  0x8d   :  { %v137_v16 = vmax.f32 %v1642_v38, %v101_v15  ;;  %289 = vrot.lane.b32.xlu0 %v1718_v12, %s1453_s24  ;;  %196 = vst.msk [vmem:[#allocation2 + $0xd1] sm:$0xff] %vm142_vm0, %v136_v14  ;;  %1399 = vmatpush3.msra.mxu0 %v999_v30  ;;  %v1783_v38 = vld [vmem:[#allocation2 + $0x50] sm:$0xff]  ;;  %v216_v40 = vld [vmem:[#allocation2 + $0x61] sm:$0xff] }
  0x8e   :  { %287 = vrot.lane.b32.xlu1 %v1706_v6, %s1453_s24  ;;  %v103_v17 = vpop.permute.xlu0 %102  ;;  %1436 = vmatpush3.msra.mxu1 %v999_v30  ;;  %v247_v42 = vld [vmem:[#allocation2 + $0x62] sm:$0xff] }
  0x8f   :  { %197 = vst.msk [vmem:[#allocation2 + $0xe1] sm:$0xff] %vm142_vm0, %v137_v16  ;;  %v138_v18 = vmax.f32 %v1652_v41, %v103_v17  ;;  %1400 = vmatprep.subr.mxu0 %v998_v31  ;;  %1432 = vmatprep.subr.mxu1 %v998_v31  ;;  %v217_v41 = vld [vmem:[#allocation2 + $0x71] sm:$0xff]  ;;  %v233_v45 = vld [vmem:[#allocation2 + $0x80] sm:$0xff] }
  0x90   :  { %v105_v19 = vpop.permute.xlu1 %104  ;;  %1401 = vmatpush3.msra.mxu0 %v998_v31  ;;  %1437 = vmatpush3.msra.mxu1 %v998_v31  ;;  %v241_v46 = vld [vmem:[#allocation2 + $0x81] sm:$0xff]  ;;  %v612_v51 = vld [vmem:[#allocation2 + $0xb1] sm:$0xff] }
  0x91   :  { %v139_v21 = vmax.f32 %v1662_v44, %v105_v19  ;;  %413 = vrot.lane.b32.xlu0 %v243_v20, %s1457_s26  ;;  %198 = vst.msk [vmem:[#allocation2 + $0xf1] sm:$0xff] %vm142_vm0, %v138_v18  ;;  %1402 = vmatprep.subr.mxu0 %v997_v32  ;;  %v1807_v44 = vld [vmem:[#allocation2 + $0x70] sm:$0xff]  ;;  %v202_v13 = vld [vmem:[#allocation2] sm:$0xff] }
  0x92   :  { %411 = vrot.lane.b32.xlu1 %v219_v4, %s1457_s26  ;;  %v107_v23 = vpop.permute.xlu0 %106  ;;  %1433 = vmatprep.subr.mxu1 %v997_v32  ;;  %v620_v58 = vld [vmem:[#allocation2 + $0xb2] sm:$0xff]  ;;  %v1846_v2 = vld [vmem:[#allocation2 + $0xc0] sm:$0xff] }
  0x93   :  { %199 = vst.msk [vmem:[#allocation2 + $0x101] sm:$0xff] %vm142_vm0, %v139_v21  ;;  %v140_v24 = vmax.f32 %v1672_v47, %v107_v23  ;;  %1403 = vmatpush3.msra.mxu0 %v997_v32  ;;  %1438 = vmatpush3.msra.mxu1 %v997_v32  ;;  %v1844_v1 = vld [vmem:[#allocation2 + $0xb0] sm:$0xff]  ;;  %v636_v9 = vld [vmem:[#allocation2 + $0xc1] sm:$0xff] }
  0x94   :  { %v109_v25 = vpop.permute.xlu1 %108  ;;  %1404 = vmatprep.subr.mxu0 %v996_v34  ;;  %1434 = vmatprep.subr.mxu1 %v996_v34  ;;  %v644_v16 = vld [vmem:[#allocation2 + $0xc2] sm:$0xff]  ;;  %v622_v21 = vld [vmem:[#allocation2 + $0xd2] sm:$0xff] }
  0x95   :  { %v141_v26 = vmax.f32 %v1676_v48, %v109_v25  ;;  %321 = vrot.lane.b32.xlu0 %v221_v22, %s1454_s0  ;;  %200 = vst.msk [vmem:[#allocation2 + $0x111] sm:$0xff] %vm142_vm0, %v140_v24  ;;  %1405 = vmatpush3.msra.mxu0 %v996_v34  ;;  %v249_v48 = vld [vmem:[#allocation2 + $0x82] sm:$0xff] }
  0x96   :  { %319 = vrot.lane.b32.xlu1 %v243_v20, %s1454_s0  ;;  %1439 = vmatpush3.msra.mxu1 %v996_v34  ;;  %v284_v47 = vpop.permute.xlu0 %283 }
  0x97   :  { %201 = vst.msk [vmem:[#allocation2 + $0x121] sm:$0xff] %vm142_vm0, %v141_v26  ;;  %v531_v17 = vsel %vm142_vm0, %v202_v13, %v284_v47  ;;  %v1876_v26 = vld [vmem:[#allocation2 + $0xd0] sm:$0xff] }
  0x99   :  { %445 = vrot.lane.b32.xlu0 %v1741_v27, %s1458_s27 }
  0x9a   :  { %443 = vrot.lane.b32.xlu1 %v1708_v7, %s1458_s27  ;;  %v316_v49 = vpop.permute.xlu0 %315 }
  0x9d   :  { %353 = vrot.lane.b32.xlu0 %v1747_v28, %s1455_s28 }
  0x9e   :  { %351 = vrot.lane.b32.xlu1 %v1741_v27, %s1455_s28 }
  0xa1   :  { %477 = vrot.lane.b32.xlu0 %v1718_v12, %s1459_s10 }
  0xa2   :  { %475 = vrot.lane.b32.xlu1 %v1706_v6, %s1459_s10 }
  0xa5   :  { %291 = vrot.lane.b32.xlu0 %v214_v33, %s1453_s24 }
  0xa6   :  { %383 = vrot.lane.b32.xlu1 %v1718_v12, %s1456_s25  ;;  %v614_v12 = vld [vmem:[#allocation2 + $0xd1] sm:$0xff] }
  0xa9   :  { %415 = vrot.lane.b32.xlu0 %v221_v22, %s1457_s26 }
  0xaa   :  { %507 = vrot.lane.b32.xlu1 %v243_v20, %s1460_s13  ;;  %v540_v20 = vsel %vm539_vm3, %v531_v17, %v316_v49  ;;  %v1949_v17 = vld [vmem:[#allocation2 + $0x100] sm:$0xff] }
  0xad   :  { %293 = vrot.lane.b32.xlu0 %v215_v35, %s1453_s24 }
  0xae   :  { %385 = vrot.lane.b32.xlu1 %v214_v33, %s1456_s25 }
  0xb1   :  { %417 = vrot.lane.b32.xlu0 %v245_v36, %s1457_s26 }
  0xb2   :  { %509 = vrot.lane.b32.xlu1 %v221_v22, %s1460_s13 }
  0xb5   :  { %325 = vrot.lane.b32.xlu0 %v223_v37, %s1454_s0 }
  0xb6   :  { %323 = vrot.lane.b32.xlu1 %v245_v36, %s1454_s0 }
  0xb9   :  { %449 = vrot.lane.b32.xlu0 %v1783_v38, %s1458_s27 }
  0xba   :  { %447 = vrot.lane.b32.xlu1 %v1747_v28, %s1458_s27 }
  0xbd   :  { %357 = vrot.lane.b32.xlu0 %v1789_v39, %s1455_s28 }
  0xbe   :  { %355 = vrot.lane.b32.xlu1 %v1783_v38, %s1455_s28 }
  0xc1   :  { %481 = vrot.lane.b32.xlu0 %v215_v35, %s1459_s10 }
  0xc2   :  { %479 = vrot.lane.b32.xlu1 %v214_v33, %s1459_s10 }
  0xc5   :  { %295 = vrot.lane.b32.xlu0 %v216_v40, %s1453_s24 }
  0xc6   :  { %387 = vrot.lane.b32.xlu1 %v215_v35, %s1456_s25 }
  0xc9   :  { %419 = vrot.lane.b32.xlu0 %v223_v37, %s1457_s26 }
  0xca   :  { %511 = vrot.lane.b32.xlu1 %v245_v36, %s1460_s13  ;;  %v1890_v36 = vld [vmem:[#allocation2 + $0xe0] sm:$0xff] }
  0xcd   :  { %297 = vrot.lane.b32.xlu0 %v217_v41, %s1453_s24 }
  0xce   :  { %389 = vrot.lane.b32.xlu1 %v216_v40, %s1456_s25 }
  0xd1   :  { %421 = vrot.lane.b32.xlu0 %v247_v42, %s1457_s26 }
  0xd2   :  { %513 = vrot.lane.b32.xlu1 %v223_v37, %s1460_s13 }
  0xd5   :  { %329 = vrot.lane.b32.xlu0 %v225_v43, %s1454_s0 }
  0xd6   :  { %327 = vrot.lane.b32.xlu1 %v247_v42, %s1454_s0 }
  0xd9   :  { %453 = vrot.lane.b32.xlu0 %v1807_v44, %s1458_s27 }
  0xda   :  { %451 = vrot.lane.b32.xlu1 %v1789_v39, %s1458_s27 }
  0xdd   :  { %361 = vrot.lane.b32.xlu0 %v233_v45, %s1455_s28 }
  0xde   :  { %359 = vrot.lane.b32.xlu1 %v1807_v44, %s1455_s28 }
  0xe1   :  { %485 = vrot.lane.b32.xlu0 %v217_v41, %s1459_s10 }
  0xe2   :  { %483 = vrot.lane.b32.xlu1 %v216_v40, %s1459_s10 }
  0xe5   :  { %393 = vrot.lane.b32.xlu0 %v241_v46, %s1456_s25 }
  0xe6   :  { %391 = vrot.lane.b32.xlu1 %v217_v41, %s1456_s25 }
  0xe9   :  { %517 = vrot.lane.b32.xlu0 %v225_v43, %s1460_s13 }
  0xea   :  { %515 = vrot.lane.b32.xlu1 %v247_v42, %s1460_s13 }
  0xed   :  { %425 = vrot.lane.b32.xlu0 %v249_v48, %s1457_s26 }
  0xee   :  { %423 = vrot.lane.b32.xlu1 %v225_v43, %s1457_s26 }
  0xf1   :  { %686 = vrot.lane.b32.xlu0 %v612_v51, %s1453_s24 }
  0xf2   :  { %684 = vrot.lane.b32.xlu1 %v611_v50, %s1453_s24  ;;  %v615_v50 = vld [vmem:[#allocation2 + $0xe1] sm:$0xff] }
  0xf3   :  { %v348_v54 = vpop.permute.xlu0 %347 }
  0xf4   :  { %v1826_v53 = vpop.permute.xlu1 %285  ;;  %v549_v22 = vsel %vm548_vm4, %v540_v20, %v348_v54 }
  0xf5   :  { %457 = vrot.lane.b32.xlu0 %v258_v52, %s1458_s27  ;;  %v532_v31 = vsel %vm142_vm0, %v1693_v62, %v1826_v53 }
  0xf6   :  { %455 = vrot.lane.b32.xlu1 %v233_v45, %s1458_s27 }
  0xf7   :  { %v380_v57 = vpop.permute.xlu0 %379 }
  0xf8   :  { %v1830_v56 = vpop.permute.xlu1 %317  ;;  %v558_v25 = vsel %vm557_vm5, %v549_v22, %v380_v57 }
  0xf9   :  { %718 = vrot.lane.b32.xlu0 %v620_v58, %s1454_s0  ;;  %v541_v35 = vsel %vm539_vm3, %v532_v31, %v1830_v56 }
  0xfa   :  { %716 = vrot.lane.b32.xlu1 %v619_v55, %s1454_s0  ;;  %v616_v55 = vld [vmem:[#allocation2 + $0xf1] sm:$0xff] }
  0xfb   :  { %v1836_v61 = vpop.permute.xlu0 %381 }
  0xfc   :  { %v1834_v60 = vpop.permute.xlu1 %349 }
  0xfd   :  { %489 = vrot.lane.b32.xlu0 %v266_v59, %s1459_s10  ;;  %v550_v40 = vsel %vm548_vm4, %v541_v35, %v1834_v60  ;;  %v618_v35 = vld [vmem:[#allocation2 + $0x111] sm:$0xff] }
  0xfe   :  { %487 = vrot.lane.b32.xlu1 %v241_v46, %s1459_s10  ;;  %v559_v42 = vsel %vm557_vm5, %v550_v40, %v1836_v61  ;;  %v624_v61 = vld [vmem:[#allocation2 + $0xf2] sm:$0xff] }
  0xff   :  { %v1842_v0 = vpop.permute.xlu0 %289 }
 0x100   :  { %v1840_v63 = vpop.permute.xlu1 %287 }
 0x101   :  { %750 = vrot.lane.b32.xlu0 %v1846_v2, %s1455_s28 }
 0x102   :  { %748 = vrot.lane.b32.xlu1 %v1844_v1, %s1455_s28 }
 0x103   :  { %v414_v5 = vpop.permute.xlu0 %413 }
 0x104   :  { %v412_v4 = vpop.permute.xlu1 %411  ;;  %v568_v43 = vsel %vm566_vm6, %v559_v42, %v414_v5 }
 0x105   :  { %521 = vrot.lane.b32.xlu0 %v274_v3, %s1460_s13  ;;  %v567_v29 = vsel %vm566_vm6, %v558_v25, %v412_v4  ;;  %v533_v3 = vsel %vm142_vm0, %v1708_v7, %v1840_v63 }
 0x106   :  { %519 = vrot.lane.b32.xlu1 %v249_v48, %s1460_s13 }
 0x107   :  { %v1856_v8 = vpop.permute.xlu0 %321 }
 0x108   :  { %v1854_v6 = vpop.permute.xlu1 %319 }
 0x109   :  { %782 = vrot.lane.b32.xlu0 %v636_v9, %s1456_s25  ;;  %v542_v4 = vsel %vm539_vm3, %v533_v3, %v1854_v6 }
 0x10a   :  { %780 = vrot.lane.b32.xlu1 %v612_v51, %s1456_s25 }
 0x10b   :  { %v446_v11 = vpop.permute.xlu0 %445 }
 0x10c   :  { %v444_v10 = vpop.permute.xlu1 %443  ;;  %v577_v45 = vsel %vm575_vm7, %v568_v43, %v446_v11 }
 0x10d   :  { %690 = vrot.lane.b32.xlu0 %v614_v12, %s1453_s24  ;;  %v576_v30 = vsel %vm575_vm7, %v567_v29, %v444_v10 }
 0x10e   :  { %688 = vrot.lane.b32.xlu1 %v636_v9, %s1453_s24 }
 0x10f   :  { %v1864_v15 = vpop.permute.xlu0 %353 }
 0x110   :  { %v1862_v14 = vpop.permute.xlu1 %351 }
 0x111   :  { %814 = vrot.lane.b32.xlu0 %v644_v16, %s1457_s26  ;;  %v551_v5 = vsel %vm548_vm4, %v542_v4, %v1862_v14  ;;  %v634_v4 = vld [vmem:[#allocation2 + $0x120] sm:$0xff] }
 0x112   :  { %812 = vrot.lane.b32.xlu1 %v620_v58, %s1457_s26  ;;  %v646_v58 = vld [vmem:[#allocation2 + $0xe2] sm:$0xff] }
 0x113   :  { %v478_v19 = vpop.permute.xlu0 %477 }
 0x114   :  { %v476_v18 = vpop.permute.xlu1 %475  ;;  %v586_v46 = vsel %vm584_vm8, %v577_v45, %v478_v19  ;;  %v626_v45 = vld [vmem:[#allocation2 + $0x112] sm:$0xff] }
 0x115   :  { %722 = vrot.lane.b32.xlu0 %v622_v21, %s1454_s0  ;;  %v585_v32 = vsel %vm584_vm8, %v576_v30, %v476_v18  ;;  %v534_v18 = vsel %vm142_vm0, %v1741_v27, %v1842_v0 }
 0x116   :  { %720 = vrot.lane.b32.xlu1 %v644_v16, %s1454_s0  ;;  %v543_v19 = vsel %vm539_vm3, %v534_v18, %v1856_v8 }
 0x117   :  { %v1873_v24 = vpop.permute.xlu0 %291  ;;  %v552_v20 = vsel %vm548_vm4, %v543_v19, %v1864_v15  ;;  %v617_v15 = vld [vmem:[#allocation2 + $0x101] sm:$0xff] }
 0x118   :  { %v384_v23 = vpop.permute.xlu1 %383 }
 0x119   :  { %846 = vrot.lane.b32.xlu0 %v1876_v26, %s1458_s27  ;;  %v560_v11 = vsel %vm557_vm5, %v551_v5, %v384_v23 }
 0x11a   :  { %844 = vrot.lane.b32.xlu1 %v1846_v2, %s1458_s27 }
 0x11b   :  { %v416_v34 = vpop.permute.xlu0 %415 }
 0x11c   :  { %v508_v33 = vpop.permute.xlu1 %507  ;;  %v569_v13 = vsel %vm566_vm6, %v560_v11, %v416_v34 }
 0x11d   :  { %v594_v37 = vsel %vm593_vm9, %v585_v32, %v508_v33  ;;  %754 = vrot.lane.b32.xlu0 %v1890_v36, %s1455_s28 }
 0x11e   :  { %752 = vrot.lane.b32.xlu1 %v1876_v26, %s1455_s28  ;;  %1406 = vmatprep.mubr.msk.f32.mxu0 %vm1001_vm10, %v594_v37 }
 0x11f   :  { %v1900_v41 = vpop.permute.xlu0 %293 }
 0x120   :  { %v386_v62 = vpop.permute.xlu1 %385 }
 0x121   :  { %878 = vrot.lane.b32.xlu0 %v614_v12, %s1459_s10  ;;  %v561_v23 = vsel %vm557_vm5, %v552_v20, %v386_v62  ;;  %v648_v62 = vld [vmem:[#allocation2 + $0x102] sm:$0xff] }
 0x122   :  { %876 = vrot.lane.b32.xlu1 %v636_v9, %s1459_s10  ;;  %v650_v20 = vld [vmem:[#allocation2 + $0x122] sm:$0xff] }
 0x123   :  { %v418_v48 = vpop.permute.xlu0 %417 }
 0x124   :  { %v510_v47 = vpop.permute.xlu1 %509  ;;  %v570_v27 = vsel %vm566_vm6, %v561_v23, %v418_v48 }
 0x125   :  { %v595_v49 = vsel %vm593_vm9, %v586_v46, %v510_v47  ;;  %692 = vrot.lane.b32.xlu0 %v615_v50, %s1453_s24  ;;  %v535_v46 = vsel %vm142_vm0, %v1747_v28, %v1873_v24  ;;  %v536_v47 = vsel %vm142_vm0, %v1783_v38, %v1900_v41 }
 0x126   :  { %784 = vrot.lane.b32.xlu1 %v614_v12, %s1456_s25  ;;  %1407 = vmatmul.mubr.msk.f32.vlgmr.msra.gmra.mxu0 %vm1001_vm10, %v595_v49  ;;  %v1939_v12 = vld [vmem:[#allocation2 + $0xf0] sm:$0xff] }
 0x127   :  { %v1915_v52 = vpop.permute.xlu0 %325 }
 0x128   :  { %v1913_v51 = vpop.permute.xlu1 %323  ;;  %v545_v49 = vsel %vm539_vm3, %v536_v47, %v1915_v52 }
 0x129   :  { %816 = vrot.lane.b32.xlu0 %v622_v21, %s1457_s26  ;;  %v544_v48 = vsel %vm539_vm3, %v535_v46, %v1913_v51 }
 0x12a   :  { %908 = vrot.lane.b32.xlu1 %v644_v16, %s1460_s13 }
 0x12b   :  { %v450_v54 = vpop.permute.xlu0 %449 }
 0x12c   :  { %v448_v53 = vpop.permute.xlu1 %447  ;;  %v579_v0 = vsel %vm575_vm7, %v570_v27, %v450_v54  ;;  %v2007_v54 = vld [vmem:[#allocation2 + $0x110] sm:$0xff] }
 0x12d   :  { %694 = vrot.lane.b32.xlu0 %v616_v55, %s1453_s24  ;;  %v578_v7 = vsel %vm575_vm7, %v569_v13, %v448_v53 }
 0x12e   :  { %786 = vrot.lane.b32.xlu1 %v615_v50, %s1456_s25 }
 0x12f   :  { %v1923_v57 = vpop.permute.xlu0 %357 }
 0x130   :  { %v1921_v56 = vpop.permute.xlu1 %355  ;;  %v554_v28 = vsel %vm548_vm4, %v545_v49, %v1923_v57 }
 0x131   :  { %818 = vrot.lane.b32.xlu0 %v646_v58, %s1457_s26 }
 0x132   :  { %910 = vrot.lane.b32.xlu1 %v622_v21, %s1460_s13 }
 0x133   :  { %v482_v60 = vpop.permute.xlu0 %481 }
 0x134   :  { %v480_v59 = vpop.permute.xlu1 %479  ;;  %v588_v8 = vsel %vm584_vm8, %v579_v0, %v482_v60 }
 0x135   :  { %726 = vrot.lane.b32.xlu0 %v624_v61, %s1454_s0  ;;  %v587_v63 = vsel %vm584_vm8, %v578_v7, %v480_v59  ;;  %v642_v7 = vld [vmem:[#allocation2 + $0x121] sm:$0xff] }
 0x136   :  { %724 = vrot.lane.b32.xlu1 %v646_v58, %s1454_s0 }
 0x137   :  { %v1936_v10 = vpop.permute.xlu0 %295 }
 0x138   :  { %v388_v9 = vpop.permute.xlu1 %387 }
 0x139   :  { %850 = vrot.lane.b32.xlu0 %v1939_v12, %s1458_s27 }
 0x13a   :  { %848 = vrot.lane.b32.xlu1 %v1890_v36, %s1458_s27 }
 0x13b   :  { %v420_v14 = vpop.permute.xlu0 %419 }
 0x13c   :  { %v512_v6 = vpop.permute.xlu1 %511 }
 0x13d   :  { %v596_v16 = vsel %vm593_vm9, %v587_v63, %v512_v6  ;;  %758 = vrot.lane.b32.xlu0 %v1949_v17, %s1455_s28 }
 0x13e   :  { %756 = vrot.lane.b32.xlu1 %v1939_v12, %s1455_s28  ;;  %1409 = vmatprep.mubr.msk.f32.mxu0 %vm1001_vm10, %v596_v16 }
 0x13f   :  { %v1963_v22 = vpop.permute.xlu0 %297 }
 0x140   :  { %v390_v21 = vpop.permute.xlu1 %389  ;;  %v538_v23 = vsel %vm142_vm0, %v1807_v44, %v1963_v22 }
 0x141   :  { %882 = vrot.lane.b32.xlu0 %v616_v55, %s1459_s10  ;;  %v563_v41 = vsel %vm557_vm5, %v554_v28, %v390_v21  ;;  %v537_v21 = vsel %vm142_vm0, %v1789_v39, %v1936_v10 }
 0x142   :  { %880 = vrot.lane.b32.xlu1 %v615_v50, %s1459_s10  ;;  %v553_v50 = vsel %vm548_vm4, %v544_v48, %v1921_v56 }
 0x143   :  { %v422_v29 = vpop.permute.xlu0 %421  ;;  %v562_v38 = vsel %vm557_vm5, %v553_v50, %v388_v9 }
 0x144   :  { %v514_v25 = vpop.permute.xlu1 %513  ;;  %v572_v51 = vsel %vm566_vm6, %v563_v41, %v422_v29 }
 0x145   :  { %v597_v30 = vsel %vm593_vm9, %v588_v8, %v514_v25  ;;  %696 = vrot.lane.b32.xlu0 %v617_v15, %s1453_s24  ;;  %v659_v8 = vld [vmem:[#allocation2 + $0x130] sm:$0xff] }
 0x146   :  { %788 = vrot.lane.b32.xlu1 %v616_v55, %s1456_s25  ;;  %1410 = vmatmul.mubr.msk.f32.gmra.mxu0 %vm1001_vm10, %v597_v30  ;;  %v571_v55 = vsel %vm566_vm6, %v562_v38, %v420_v14 }
 0x147   :  { %v1977_v32 = vpop.permute.xlu0 %329 }
 0x148   :  { %v1975_v31 = vpop.permute.xlu1 %327  ;;  %v547_v0 = vsel %vm539_vm3, %v538_v23, %v1977_v32 }
 0x149   :  { %820 = vrot.lane.b32.xlu0 %v624_v61, %s1457_s26  ;;  %v546_v27 = vsel %vm539_vm3, %v537_v21, %v1975_v31 }
 0x14a   :  { %912 = vrot.lane.b32.xlu1 %v646_v58, %s1460_s13 }
 0x14b   :  { %v454_v34 = vpop.permute.xlu0 %453 }
 0x14c   :  { %v452_v33 = vpop.permute.xlu1 %451  ;;  %v581_v56 = vsel %vm575_vm7, %v572_v51, %v454_v34  ;;  %v603_v51 = vld [vmem:[#allocation2 + $0xa0] sm:$0xff] }
 0x14d   :  { %698 = vrot.lane.b32.xlu0 %v618_v35, %s1453_s24  ;;  %v580_v52 = vsel %vm575_vm7, %v571_v55, %v452_v33  ;;  %v667_v33 = vld [vmem:[#allocation2 + $0x131] sm:$0xff] }
 0x14e   :  { %790 = vrot.lane.b32.xlu1 %v617_v15, %s1456_s25 }
 0x14f   :  { %v1985_v40 = vpop.permute.xlu0 %361 }
 0x150   :  { %v1983_v37 = vpop.permute.xlu1 %359  ;;  %v556_v39 = vsel %vm548_vm4, %v547_v0, %v1985_v40 }
 0x151   :  { %822 = vrot.lane.b32.xlu0 %v648_v62, %s1457_s26  ;;  %v555_v25 = vsel %vm548_vm4, %v546_v27, %v1983_v37 }
 0x152   :  { %914 = vrot.lane.b32.xlu1 %v624_v61, %s1460_s13 }
 0x153   :  { %v486_v43 = vpop.permute.xlu0 %485 }
 0x154   :  { %v484_v42 = vpop.permute.xlu1 %483  ;;  %v590_v58 = vsel %vm584_vm8, %v581_v56, %v486_v43  ;;  %v675_v43 = vld [vmem:[#allocation2 + $0x132] sm:$0xff] }
 0x155   :  { %730 = vrot.lane.b32.xlu0 %v626_v45, %s1454_s0  ;;  %v589_v57 = vsel %vm584_vm8, %v580_v52, %v484_v42 }
 0x156   :  { %728 = vrot.lane.b32.xlu1 %v648_v62, %s1454_s0 }
 0x157   :  { %v394_v53 = vpop.permute.xlu0 %393 }
 0x158   :  { %v392_v24 = vpop.permute.xlu1 %391  ;;  %v565_v22 = vsel %vm557_vm5, %v556_v39, %v394_v53 }
 0x159   :  { %854 = vrot.lane.b32.xlu0 %v2007_v54, %s1458_s27  ;;  %v564_v44 = vsel %vm557_vm5, %v555_v25, %v392_v24 }
 0x15a   :  { %852 = vrot.lane.b32.xlu1 %v1949_v17, %s1458_s27 }
 0x15b   :  { %v518_v60 = vpop.permute.xlu0 %517 }
 0x15c   :  { %v516_v59 = vpop.permute.xlu1 %515  ;;  %v599_v3 = vsel %vm593_vm9, %v590_v58, %v518_v60 }
 0x15d   :  { %v598_v61 = vsel %vm593_vm9, %v589_v57, %v516_v59  ;;  %762 = vrot.lane.b32.xlu0 %v634_v4, %s1455_s28 }
 0x15e   :  { %760 = vrot.lane.b32.xlu1 %v2007_v54, %s1455_s28  ;;  %1412 = vmatprep.mubr.msk.f32.mxu0 %vm1001_vm10, %v598_v61 }
 0x15f   :  { %1413 = vmatmul.mubr.msk.f32.gmra.mxu0 %vm1001_vm10, %v599_v3  ;;  %v426_v9 = vpop.permute.xlu0 %425 }
 0x160   :  { %v424_v5 = vpop.permute.xlu1 %423 }
 0x161   :  { %886 = vrot.lane.b32.xlu0 %v618_v35, %s1459_s10  ;;  %v573_v30 = vsel %vm566_vm6, %v564_v44, %v424_v5 }
 0x162   :  { %884 = vrot.lane.b32.xlu1 %v617_v15, %s1459_s10  ;;  %v574_v15 = vsel %vm566_vm6, %v565_v22, %v426_v9 }
 0x163   :  { %v2030_v13 = vpop.permute.xlu0 %686 }
 0x164   :  { %v2028_v11 = vpop.permute.xlu1 %684 }
 0x165   :  { %794 = vrot.lane.b32.xlu0 %v642_v7, %s1456_s25  ;;  %v932_v57 = vsel %vm142_vm0, %v603_v51, %v2028_v11  ;;  %v933_v11 = vsel %vm142_vm0, %v1844_v1, %v2030_v13 }
 0x166   :  { %792 = vrot.lane.b32.xlu1 %v618_v35, %s1456_s25 }
 0x167   :  { %v458_v6 = vpop.permute.xlu0 %457 }
 0x168   :  { %v456_v63 = vpop.permute.xlu1 %455  ;;  %v583_v32 = vsel %vm575_vm7, %v574_v15, %v458_v6 }
 0x169   :  { %918 = vrot.lane.b32.xlu0 %v626_v45, %s1460_s13  ;;  %v582_v31 = vsel %vm575_vm7, %v573_v30, %v456_v63 }
 0x16a   :  { %916 = vrot.lane.b32.xlu1 %v648_v62, %s1460_s13 }
 0x16b   :  { %v2036_v16 = vpop.permute.xlu0 %718 }
 0x16c   :  { %v717_v14 = vpop.permute.xlu1 %716 }
 0x16d   :  { %856 = vrot.lane.b32.xlu0 %v634_v4, %s1458_s27  ;;  %v940_v58 = vsel %vm539_vm3, %v932_v57, %v717_v14  ;;  %v941_v14 = vsel %vm539_vm3, %v933_v11, %v2036_v16 }
 0x16e   :  { %824 = vrot.lane.b32.xlu1 %v626_v45, %s1457_s26 }
 0x16f   :  { %v490_v19 = vpop.permute.xlu0 %489 }
 0x170   :  { %v488_v18 = vpop.permute.xlu1 %487  ;;  %v592_v35 = vsel %vm584_vm8, %v583_v32, %v490_v19 }
 0x171   :  { %888 = vrot.lane.b32.xlu0 %v642_v7, %s1459_s10  ;;  %v591_v34 = vsel %vm584_vm8, %v582_v31, %v488_v18 }
 0x172   :  { %826 = vrot.lane.b32.xlu1 %v650_v20, %s1457_s26 }
 0x173   :  { %v751_v29 = vpop.permute.xlu0 %750 }
 0x174   :  { %v749_v10 = vpop.permute.xlu1 %748  ;;  %v949_v18 = vsel %vm548_vm4, %v941_v14, %v751_v29 }
 0x175   :  { %920 = vrot.lane.b32.xlu0 %v650_v20, %s1460_s13  ;;  %v948_v59 = vsel %vm548_vm4, %v940_v58, %v749_v10 }
 0x176   :  { %858 = vrot.lane.b32.xlu1 %v659_v8, %s1458_s27 }
 0x177   :  { %v522_v40 = vpop.permute.xlu0 %521 }
 0x178   :  { %v520_v37 = vpop.permute.xlu1 %519  ;;  %v601_v42 = vsel %vm593_vm9, %v592_v35, %v522_v40 }
 0x179   :  { %v600_v62 = vsel %vm593_vm9, %v591_v34, %v520_v37 }
 0x17a   :  { %890 = vrot.lane.b32.xlu1 %v667_v33, %s1459_s10  ;;  %1415 = vmatprep.mubr.msk.f32.mxu0 %vm1001_vm10, %v600_v62 }
 0x17b   :  { %1416 = vmatmul.mubr.msk.f32.gmra.mxu0 %vm1001_vm10, %v601_v42  ;;  %v783_v46 = vpop.permute.xlu0 %782 }
 0x17c   :  { %v781_v45 = vpop.permute.xlu1 %780  ;;  %v957_v21 = vsel %vm557_vm5, %v949_v18, %v783_v46 }
 0x17d   :  { %v956_v3 = vsel %vm557_vm5, %v948_v59, %v781_v45 }
 0x17e   :  { %922 = vrot.lane.b32.xlu1 %v675_v43, %s1460_s13 }
 0x17f   :  { %v691_v48 = vpop.permute.xlu0 %690 }
 0x180   :  { %v689_v47 = vpop.permute.xlu1 %688 }
 0x181   :  { %v934_v15 = vsel %vm142_vm0, %v1846_v2, %v689_v47  ;;  %v935_v2 = vsel %vm142_vm0, %v1876_v26, %v691_v48 }
 0x183   :  { %v815_v50 = vpop.permute.xlu0 %814 }
 0x184   :  { %v813_v49 = vpop.permute.xlu1 %812  ;;  %v965_v23 = vsel %vm566_vm6, %v957_v21, %v815_v50 }
 0x185   :  { %v964_v4 = vsel %vm566_vm6, %v956_v3, %v813_v49 }
 0x187   :  { %v723_v24 = vpop.permute.xlu0 %722 }
 0x188   :  { %v721_v28 = vpop.permute.xlu1 %720  ;;  %v943_v46 = vsel %vm539_vm3, %v935_v2, %v723_v24 }
 0x189   :  { %v942_v31 = vsel %vm539_vm3, %v934_v15, %v721_v28 }
 0x18b   :  { %v847_v38 = vpop.permute.xlu0 %846 }
 0x18c   :  { %v845_v53 = vpop.permute.xlu1 %844  ;;  %v973_v27 = vsel %vm575_vm7, %v965_v23, %v847_v38 }
 0x18d   :  { %v972_v5 = vsel %vm575_vm7, %v964_v4, %v845_v53 }
 0x18f   :  { %v755_v55 = vpop.permute.xlu0 %754 }
 0x190   :  { %v753_v41 = vpop.permute.xlu1 %752  ;;  %v951_v47 = vsel %vm548_vm4, %v943_v46, %v755_v55 }
 0x191   :  { %v950_v32 = vsel %vm548_vm4, %v942_v31, %v753_v41 }
 0x193   :  { %v879_v56 = vpop.permute.xlu0 %878 }
 0x194   :  { %v877_v52 = vpop.permute.xlu1 %876  ;;  %v981_v0 = vsel %vm584_vm8, %v973_v27, %v879_v56 }
 0x195   :  { %v980_v9 = vsel %vm584_vm8, %v972_v5, %v877_v52 }
 0x197   :  { %v2076_v61 = vpop.permute.xlu0 %692 }
 0x198   :  { %v785_v60 = vpop.permute.xlu1 %784  ;;  %v936_v3 = vsel %vm142_vm0, %v1890_v36, %v2076_v61 }
 0x199   :  { %v958_v35 = vsel %vm557_vm5, %v950_v32, %v785_v60 }
 0x19b   :  { %v817_v63 = vpop.permute.xlu0 %816 }
 0x19c   :  { %v909_v7 = vpop.permute.xlu1 %908  ;;  %v966_v37 = vsel %vm566_vm6, %v958_v35, %v817_v63 }
 0x19d   :  { %v988_v6 = vsel %vm593_vm9, %v980_v9, %v909_v7 }
 0x19e   :  { %1418 = vmatprep.mubr.msk.f32.mxu1 %vm1001_vm10, %v988_v6 }
 0x19f   :  { %v695_v20 = vpop.permute.xlu0 %694 }
 0x1a0   :  { %v787_v19 = vpop.permute.xlu1 %786  ;;  %v937_v4 = vsel %vm142_vm0, %v1939_v12, %v695_v20 }
 0x1a1   :  { %v959_v28 = vsel %vm557_vm5, %v951_v47, %v787_v19 }
 0x1a3   :  { %v819_v25 = vpop.permute.xlu0 %818 }
 0x1a4   :  { %v911_v8 = vpop.permute.xlu1 %910  ;;  %v967_v53 = vsel %vm566_vm6, %v959_v28, %v819_v25 }
 0x1a5   :  { %v989_v1 = vsel %vm593_vm9, %v981_v0, %v911_v8 }
 0x1a6   :  { %1419 = vmatmul.mubr.msk.f32.vlgmr.msra.gmra.mxu1 %vm1001_vm10, %v989_v1 }
 0x1a7   :  { %v727_v16 = vpop.permute.xlu0 %726 }
 0x1a8   :  { %v725_v13 = vpop.permute.xlu1 %724  ;;  %v945_v9 = vsel %vm539_vm3, %v937_v4, %v727_v16 }
 0x1a9   :  { %v944_v5 = vsel %vm539_vm3, %v936_v3, %v725_v13 }
 0x1ab   :  { %v851_v10 = vpop.permute.xlu0 %850 }
 0x1ac   :  { %v849_v39 = vpop.permute.xlu1 %848  ;;  %v975_v38 = vsel %vm575_vm7, %v967_v53, %v851_v10 }
 0x1ad   :  { %v974_v40 = vsel %vm575_vm7, %v966_v37, %v849_v39 }
 0x1af   :  { %v759_v44 = vpop.permute.xlu0 %758 }
 0x1b0   :  { %v757_v29 = vpop.permute.xlu1 %756  ;;  %v953_v63 = vsel %vm548_vm4, %v945_v9, %v759_v44 }
 0x1b1   :  { %v952_v7 = vsel %vm548_vm4, %v944_v5, %v757_v29 }
 0x1b3   :  { %v883_v30 = vpop.permute.xlu0 %882 }
 0x1b4   :  { %v881_v22 = vpop.permute.xlu1 %880  ;;  %v983_v41 = vsel %vm584_vm8, %v975_v38, %v883_v30 }
 0x1b5   :  { %v982_v62 = vsel %vm584_vm8, %v974_v40, %v881_v22 }
 0x1b7   :  { %v697_v34 = vpop.permute.xlu0 %696 }
 0x1b8   :  { %v789_v33 = vpop.permute.xlu1 %788  ;;  %v938_v25 = vsel %vm142_vm0, %v1949_v17, %v697_v34 }
 0x1b9   :  { %v960_v14 = vsel %vm557_vm5, %v952_v7, %v789_v33 }
 0x1bb   :  { %v821_v43 = vpop.permute.xlu0 %820 }
 0x1bc   :  { %v913_v42 = vpop.permute.xlu1 %912  ;;  %v968_v19 = vsel %vm566_vm6, %v960_v14, %v821_v43 }
 0x1bd   :  { %v990_v45 = vsel %vm593_vm9, %v982_v62, %v913_v42 }
 0x1be   :  { %1421 = vmatprep.mubr.msk.f32.mxu1 %vm1001_vm10, %v990_v45 }
 0x1bf   :  { %v699_v50 = vpop.permute.xlu0 %698 }
 0x1c0   :  { %v791_v49 = vpop.permute.xlu1 %790  ;;  %v939_v37 = vsel %vm142_vm0, %v2007_v54, %v699_v50 }
 0x1c1   :  { %v961_v18 = vsel %vm557_vm5, %v953_v63, %v791_v49 }
 0x1c3   :  { %v823_v52 = vpop.permute.xlu0 %822 }
 0x1c4   :  { %v915_v51 = vpop.permute.xlu1 %914  ;;  %v969_v36 = vsel %vm566_vm6, %v961_v18, %v823_v52 }
 0x1c5   :  { %v991_v26 = vsel %vm593_vm9, %v983_v41, %v915_v51 }
 0x1c6   :  { %1422 = vmatmul.mubr.msk.f32.gmra.mxu1 %vm1001_vm10, %v991_v26 }
 0x1c7   :  { %v731_v24 = vpop.permute.xlu0 %730 }
 0x1c8   :  { %v729_v48 = vpop.permute.xlu1 %728  ;;  %v947_v43 = vsel %vm539_vm3, %v939_v37, %v731_v24 }
 0x1c9   :  { %v946_v16 = vsel %vm539_vm3, %v938_v25, %v729_v48 }
 0x1cb   :  { %v855_v55 = vpop.permute.xlu0 %854 }
 0x1cc   :  { %v853_v56 = vpop.permute.xlu1 %852  ;;  %v977_v61 = vsel %vm575_vm7, %v969_v36, %v855_v55 }
 0x1cd   :  { %v976_v12 = vsel %vm575_vm7, %v968_v19, %v853_v56 }
 0x1cf   :  { %v763_v58 = vpop.permute.xlu0 %762 }
 0x1d0   :  { %v761_v57 = vpop.permute.xlu1 %760  ;;  %v955_v2 = vsel %vm548_vm4, %v947_v43, %v763_v58 }
 0x1d1   :  { %v954_v39 = vsel %vm548_vm4, %v946_v16, %v761_v57 }
 0x1d3   :  { %v887_v60 = vpop.permute.xlu0 %886 }
 0x1d4   :  { %v885_v59 = vpop.permute.xlu1 %884  ;;  %v985_v21 = vsel %vm584_vm8, %v977_v61, %v887_v60 }
 0x1d5   :  { %v984_v20 = vsel %vm584_vm8, %v976_v12, %v885_v59 }
 0x1d7   :  { %v795_v11 = vpop.permute.xlu0 %794 }
 0x1d8   :  { %v793_v6 = vpop.permute.xlu1 %792  ;;  %v963_v54 = vsel %vm557_vm5, %v955_v2, %v795_v11 }
 0x1d9   :  { %v962_v10 = vsel %vm557_vm5, %v954_v39, %v793_v6 }
 0x1db   :  { %v919_v27 = vpop.permute.xlu0 %918 }
 0x1dc   :  { %v917_v23 = vpop.permute.xlu1 %916  ;;  %v993_v8 = vsel %vm593_vm9, %v985_v21, %v919_v27 }
 0x1dd   :  { %v992_v0 = vsel %vm593_vm9, %v984_v20, %v917_v23 }
 0x1de   :  { %1424 = vmatprep.mubr.msk.f32.mxu1 %vm1001_vm10, %v992_v0 }
 0x1df   :  { %1425 = vmatmul.mubr.msk.f32.gmra.mxu1 %vm1001_vm10, %v993_v8  ;;  %v857_v13 = vpop.permute.xlu0 %856 }
 0x1e0   :  { %v825_v1 = vpop.permute.xlu1 %824 }
 0x1e1   :  { %v970_v29 = vsel %vm566_vm6, %v962_v10, %v825_v1 }
 0x1e2   :  { %v978_v30 = vsel %vm575_vm7, %v970_v29, %v857_v13 }
 0x1e3   :  { %v889_v22 = vpop.permute.xlu0 %888 }
 0x1e4   :  { %v827_v44 = vpop.permute.xlu1 %826  ;;  %v986_v31 = vsel %vm584_vm8, %v978_v30, %v889_v22 }
 0x1e5   :  { %v971_v28 = vsel %vm566_vm6, %v963_v54, %v827_v44 }
 0x1e6   :  { %v1408_v15 = vpop.f32.mrf.mxu0 }
 0x1e7   :  { %v1237_v32 = vmul.f32 %v1408_v15, %v1408_v15  ;;  %v921_v17 = vpop.permute.xlu0 %920  ;;  %v1200_v40 = vsel %vm539_vm3, %v1408_v15, 0.0 }
 0x1e8   :  { %v859_v33 = vpop.permute.xlu1 %858  ;;  %v1120_v34 = vpop.f32.mrf.mxu0  ;;  %v994_v35 = vsel %vm593_vm9, %v986_v31, %v921_v17 }
 0x1e9   :  { %v1199_v62 = vsel %vm539_vm3, %v1120_v34, 0.0  ;;  %v1236_v42 = vmul.f32 %v1120_v34, %v1120_v34  ;;  %1293 = vxpose.xlu0.b32.start [1/16] (narrow) %v1120_v34, 8  ;;  %1427 = vmatprep.mubr.msk.f32.mxu1 %vm1001_vm10, %v994_v35  ;;  %v1253_v46 = vsel %vm539_vm3, %v1237_v32, 0.0  ;;  %v979_v53 = vsel %vm575_vm7, %v971_v28, %v859_v33 }
 0x1ea   :  { %v1201_v45 = vadd.f32 %v1200_v40, %v1199_v62 }
 0x1eb   :  { %v1252_v47 = vsel %vm539_vm3, %v1236_v42, 0.0 }
 0x1ec   :  { %v891_v49 = vpop.permute.xlu1 %890  ;;  %v1254_v50 = vadd.f32 %v1253_v46, %v1252_v47 }
 0x1ed   :  { %1294 = vxpose.xlu0.b32.cont [2/16] (narrow) %v1408_v15, 8  ;;  %v987_v38 = vsel %vm584_vm8, %v979_v53, %v891_v49 }
 0x1f0   :  { %v923_v41 = vpop.permute.xlu1 %922 }
 0x1f1   :  { %v995_v51 = vsel %vm593_vm9, %v987_v38, %v923_v41 }
 0x1f2   :  { %1428 = vmatmul.mubr.msk.f32.gmra.mxu1 %vm1001_vm10, %v995_v51 }
 0x206   :  { %v1411_v52 = vpop.f32.mrf.mxu0 }
 0x207   :  { %v1239_v48 = vmul.f32 %v1411_v52, %v1411_v52  ;;  %v1204_v57 = vsel %vm539_vm3, %v1411_v52, 0.0 }
 0x208   :  { %v1130_v26 = vpop.f32.mrf.mxu0 }
 0x209   :  { %v1202_v24 = vsel %vm539_vm3, %v1130_v26, 0.0  ;;  %v1238_v56 = vmul.f32 %v1130_v26, %v1130_v26  ;;  %1295 = vxpose.xlu0.b32.cont [3/16] (narrow) %v1130_v26, 8  ;;  %v1257_v3 = vsel %vm539_vm3, %v1239_v48, 0.0 }
 0x20a   :  { %v1203_v55 = vadd.f32 %v1202_v24, %v1201_v45 }
 0x20b   :  { %v1255_v58 = vsel %vm539_vm3, %v1238_v56, 0.0 }
 0x20c   :  { %v1256_v59 = vadd.f32 %v1255_v58, %v1254_v50  ;;  %v1205_v60 = vadd.f32 %v1204_v57, %v1203_v55 }
 0x20d   :  { %1296 = vxpose.xlu0.b32.cont [4/16] (narrow) %v1411_v52, 8 }
 0x20e   :  { %v1258_v4 = vadd.f32 %v1257_v3, %v1256_v59 }
 0x21f   :  { %v1414_v5 = vpop.f32.mrf.mxu0 }
 0x220   :  { %v1241_v7 = vmul.f32 %v1414_v5, %v1414_v5  ;;  %v1208_v14 = vsel %vm539_vm3, %v1414_v5, 0.0 }
 0x221   :  { %v1140_v9 = vpop.f32.mrf.mxu0 }
 0x222   :  { %v1206_v63 = vsel %vm539_vm3, %v1140_v9, 0.0  ;;  %v1240_v6 = vmul.f32 %v1140_v9, %v1140_v9  ;;  %1297 = vxpose.xlu0.b32.cont [5/16] (narrow) %v1140_v9, 8  ;;  %v1261_v12 = vsel %vm539_vm3, %v1241_v7, 0.0 }
 0x223   :  { %v1207_v11 = vadd.f32 %v1206_v63, %v1205_v60 }
 0x224   :  { %v1259_v18 = vsel %vm539_vm3, %v1240_v6, 0.0 }
 0x225   :  { %v1260_v19 = vadd.f32 %v1259_v18, %v1258_v4  ;;  %v1209_v36 = vadd.f32 %v1208_v14, %v1207_v11 }
 0x226   :  { %1298 = vxpose.xlu0.b32.cont [6/16] (narrow) %v1414_v5, 8 }
 0x227   :  { %v1262_v61 = vadd.f32 %v1261_v12, %v1260_v19 }
 0x23b   :  { %v1417_v20 = vpop.f32.mrf.mxu0 }
 0x23c   :  { %v1243_v23 = vmul.f32 %v1417_v20, %v1417_v20  ;;  %v1212_v25 = vsel %vm539_vm3, %v1417_v20, 0.0 }
 0x23d   :  { %v1150_v21 = vpop.f32.mrf.mxu0 }
 0x23e   :  { %v1210_v27 = vsel %vm539_vm3, %v1150_v21, 0.0  ;;  %v1242_v0 = vmul.f32 %v1150_v21, %v1150_v21  ;;  %1299 = vxpose.xlu0.b32.cont [7/16] (narrow) %v1150_v21, 8  ;;  %v1265_v39 = vsel %vm539_vm3, %v1243_v23, 0.0 }
 0x23f   :  { %v1211_v8 = vadd.f32 %v1210_v27, %v1209_v36 }
 0x240   :  { %v1263_v1 = vsel %vm539_vm3, %v1242_v0, 0.0 }
 0x241   :  { %v1213_v13 = vadd.f32 %v1212_v25, %v1211_v8  ;;  %v1264_v16 = vadd.f32 %v1263_v1, %v1262_v61 }
 0x242   :  { %1300 = vxpose.xlu0.b32.cont [8/16] (narrow) %v1417_v20, 8 }
 0x243   :  { %v1266_v10 = vadd.f32 %v1265_v39, %v1264_v16 }
 0x266   :  { %v1420_v29 = vpop.f32.mrf.mxu1 }
 0x267   :  { %v1245_v22 = vmul.f32 %v1420_v29, %v1420_v29  ;;  %v1216_v32 = vsel %vm539_vm3, %v1420_v29, 0.0 }
 0x268   :  { %v1160_v44 = vpop.f32.mrf.mxu1 }
 0x269   :  { %v1214_v30 = vsel %vm539_vm3, %v1160_v44, 0.0  ;;  %v1244_v15 = vmul.f32 %v1160_v44, %v1160_v44  ;;  %1301 = vxpose.xlu0.b32.cont [9/16] (narrow) %v1160_v44, 8  ;;  %v1269_v35 = vsel %vm539_vm3, %v1245_v22, 0.0 }
 0x26a   :  { %v1215_v31 = vadd.f32 %v1214_v30, %v1213_v13 }
 0x26b   :  { %v1267_v33 = vsel %vm539_vm3, %v1244_v15, 0.0 }
 0x26c   :  { %v1268_v17 = vadd.f32 %v1267_v33, %v1266_v10  ;;  %v1217_v34 = vadd.f32 %v1216_v32, %v1215_v31 }
 0x26d   :  { %1302 = vxpose.xlu0.b32.cont [10/16] (narrow) %v1420_v29, 8 }
 0x26e   :  { %v1270_v37 = vadd.f32 %v1269_v35, %v1268_v17 }
 0x286   :  { %v1423_v40 = vpop.f32.mrf.mxu1 }
 0x287   :  { %v1247_v49 = vmul.f32 %v1423_v40, %v1423_v40  ;;  %v1220_v28 = vsel %vm539_vm3, %v1423_v40, 0.0 }
 0x288   :  { %v1170_v62 = vpop.f32.mrf.mxu1 }
 0x289   :  { %1303 = vxpose.xlu0.b32.cont [11/16] (narrow) %v1170_v62, 8  ;;  %v1246_v45 = vmul.f32 %v1170_v62, %v1170_v62  ;;  %v1218_v2 = vsel %vm539_vm3, %v1170_v62, 0.0  ;;  %v1273_v41 = vsel %vm539_vm3, %v1247_v49, 0.0 }
 0x28a   :  { %v1219_v47 = vadd.f32 %v1218_v2, %v1217_v34 }
 0x28b   :  { %v1271_v46 = vsel %vm539_vm3, %v1246_v45, 0.0 }
 0x28c   :  { %v1272_v50 = vadd.f32 %v1271_v46, %v1270_v37  ;;  %v1221_v38 = vadd.f32 %v1220_v28, %v1219_v47 }
 0x28d   :  { %1304 = vxpose.xlu0.b32.cont [12/16] (narrow) %v1423_v40, 8 }
 0x28e   :  { %v1274_v26 = vadd.f32 %v1273_v41, %v1272_v50 }
 0x29f   :  { %v1426_v42 = vpop.f32.mrf.mxu1 }
 0x2a0   :  { %v1249_v48 = vmul.f32 %v1426_v42, %v1426_v42  ;;  %v1224_v55 = vsel %vm539_vm3, %v1426_v42, 0.0 }
 0x2a1   :  { %v1180_v43 = vpop.f32.mrf.mxu1 }
 0x2a2   :  { %1305 = vxpose.xlu0.b32.cont [13/16] (narrow) %v1180_v43, 8  ;;  %v1248_v54 = vmul.f32 %v1180_v43, %v1180_v43  ;;  %v1222_v53 = vsel %vm539_vm3, %v1180_v43, 0.0  ;;  %v1277_v59 = vsel %vm539_vm3, %v1249_v48, 0.0 }
 0x2a3   :  { %v1223_v52 = vadd.f32 %v1222_v53, %v1221_v38 }
 0x2a4   :  { %v1275_v51 = vsel %vm539_vm3, %v1248_v54, 0.0 }
 0x2a5   :  { %v1276_v24 = vadd.f32 %v1275_v51, %v1274_v26  ;;  %v1225_v58 = vadd.f32 %v1224_v55, %v1223_v52 }
 0x2a6   :  { %1306 = vxpose.xlu0.b32.cont [14/16] (narrow) %v1426_v42, 8 }
 0x2a7   :  { %v1278_v9 = vadd.f32 %v1277_v59, %v1276_v24 }
 0x2b2   :  { %v1429_v56 = vpop.f32.mrf.mxu1 }
 0x2b3   :  { %v1251_v60 = vmul.f32 %v1429_v56, %v1429_v56  ;;  %v1228_v7 = vsel %vm539_vm3, %v1429_v56, 0.0 }
 0x2b4   :  { %v1190_v57 = vpop.f32.mrf.mxu1 }
 0x2b5   :  { %v1226_v3 = vsel %vm539_vm3, %v1190_v57, 0.0  ;;  %v1250_v4 = vmul.f32 %v1190_v57, %v1190_v57  ;;  %1307 = vxpose.xlu0.b32.cont [15/16] (narrow) %v1190_v57, 8  ;;  %v1281_v14 = vsel %vm539_vm3, %v1251_v60, 0.0 }
 0x2b6   :  { %v1227_v5 = vadd.f32 %v1226_v3, %v1225_v58 }
 0x2b7   :  { %v1279_v63 = vsel %vm539_vm3, %v1250_v4, 0.0 }
 0x2b8   :  { %v1229_v6 = vadd.f32 %v1228_v7, %v1227_v5  ;;  %v1280_v11 = vadd.f32 %v1279_v63, %v1278_v9 }
 0x2b9   :  { %1308 = vxpose.xlu0.b32.end [16/16] (narrow) %v1429_v56, 8 }
 0x2ba   :  { %v1230_v18 = vrot.slane %v1229_v6, 4  ;;  %v1282_v19 = vadd.f32 %v1281_v14, %v1280_v11 }
 0x2bc   :  { %v1231_v36 = vadd.f32 %v1230_v18, %v1229_v6  ;;  %v1283_v12 = vrot.slane %v1282_v19, 4 }
 0x2be   :  { %v1232_v61 = vrot.slane %v1231_v36, 2  ;;  %v1284_v20 = vadd.f32 %v1283_v12, %v1282_v19 }
 0x2c0   :  { %v1233_v21 = vadd.f32 %v1232_v61, %v1231_v36  ;;  %v1285_v23 = vrot.slane %v1284_v20, 2 }
 0x2c2   :  { %v1234_v27 = vrot.slane %v1233_v21, 1  ;;  %v1286_v0 = vadd.f32 %v1285_v23, %v1284_v20 }
 0x2c4   :  { %v1287_v8 = vrot.slane %v1286_v0, 1  ;;  %v1235_v25 = vadd.f32 %v1234_v27, %v1233_v21 }
 0x2c6   :  { %v1288_v1 = vadd.f32 %v1287_v8, %v1286_v0 }
 0x2c8   :  { %v1290_v13 = vsel %vm1289_vm11, %v1235_v25, %v1288_v1 }
 0x2c9   :  { %1292 = vst.msk [vmem:[%s2200_s3] sm:$0x3] %vm1291_vm12, %v1290_v13 }
 0x2f9   :  { %v1309_v16 = vpop.trf.xlu0 }
 0x2fa   :  { %1326 = vst.msk [vmem:[%s2201_s2] sm:$0xff] %vm1325_vm13, %v1309_v16  ;;  %1328 = vrot.lane.b32.xlu1 %v1309_v16, %s1461_s17 }
 0x36c   :  { %v1329_v39 = vpop.permute.xlu1 %1328 }
 0x36d   :  { %1374 = vst.msk [vmem:[%s2201_s2 + $0x8] sm:$0xff] %vm1325_vm13, %v1329_v39 }

// kernel: down_forward.4
= control target key start
LH: loop header
LB: loop body
LE: loop exit
PB: predicated region body
PF: predicated region fallthrough
CT: control target
= control target key end

     0   :  { %vm21_vm0 = vcmask 64512   ;;  %vm23_vm1 = vcmask 58368   ;;  %v1415_v0 = vmov 0   ;;  %v1416_v2 = vmov 0.0   ;;  %s1417_s21 = smov 48   ;;  %s1418_s22 = smov 56   ;;  %s2204_s1 = inlined_call_operand.vmem [shape: f32[8,1], index: 1, kind: input, shape index: {}]   ;;  %s2205_s2 = inlined_call_operand.vmem [shape: f32[8,1], index: 2, kind: input, shape index: {}]   ;;  %s2206_s0 = inlined_call_operand.vmem [shape: f32[2,8,64], index: 0, kind: input, shape index: {}]   ;;  %s2207_s3 = inlined_call_operand.vmem [shape: f32[72,8], index: 3, kind: input, shape index: {}]   ;;  %s2208_s5 = inlined_call_operand.vmem [shape: f32[1,2,8], index: 5, kind: output, shape index: {1}]   ;;  %s2209_s4 = inlined_call_operand.vmem [shape: f32[2,8,64], index: 4, kind: output, shape index: {0}]  }
   0x1   :  { %1414 = vset.pattern.permute.xlu0 %v1415_v0  ;;  %v19_v1 = vld [vmem:[%s2204_s1] sm:$0xff]  ;;  %41 = vst.msk [vmem:[#allocation2 + $0x90] sm:$0xff] %vm21_vm0, %v1416_v2  ;;  %22 = vst.msk [vmem:[#allocation2] sm:$0xff] %vm21_vm0, %v1416_v2  ;;  %s1419_s23 = smov 64   ;;  %s1420_s24 = smov 8   ;;  %v1301_v17 = vld [vmem:[%s2206_s0 + $0x8] sm:$0xff] }
   0x2   :  { %25 = vst.msk [vmem:[#allocation2 + $0x10] sm:$0xff] %vm21_vm0, %v1416_v2  ;;  %27 = vst.msk [vmem:[#allocation2 + $0x20] sm:$0xff] %vm21_vm0, %v1416_v2  ;;  %66 = vperm.xlu0 %1414, %v19_v1   ;;  %v20_v3 = vld [vmem:[%s2205_s2] sm:$0xff]  ;;  %s1421_s25 = smov 16   ;;  %s1423_s29 = smov 32   ;;  %v965_v60 = vld [vmem:[%s2207_s3 + $0x38] sm:$0xff] }
   0x3   :  { %29 = vst.msk [vmem:[#allocation2 + $0x30] sm:$0xff] %vm21_vm0, %v1416_v2  ;;  %31 = vst.msk [vmem:[#allocation2 + $0x40] sm:$0xff] %vm21_vm0, %v1416_v2  ;;  %v63_v10 = vld [vmem:[%s2206_s0] sm:$0xff]  ;;  %s1422_s0 = smov 24   ;;  %s1424_s30 = smov 40   ;;  %v964_v62 = vld [vmem:[%s2207_s3 + $0x30] sm:$0xff] }
   0x4   :  { %33 = vst.msk [vmem:[#allocation2 + $0x50] sm:$0xff] %vm21_vm0, %v1416_v2  ;;  %35 = vst.msk [vmem:[#allocation2 + $0x60] sm:$0xff] %vm21_vm0, %v1416_v2  ;;  %v966_v59 = vld [vmem:[%s2207_s3 + $0x40] sm:$0xff]  ;;  %v963_v0 = vld [vmem:[%s2207_s3 + $0x28] sm:$0xff]  ;;  %vm501_vm2 = vcmask 130048   ;;  %vm510_vm3 = vcmask 195584  }
   0x5   :  { %37 = vst.msk [vmem:[#allocation2 + $0x70] sm:$0xff] %vm21_vm0, %v1416_v2  ;;  %39 = vst.msk [vmem:[#allocation2 + $0x80] sm:$0xff] %vm21_vm0, %v1416_v2  ;;  %1344 = vmatprep.subr.mxu0 %v966_v59  ;;  %1386 = vmatprep.subr.mxu1 %v966_v59  ;;  %vm519_vm4 = vcmask 261120   ;;  %vm528_vm5 = vcmask 326656   ;;  %vm537_vm6 = vcmask 392192   ;;  %vm546_vm7 = vcmask 457728  }
   0x6   :  { %43 = vst.msk [vmem:[#allocation2 + $0xa0] sm:$0xff] %vm21_vm0, %v1416_v2  ;;  %45 = vst.msk [vmem:[#allocation2 + $0xb0] sm:$0xff] %vm21_vm0, %v1416_v2  ;;  %72 = vperm.xlu0 %1414, %v20_v3   ;;  %1345 = vmatpush3.msra.mxu0 %v966_v59  ;;  %v962_v3 = vld [vmem:[%s2207_s3 + $0x20] sm:$0xff]  ;;  %vm555_vm8 = vcmask 523264   ;;  %vm967_vm9 = vcmask 588800   ;;  %vm1251_vm10 = vcmask 1040384  }
   0x7   :  { %47 = vst.msk [vmem:[#allocation2 + $0xc0] sm:$0xff] %vm21_vm0, %v1416_v2  ;;  %49 = vst.msk [vmem:[#allocation2 + $0xd0] sm:$0xff] %vm21_vm0, %v1416_v2  ;;  %1395 = vmatpush3.msra.mxu1 %v966_v59  ;;  %1346 = vmatprep.subr.mxu0 %v965_v60 }
   0x8   :  { %51 = vst.msk [vmem:[#allocation2 + $0xe0] sm:$0xff] %vm21_vm0, %v1416_v2  ;;  %53 = vst.msk [vmem:[#allocation2 + $0xf0] sm:$0xff] %vm21_vm0, %v1416_v2  ;;  %v220_v4 = vld [vmem:[#allocation2 + $0x90] sm:$0xff]  ;;  %1387 = vmatprep.subr.mxu1 %v965_v60  ;;  %1347 = vmatpush3.msra.mxu0 %v965_v60 }
   0x9   :  { %55 = vst.msk [vmem:[#allocation2 + $0x100] sm:$0xff] %vm21_vm0, %v1416_v2  ;;  %57 = vst.msk [vmem:[#allocation2 + $0x110] sm:$0xff] %vm21_vm0, %v1416_v2  ;;  %419 = vrot.lane.b32.xlu1 %v220_v4, %s1417_s21  ;;  %1396 = vmatpush3.msra.mxu1 %v965_v60  ;;  %v961_v4 = vld [vmem:[%s2207_s3 + $0x18] sm:$0xff] }
   0xa   :  { %59 = vst.msk [vmem:[#allocation2 + $0x120] sm:$0xff] %vm21_vm0, %v1416_v2  ;;  %61 = vst.msk [vmem:[#allocation2 + $0x130] sm:$0xff] %vm21_vm0, %v1416_v2  ;;  %1348 = vmatprep.subr.mxu0 %v964_v62  ;;  %1388 = vmatprep.subr.mxu1 %v964_v62 }
   0xb   :  { %42 = vst.msk [vmem:[#allocation2 + $0x98] sm:$0x3] %vm23_vm1, %v1416_v2  ;;  %24 = vst.msk [vmem:[#allocation2 + $0x8] sm:$0x3] %vm23_vm1, %v1416_v2  ;;  %1349 = vmatpush3.msra.mxu0 %v964_v62  ;;  %1397 = vmatpush3.msra.mxu1 %v964_v62 }
   0xc   :  { %26 = vst.msk [vmem:[#allocation2 + $0x18] sm:$0x3] %vm23_vm1, %v1416_v2  ;;  %28 = vst.msk [vmem:[#allocation2 + $0x28] sm:$0x3] %vm23_vm1, %v1416_v2  ;;  %1350 = vmatprep.subr.mxu0 %v963_v0  ;;  %1389 = vmatprep.subr.mxu1 %v963_v0 }
   0xd   :  { %30 = vst.msk [vmem:[#allocation2 + $0x38] sm:$0x3] %vm23_vm1, %v1416_v2  ;;  %32 = vst.msk [vmem:[#allocation2 + $0x48] sm:$0x3] %vm23_vm1, %v1416_v2  ;;  %1351 = vmatpush3.msra.mxu0 %v963_v0  ;;  %1398 = vmatpush3.msra.mxu1 %v963_v0 }
   0xe   :  { %34 = vst.msk [vmem:[#allocation2 + $0x58] sm:$0x3] %vm23_vm1, %v1416_v2  ;;  %36 = vst.msk [vmem:[#allocation2 + $0x68] sm:$0x3] %vm23_vm1, %v1416_v2  ;;  %1352 = vmatprep.subr.mxu0 %v962_v3  ;;  %1390 = vmatprep.subr.mxu1 %v962_v3 }
   0xf   :  { %38 = vst.msk [vmem:[#allocation2 + $0x78] sm:$0x3] %vm23_vm1, %v1416_v2  ;;  %40 = vst.msk [vmem:[#allocation2 + $0x88] sm:$0x3] %vm23_vm1, %v1416_v2  ;;  %1353 = vmatpush3.msra.mxu0 %v962_v3  ;;  %1399 = vmatpush3.msra.mxu1 %v962_v3 }
  0x10   :  { %44 = vst.msk [vmem:[#allocation2 + $0xa8] sm:$0x3] %vm23_vm1, %v1416_v2  ;;  %46 = vst.msk [vmem:[#allocation2 + $0xb8] sm:$0x3] %vm23_vm1, %v1416_v2  ;;  %1354 = vmatprep.subr.mxu0 %v961_v4  ;;  %1391 = vmatprep.subr.mxu1 %v961_v4 }
  0x11   :  { %48 = vst.msk [vmem:[#allocation2 + $0xc8] sm:$0x3] %vm23_vm1, %v1416_v2  ;;  %50 = vst.msk [vmem:[#allocation2 + $0xd8] sm:$0x3] %vm23_vm1, %v1416_v2  ;;  %1355 = vmatpush3.msra.mxu0 %v961_v4  ;;  %1400 = vmatpush3.msra.mxu1 %v961_v4 }
  0x12   :  { %52 = vst.msk [vmem:[#allocation2 + $0xe8] sm:$0x3] %vm23_vm1, %v1416_v2  ;;  %54 = vst.msk [vmem:[#allocation2 + $0xf8] sm:$0x3] %vm23_vm1, %v1416_v2  ;;  %v228_v5 = vld [vmem:[#allocation2 + $0x91] sm:$0xff]  ;;  %v172_v7 = vld [vmem:[#allocation2 + $0x1] sm:$0xff] }
  0x13   :  { %56 = vst.msk [vmem:[#allocation2 + $0x108] sm:$0x3] %vm23_vm1, %v1416_v2  ;;  %58 = vst.msk [vmem:[#allocation2 + $0x118] sm:$0x3] %vm23_vm1, %v1416_v2  ;;  %451 = vrot.lane.b32.xlu1 %v228_v5, %s1418_s22  ;;  %v236_v6 = vld [vmem:[#allocation2 + $0x92] sm:$0xff]  ;;  %245 = vrot.lane.b32.xlu0 %v172_v7, %s1420_s24  ;;  %v180_v8 = vld [vmem:[#allocation2 + $0x2] sm:$0xff] }
  0x14   :  { %60 = vst.msk [vmem:[#allocation2 + $0x128] sm:$0x3] %vm23_vm1, %v1416_v2  ;;  %62 = vst.msk [vmem:[#allocation2 + $0x138] sm:$0x3] %vm23_vm1, %v1416_v2 }
  0x17   :  { %483 = vrot.lane.b32.xlu1 %v236_v6, %s1419_s23  ;;  %277 = vrot.lane.b32.xlu0 %v180_v8, %s1421_s25  ;;  %v573_v14 = vld [vmem:[#allocation2 + $0xa1] sm:$0xff]  ;;  %v960_v8 = vld [vmem:[%s2207_s3 + $0x10] sm:$0xff] }
  0x18   :  { %v581_v16 = vld [vmem:[#allocation2 + $0xa2] sm:$0xff]  ;;  %1356 = vmatprep.subr.mxu0 %v960_v8  ;;  %1392 = vmatprep.subr.mxu1 %v960_v8 }
  0x19   :  { %1357 = vmatpush3.msra.mxu0 %v960_v8  ;;  %1401 = vmatpush3.msra.mxu1 %v960_v8 }
  0x1b   :  { %646 = vrot.lane.b32.xlu0 %v573_v14, %s1420_s24 }
  0x1f   :  { %678 = vrot.lane.b32.xlu0 %v581_v16, %s1421_s25 }
  0x7b   :  { %v1514_v21 = vpop.permute.xlu1 %419 }
  0x7d   :  { %v67_v9 = vpop.permute.xlu0 %66 }
  0x7e   :  { %v69_v11 = vmul.f32 %v67_v9, %v63_v10  ;;  %v120_v18 = vmul.f32 %v1301_v17, %v67_v9  ;;  %v959_v10 = vld [vmem:[%s2207_s3 + $0x8] sm:$0xff] }
  0x7f   :  { %1358 = vmatprep.subr.mxu0 %v959_v10  ;;  %1393 = vmatprep.subr.mxu1 %v959_v10 }
  0x80   :  { %1359 = vmatpush3.msra.mxu0 %v959_v10  ;;  %1402 = vmatpush3.msra.mxu1 %v959_v10 }
  0x81   :  { %v73_v12 = vpop.permute.xlu0 %72 }
  0x82   :  { %v75_v13 = vadd.f32 %v73_v12, %v69_v11  ;;  %v121_v19 = vadd.f32 %v120_v18, %v73_v12  ;;  %v958_v12 = vld [vmem:[%s2207_s3] sm:$0xff] }
  0x83   :  { %1360 = vmatprep.subr.mxu0 %v958_v12  ;;  %1394 = vmatprep.subr.mxu1 %v958_v12 }
  0x84   :  { %v76_v15 = vmax.f32 %v75_v13, 0.0  ;;  %v122_v20 = vmax.f32 %v121_v19, 0.0  ;;  %1361 = vmatpush3.msra.mxu0 %v958_v12  ;;  %1403 = vmatpush3.msra.mxu1 %v958_v12 }
  0x85   :  { %v1516_v22 = vpop.permute.xlu1 %451  ;;  %v1627_v2 = vpop.permute.xlu0 %245 }
  0x86   :  { %77 = vxpose.xlu1.b32.start.end [1/1] (short) (narrow) %v76_v15, 64 }
  0x89   :  { %v1518_v23 = vpop.permute.xlu1 %483  ;;  %v1647_v7 = vpop.permute.xlu0 %277 }
  0x8d   :  { %v1661_v11 = vpop.permute.xlu0 %646 }
  0x91   :  { %v1671_v14 = vpop.permute.xlu0 %678 }
  0xa3   :  { %123 = vxpose.xlu1.b32.start.end [1/1] (short) (narrow) %v122_v20, 64 }
 0x102   :  { %v93_v24 = vpop.trf.xlu1 }
 0x103   :  { %110 = vst.msk [vmem:[#allocation2 + $0x11] sm:$0xff] %vm21_vm0, %v93_v24 }
 0x106   :  { %v94_v25 = vpop.trf.xlu1 }
 0x107   :  { %111 = vst.msk [vmem:[#allocation2 + $0x21] sm:$0xff] %vm21_vm0, %v94_v25 }
 0x10a   :  { %v95_v26 = vpop.trf.xlu1  ;;  %v173_v27 = vld [vmem:[#allocation2 + $0x11] sm:$0xff] }
 0x10b   :  { %112 = vst.msk [vmem:[#allocation2 + $0x31] sm:$0xff] %vm21_vm0, %v95_v26  ;;  %247 = vrot.lane.b32.xlu0 %v173_v27, %s1420_s24  ;;  %v181_v29 = vld [vmem:[#allocation2 + $0x12] sm:$0xff] }
 0x10c   :  { %v1526_v31 = vld [vmem:[#allocation2 + $0x10] sm:$0xff] }
 0x10e   :  { %v96_v28 = vpop.trf.xlu1  ;;  %v174_v42 = vld [vmem:[#allocation2 + $0x21] sm:$0xff] }
 0x10f   :  { %113 = vst.msk [vmem:[#allocation2 + $0x41] sm:$0xff] %vm21_vm0, %v96_v28  ;;  %279 = vrot.lane.b32.xlu0 %v181_v29, %s1421_s25  ;;  %v1552_v45 = vld [vmem:[#allocation2 + $0x20] sm:$0xff] }
 0x110   :  { %v182_v50 = vld [vmem:[#allocation2 + $0x22] sm:$0xff] }
 0x112   :  { %v97_v30 = vpop.trf.xlu1  ;;  %v1565_v52 = vld [vmem:[#allocation2 + $0x32] sm:$0xff] }
 0x113   :  { %114 = vst.msk [vmem:[#allocation2 + $0x51] sm:$0xff] %vm21_vm0, %v97_v30  ;;  %309 = vrot.lane.b32.xlu0 %v1526_v31, %s1422_s0  ;;  %v175_v63 = vld [vmem:[#allocation2 + $0x31] sm:$0xff] }
 0x114   :  { %v1639_v5 = vld [vmem:[#allocation2 + $0x30] sm:$0xff] }
 0x116   :  { %v98_v32 = vpop.trf.xlu1  ;;  %v1592_v56 = vld [vmem:[#allocation2 + $0x41] sm:$0xff] }
 0x117   :  { %115 = vst.msk [vmem:[#allocation2 + $0x61] sm:$0xff] %vm21_vm0, %v98_v32  ;;  %341 = vrot.lane.b32.xlu0 %v173_v27, %s1423_s29  ;;  %v1598_v57 = vld [vmem:[#allocation2 + $0x42] sm:$0xff] }
 0x118   :  { %v1702_v24 = vld [vmem:[#allocation2 + $0x40] sm:$0xff] }
 0x11a   :  { %v99_v33 = vpop.trf.xlu1  ;;  %v1641_v6 = vld [vmem:[#allocation2 + $0x51] sm:$0xff] }
 0x11b   :  { %116 = vst.msk [vmem:[#allocation2 + $0x71] sm:$0xff] %vm21_vm0, %v99_v33  ;;  %373 = vrot.lane.b32.xlu0 %v181_v29, %s1424_s30  ;;  %v1652_v9 = vld [vmem:[#allocation2 + $0x52] sm:$0xff] }
 0x11c   :  { %v1666_v13 = vld [vmem:[#allocation2 + $0x50] sm:$0xff] }
 0x11e   :  { %v100_v34 = vpop.trf.xlu1  ;;  %v1688_v17 = vld [vmem:[#allocation2 + $0x60] sm:$0xff] }
 0x11f   :  { %117 = vst.msk [vmem:[#allocation2 + $0x81] sm:$0xff] %vm21_vm0, %v100_v34  ;;  %v1696_v19 = vld [vmem:[#allocation2 + $0x61] sm:$0xff] }
 0x120   :  { %v1704_v25 = vld [vmem:[#allocation2 + $0x62] sm:$0xff] }
 0x122   :  { %v139_v35 = vpop.trf.xlu1  ;;  %v1710_v26 = vld [vmem:[#allocation2 + $0x71] sm:$0xff] }
 0x123   :  { %156 = vst.msk [vmem:[#allocation2 + $0xb1] sm:$0xff] %vm21_vm0, %v139_v35  ;;  %v1716_v28 = vld [vmem:[#allocation2 + $0x72] sm:$0xff] }
 0x124   :  { %v1722_v30 = vld [vmem:[#allocation2 + $0x70] sm:$0xff] }
 0x126   :  { %v140_v36 = vpop.trf.xlu1 }
 0x127   :  { %157 = vst.msk [vmem:[#allocation2 + $0xc1] sm:$0xff] %vm21_vm0, %v140_v36 }
 0x12a   :  { %v1538_v37 = vld [vmem:[#allocation2 + $0xb0] sm:$0xff]  ;;  %v141_v39 = vpop.trf.xlu1 }
 0x12b   :  { %v574_v38 = vld [vmem:[#allocation2 + $0xb1] sm:$0xff]  ;;  %710 = vrot.lane.b32.xlu0 %v1538_v37, %s1422_s0  ;;  %158 = vst.msk [vmem:[#allocation2 + $0xd1] sm:$0xff] %vm21_vm0, %v141_v39  ;;  %v1748_v39 = vld [vmem:[#allocation2 + $0x80] sm:$0xff] }
 0x12c   :  { %648 = vrot.lane.b32.xlu1 %v574_v38, %s1420_s24  ;;  %v582_v40 = vld [vmem:[#allocation2 + $0xb2] sm:$0xff] }
 0x12e   :  { %v142_v41 = vpop.trf.xlu1  ;;  %v1550_v44 = vld [vmem:[#allocation2 + $0xc0] sm:$0xff] }
 0x12f   :  { %742 = vrot.lane.b32.xlu0 %v574_v38, %s1423_s29  ;;  %159 = vst.msk [vmem:[#allocation2 + $0xe1] sm:$0xff] %vm21_vm0, %v142_v41  ;;  %v598_v47 = vld [vmem:[#allocation2 + $0xc1] sm:$0xff] }
 0x130   :  { %680 = vrot.lane.b32.xlu1 %v582_v40, %s1421_s25  ;;  %v606_v49 = vld [vmem:[#allocation2 + $0xc2] sm:$0xff] }
 0x132   :  { %v143_v43 = vpop.trf.xlu1  ;;  %v1570_v53 = vld [vmem:[#allocation2 + $0xd1] sm:$0xff] }
 0x133   :  { %774 = vrot.lane.b32.xlu0 %v582_v40, %s1424_s30  ;;  %160 = vst.msk [vmem:[#allocation2 + $0xf1] sm:$0xff] %vm21_vm0, %v143_v43  ;;  %v1576_v54 = vld [vmem:[#allocation2 + $0xd2] sm:$0xff] }
 0x134   :  { %249 = vrot.lane.b32.xlu1 %v174_v42, %s1420_s24  ;;  %v1581_v55 = vld [vmem:[#allocation2 + $0xd0] sm:$0xff] }
 0x136   :  { %v144_v46 = vpop.trf.xlu1  ;;  %v1603_v58 = vld [vmem:[#allocation2 + $0xe0] sm:$0xff] }
 0x137   :  { %311 = vrot.lane.b32.xlu0 %v1552_v45, %s1422_s0  ;;  %161 = vst.msk [vmem:[#allocation2 + $0x101] sm:$0xff] %vm21_vm0, %v144_v46  ;;  %v1614_v61 = vld [vmem:[#allocation2 + $0xe1] sm:$0xff] }
 0x138   :  { %712 = vrot.lane.b32.xlu1 %v1550_v44, %s1422_s0  ;;  %v1625_v1 = vld [vmem:[#allocation2 + $0xe2] sm:$0xff] }
 0x13a   :  { %v145_v48 = vpop.trf.xlu1  ;;  %v1680_v15 = vld [vmem:[#allocation2 + $0xf1] sm:$0xff] }
 0x13b   :  { %343 = vrot.lane.b32.xlu0 %v174_v42, %s1423_s29  ;;  %162 = vst.msk [vmem:[#allocation2 + $0x111] sm:$0xff] %vm21_vm0, %v145_v48  ;;  %v1774_v48 = vld [vmem:[#allocation2 + $0xf2] sm:$0xff] }
 0x13c   :  { %744 = vrot.lane.b32.xlu1 %v598_v47, %s1423_s29 }
 0x13e   :  { %v146_v51 = vpop.trf.xlu1  ;;  %v1818_v12 = vld [vmem:[#allocation2 + $0x101] sm:$0xff] }
 0x13f   :  { %281 = vrot.lane.b32.xlu0 %v182_v50, %s1421_s25  ;;  %163 = vst.msk [vmem:[#allocation2 + $0x121] sm:$0xff] %vm21_vm0, %v146_v51  ;;  %v1784_v51 = vld [vmem:[#allocation2 + $0xf0] sm:$0xff] }
 0x140   :  { %776 = vrot.lane.b32.xlu1 %v606_v49, %s1424_s30 }
 0x143   :  { %375 = vrot.lane.b32.xlu0 %v182_v50, %s1424_s30 }
 0x144   :  { %377 = vrot.lane.b32.xlu1 %v1565_v52, %s1424_s30 }
 0x147   :  { %405 = vrot.lane.b32.xlu0 %v1552_v45, %s1417_s21 }
 0x148   :  { %652 = vrot.lane.b32.xlu1 %v1570_v53, %s1420_s24 }
 0x14b   :  { %437 = vrot.lane.b32.xlu0 %v174_v42, %s1418_s22  ;;  %v1758_v42 = vld [vmem:[#allocation2 + $0x81] sm:$0xff] }
 0x14c   :  { %684 = vrot.lane.b32.xlu1 %v1576_v54, %s1421_s25 }
 0x14f   :  { %469 = vrot.lane.b32.xlu0 %v182_v50, %s1419_s23 }
 0x150   :  { %808 = vrot.lane.b32.xlu1 %v1581_v55, %s1417_s21 }
 0x153   :  { %650 = vrot.lane.b32.xlu0 %v598_v47, %s1420_s24 }
 0x154   :  { %840 = vrot.lane.b32.xlu1 %v1570_v53, %s1418_s22 }
 0x157   :  { %682 = vrot.lane.b32.xlu0 %v606_v49, %s1421_s25 }
 0x158   :  { %778 = vrot.lane.b32.xlu1 %v1576_v54, %s1424_s30 }
 0x15b   :  { %806 = vrot.lane.b32.xlu0 %v1550_v44, %s1417_s21 }
 0x15c   :  { %253 = vrot.lane.b32.xlu1 %v1592_v56, %s1420_s24 }
 0x15f   :  { %838 = vrot.lane.b32.xlu0 %v598_v47, %s1418_s22  ;;  %v1768_v47 = vld [vmem:[#allocation2 + $0x82] sm:$0xff] }
 0x160   :  { %379 = vrot.lane.b32.xlu1 %v1598_v57, %s1424_s30 }
 0x163   :  { %870 = vrot.lane.b32.xlu0 %v606_v49, %s1419_s23 }
 0x164   :  { %716 = vrot.lane.b32.xlu1 %v1603_v58, %s1422_s0 }
 0x167   :  { %251 = vrot.lane.b32.xlu0 %v175_v63, %s1420_s24 }
 0x168   :  { %654 = vrot.lane.b32.xlu1 %v1614_v61, %s1420_s24 }
 0x16b   :  { %283 = vrot.lane.b32.xlu0 %v1565_v52, %s1421_s25 }
 0x16c   :  { %780 = vrot.lane.b32.xlu1 %v1625_v1, %s1424_s30 }
 0x16f   :  { %313 = vrot.lane.b32.xlu0 %v1639_v5, %s1422_s0 }
 0x170   :  { %255 = vrot.lane.b32.xlu1 %v1641_v6, %s1420_s24 }
 0x173   :  { %407 = vrot.lane.b32.xlu0 %v1639_v5, %s1417_s21 }
 0x174   :  { %287 = vrot.lane.b32.xlu1 %v1652_v9, %s1421_s25 }
 0x177   :  { %345 = vrot.lane.b32.xlu0 %v175_v63, %s1423_s29 }
 0x178   :  { %411 = vrot.lane.b32.xlu1 %v1666_v13, %s1417_s21 }
 0x17b   :  { %439 = vrot.lane.b32.xlu0 %v175_v63, %s1418_s22 }
 0x17c   :  { %443 = vrot.lane.b32.xlu1 %v1641_v6, %s1418_s22 }
 0x17d   :  { %v1682_v16 = vpop.permute.xlu0 %247 }
 0x17f   :  { %471 = vrot.lane.b32.xlu0 %v1565_v52, %s1419_s23 }
 0x180   :  { %381 = vrot.lane.b32.xlu1 %v1652_v9, %s1424_s30 }
 0x181   :  { %v1690_v18 = vpop.permute.xlu0 %279 }
 0x183   :  { %714 = vrot.lane.b32.xlu0 %v1581_v55, %s1422_s0 }
 0x184   :  { %656 = vrot.lane.b32.xlu1 %v1680_v15, %s1420_s24 }
 0x185   :  { %v310_v20 = vpop.permute.xlu0 %309 }
 0x187   :  { %746 = vrot.lane.b32.xlu0 %v1570_v53, %s1423_s29 }
 0x188   :  { %319 = vrot.lane.b32.xlu1 %v1688_v17, %s1422_s0 }
 0x189   :  { %v342_v27 = vpop.permute.xlu0 %341 }
 0x18b   :  { %872 = vrot.lane.b32.xlu0 %v1576_v54, %s1419_s23  ;;  %v164_v54 = vld [vmem:[#allocation2] sm:$0xff] }
 0x18c   :  { %257 = vrot.lane.b32.xlu1 %v1696_v19, %s1420_s24 }
 0x18d   :  { %v374_v29 = vpop.permute.xlu0 %373 }
 0x18f   :  { %315 = vrot.lane.b32.xlu0 %v1702_v24, %s1422_s0 }
 0x190   :  { %383 = vrot.lane.b32.xlu1 %v1704_v25, %s1424_s30 }
 0x193   :  { %347 = vrot.lane.b32.xlu0 %v1592_v56, %s1423_s29 }
 0x194   :  { %259 = vrot.lane.b32.xlu1 %v1710_v26, %s1420_s24 }
 0x197   :  { %285 = vrot.lane.b32.xlu0 %v1598_v57, %s1421_s25 }
 0x198   :  { %291 = vrot.lane.b32.xlu1 %v1716_v28, %s1421_s25 }
 0x19b   :  { %409 = vrot.lane.b32.xlu0 %v1702_v24, %s1417_s21 }
 0x19c   :  { %415 = vrot.lane.b32.xlu1 %v1722_v30, %s1417_s21 }
 0x19d   :  { %v1728_v32 = vpop.permute.xlu0 %710 }
 0x19e   :  { %v1730_v33 = vpop.permute.xlu1 %648 }
 0x19f   :  { %441 = vrot.lane.b32.xlu0 %v1592_v56, %s1418_s22  ;;  %v1794_v56 = vld [vmem:[#allocation2 + $0x100] sm:$0xff] }
 0x1a0   :  { %447 = vrot.lane.b32.xlu1 %v1710_v26, %s1418_s22 }
 0x1a1   :  { %v1736_v34 = vpop.permute.xlu0 %742 }
 0x1a2   :  { %v1738_v35 = vpop.permute.xlu1 %680 }
 0x1a3   :  { %473 = vrot.lane.b32.xlu0 %v1598_v57, %s1419_s23  ;;  %v493_v57 = vsel %vm21_vm0, %v164_v54, %v1627_v2 }
 0x1a4   :  { %479 = vrot.lane.b32.xlu1 %v1716_v28, %s1419_s23  ;;  %v502_v62 = vsel %vm501_vm2, %v493_v57, %v1647_v7 }
 0x1a5   :  { %v1744_v36 = vpop.permute.xlu0 %774  ;;  %v511_v63 = vsel %vm510_vm3, %v502_v62, %v310_v20 }
 0x1a6   :  { %v1746_v38 = vpop.permute.xlu1 %249  ;;  %v520_v4 = vsel %vm519_vm4, %v511_v63, %v342_v27 }
 0x1a7   :  { %748 = vrot.lane.b32.xlu0 %v1614_v61, %s1423_s29  ;;  %v529_v8 = vsel %vm528_vm5, %v520_v4, %v374_v29 }
 0x1a8   :  { %323 = vrot.lane.b32.xlu1 %v1748_v39, %s1422_s0 }
 0x1a9   :  { %v1754_v40 = vpop.permute.xlu0 %311 }
 0x1aa   :  { %v1756_v41 = vpop.permute.xlu1 %712 }
 0x1ab   :  { %686 = vrot.lane.b32.xlu0 %v1625_v1, %s1421_s25 }
 0x1ac   :  { %355 = vrot.lane.b32.xlu1 %v1758_v42, %s1423_s29 }
 0x1ad   :  { %v1764_v43 = vpop.permute.xlu0 %343 }
 0x1ae   :  { %v1766_v46 = vpop.permute.xlu1 %744 }
 0x1af   :  { %810 = vrot.lane.b32.xlu0 %v1603_v58, %s1417_s21 }
 0x1b0   :  { %387 = vrot.lane.b32.xlu1 %v1768_v47, %s1424_s30 }
 0x1b1   :  { %v1776_v49 = vpop.permute.xlu0 %281 }
 0x1b2   :  { %v1778_v50 = vpop.permute.xlu1 %776 }
 0x1b3   :  { %317 = vrot.lane.b32.xlu0 %v1666_v13, %s1422_s0 }
 0x1b4   :  { %688 = vrot.lane.b32.xlu1 %v1774_v48, %s1421_s25 }
 0x1b5   :  { %v1786_v52 = vpop.permute.xlu0 %375 }
 0x1b6   :  { %v1788_v53 = vpop.permute.xlu1 %377 }
 0x1b7   :  { %349 = vrot.lane.b32.xlu0 %v1641_v6, %s1423_s29 }
 0x1b8   :  { %812 = vrot.lane.b32.xlu1 %v1784_v51, %s1417_s21 }
 0x1b9   :  { %v406_v59 = vpop.permute.xlu0 %405 }
 0x1ba   :  { %v653_v60 = vpop.permute.xlu1 %652  ;;  %v538_v7 = vsel %vm537_vm6, %v529_v8, %v406_v59  ;;  %v1838_v59 = vld [vmem:[#allocation2 + $0x111] sm:$0xff] }
 0x1bb   :  { %475 = vrot.lane.b32.xlu0 %v1652_v9, %s1419_s23  ;;  %v897_v0 = vsel %vm21_vm0, %v1581_v55, %v653_v60  ;;  %v565_v60 = vld [vmem:[#allocation2 + $0xa0] sm:$0xff] }
 0x1bc   :  { %720 = vrot.lane.b32.xlu1 %v1794_v56, %s1422_s0  ;;  %v894_v62 = vsel %vm21_vm0, %v565_v60, %v1661_v11 }
 0x1bd   :  { %v438_v2 = vpop.permute.xlu0 %437 }
 0x1be   :  { %v685_v3 = vpop.permute.xlu1 %684  ;;  %v547_v55 = vsel %vm546_vm7, %v538_v7, %v438_v2  ;;  %v1846_v2 = vld [vmem:[#allocation2 + $0x102] sm:$0xff]  ;;  %v1862_v7 = vld [vmem:[#allocation2 + $0x112] sm:$0xff] }
 0x1bf   :  { %v905_v6 = vsel %vm501_vm2, %v897_v0, %v685_v3  ;;  %351 = vrot.lane.b32.xlu0 %v1696_v19, %s1423_s29 }
 0x1c0   :  { %844 = vrot.lane.b32.xlu1 %v1680_v15, %s1418_s22 }
 0x1c1   :  { %v470_v9 = vpop.permute.xlu0 %469 }
 0x1c2   :  { %v1816_v10 = vpop.permute.xlu1 %808  ;;  %v556_v20 = vsel %vm555_vm8, %v547_v55, %v470_v9 }
 0x1c3   :  { %1362 = vmatprep.mubr.msk.f32.mxu0 %vm967_vm9, %v556_v20  ;;  %289 = vrot.lane.b32.xlu0 %v1704_v25, %s1421_s25 }
 0x1c4   :  { %658 = vrot.lane.b32.xlu1 %v1818_v12, %s1420_s24 }
 0x1c5   :  { %v1826_v27 = vpop.permute.xlu0 %650 }
 0x1c6   :  { %v1828_v29 = vpop.permute.xlu1 %840 }
 0x1c7   :  { %413 = vrot.lane.b32.xlu0 %v1688_v17, %s1417_s21 }
 0x1c8   :  { %782 = vrot.lane.b32.xlu1 %v1774_v48, %s1424_s30 }
 0x1c9   :  { %v1834_v54 = vpop.permute.xlu0 %682 }
 0x1ca   :  { %v1836_v57 = vpop.permute.xlu1 %778 }
 0x1cb   :  { %445 = vrot.lane.b32.xlu0 %v1696_v19, %s1418_s22  ;;  %v902_v19 = vsel %vm501_vm2, %v894_v62, %v1671_v14 }
 0x1cc   :  { %660 = vrot.lane.b32.xlu1 %v1838_v59, %s1420_s24  ;;  %v910_v11 = vsel %vm510_vm3, %v902_v19, %v1728_v32 }
 0x1cd   :  { %v807_v63 = vpop.permute.xlu0 %806 }
 0x1ce   :  { %v254_v0 = vpop.permute.xlu1 %253 }
 0x1cf   :  { %v1850_v3 = vsel %vm21_vm0, %v1702_v24, %v254_v0  ;;  %477 = vrot.lane.b32.xlu0 %v1704_v25, %s1419_s23  ;;  %v918_v24 = vsel %vm519_vm4, %v910_v11, %v1736_v34 }
 0x1d0   :  { %784 = vrot.lane.b32.xlu1 %v1846_v2, %s1424_s30  ;;  %v926_v25 = vsel %vm528_vm5, %v918_v24, %v1744_v36  ;;  %v1881_v36 = vld [vmem:[#allocation2 + $0x110] sm:$0xff] }
 0x1d1   :  { %v839_v4 = vpop.permute.xlu0 %838  ;;  %v934_v14 = vsel %vm537_vm6, %v926_v25, %v807_v63  ;;  %v494_v25 = vsel %vm21_vm0, %v1526_v31, %v1682_v16 }
 0x1d2   :  { %v1860_v8 = vpop.permute.xlu1 %379  ;;  %v942_v32 = vsel %vm546_vm7, %v934_v14, %v839_v4 }
 0x1d3   :  { %321 = vrot.lane.b32.xlu0 %v1722_v30, %s1422_s0 }
 0x1d4   :  { %692 = vrot.lane.b32.xlu1 %v1862_v7, %s1421_s25 }
 0x1d5   :  { %v871_v55 = vpop.permute.xlu0 %870 }
 0x1d6   :  { %v717_v9 = vpop.permute.xlu1 %716  ;;  %v950_v34 = vsel %vm555_vm8, %v942_v32, %v871_v55 }
 0x1d7   :  { %v1875_v20 = vsel %vm510_vm3, %v905_v6, %v717_v9  ;;  %1374 = vmatprep.mubr.msk.f32.mxu1 %vm967_vm9, %v950_v34  ;;  %353 = vrot.lane.b32.xlu0 %v1710_v26, %s1423_s29  ;;  %v596_v6 = vld [vmem:[#allocation2 + $0x120] sm:$0xff] }
 0x1d8   :  { %816 = vrot.lane.b32.xlu1 %v1881_v36, %s1417_s21 }
 0x1d9   :  { %v1885_v60 = vpop.permute.xlu0 %251 }
 0x1da   :  { %v1887_v62 = vpop.permute.xlu1 %654 }
 0x1db   :  { %385 = vrot.lane.b32.xlu0 %v1716_v28, %s1424_s30  ;;  %v604_v28 = vld [vmem:[#allocation2 + $0x121] sm:$0xff] }
 0x1dc   :  { %724 = vrot.lane.b32.xlu1 %v596_v6, %s1422_s0 }
 0x1dd   :  { %v1892_v63 = vpop.permute.xlu0 %283 }
 0x1de   :  { %v1894_v0 = vpop.permute.xlu1 %780 }
 0x1df   :  { %417 = vrot.lane.b32.xlu0 %v1748_v39, %s1417_s21 }
 0x1e0   :  { %848 = vrot.lane.b32.xlu1 %v1838_v59, %s1418_s22 }
 0x1e1   :  { %v1900_v26 = vpop.permute.xlu0 %313 }
 0x1e2   :  { %v1902_v19 = vpop.permute.xlu1 %255 }
 0x1e3   :  { %449 = vrot.lane.b32.xlu0 %v1758_v42, %s1418_s22  ;;  %v503_v42 = vsel %vm501_vm2, %v494_v25, %v1690_v18 }
 0x1e4   :  { %756 = vrot.lane.b32.xlu1 %v604_v28, %s1423_s29 }
 0x1e5   :  { %v408_v11 = vpop.permute.xlu0 %407 }
 0x1e6   :  { %v1907_v4 = vpop.permute.xlu1 %287 }
 0x1e7   :  { %481 = vrot.lane.b32.xlu0 %v1768_v47, %s1419_s23  ;;  %v512_v47 = vsel %vm510_vm3, %v503_v42, %v1754_v40 }
 0x1e8   :  { %880 = vrot.lane.b32.xlu1 %v1862_v7, %s1419_s23  ;;  %v521_v55 = vsel %vm519_vm4, %v512_v47, %v1764_v43  ;;  %v636_v43 = vld [vmem:[#allocation2 + $0x122] sm:$0xff] }
 0x1e9   :  { %v346_v39 = vpop.permute.xlu0 %345  ;;  %v530_v31 = vsel %vm528_vm5, %v521_v55, %v1786_v52 }
 0x1ea   :  { %v1913_v24 = vpop.permute.xlu1 %411  ;;  %v539_v16 = vsel %vm537_vm6, %v530_v31, %v408_v11  ;;  %v896_v11 = vsel %vm21_vm0, %v1550_v44, %v1826_v27 }
 0x1eb   :  { %718 = vrot.lane.b32.xlu0 %v1784_v51, %s1422_s0  ;;  %v904_v25 = vsel %vm501_vm2, %v896_v11, %v1834_v54 }
 0x1ec   :  { %818 = vrot.lane.b32.xlu1 %v596_v6, %s1417_s21 }
 0x1ed   :  { %v440_v14 = vpop.permute.xlu0 %439 }
 0x1ee   :  { %v1925_v32 = vpop.permute.xlu1 %443  ;;  %v548_v18 = vsel %vm546_vm7, %v539_v16, %v440_v14 }
 0x1ef   :  { %842 = vrot.lane.b32.xlu0 %v1614_v61, %s1418_s22 }
 0x1f0   :  { %850 = vrot.lane.b32.xlu1 %v604_v28, %s1418_s22  ;;  %v895_v28 = vsel %vm21_vm0, %v1538_v37, %v1730_v33 }
 0x1f1   :  { %v472_v9 = vpop.permute.xlu0 %471 }
 0x1f2   :  { %v1936_v40 = vpop.permute.xlu1 %381  ;;  %v557_v34 = vsel %vm555_vm8, %v548_v18, %v472_v9 }
 0x1f3   :  { %1363 = vmatmul.mubr.msk.f32.vlgmr.msra.gmra.mxu0 %vm967_vm9, %v557_v34  ;;  %750 = vrot.lane.b32.xlu0 %v1680_v15, %s1423_s29  ;;  %v903_v15 = vsel %vm501_vm2, %v895_v28, %v1738_v35 }
 0x1f4   :  { %882 = vrot.lane.b32.xlu1 %v636_v43, %s1419_s23 }
 0x1f5   :  { %v715_v61 = vpop.permute.xlu0 %714 }
 0x1f6   :  { %v657_v52 = vpop.permute.xlu1 %656  ;;  %v912_v42 = vsel %vm510_vm3, %v904_v25, %v715_v61 }
 0x1f7   :  { %v1945_v6 = vsel %vm21_vm0, %v1784_v51, %v657_v52  ;;  %874 = vrot.lane.b32.xlu0 %v1625_v1, %s1419_s23  ;;  %v911_v51 = vsel %vm510_vm3, %v903_v15, %v1756_v41  ;;  %v898_v15 = vsel %vm21_vm0, %v1603_v58, %v1887_v62 }
 0x1f8   :  { %v919_v44 = vsel %vm519_vm4, %v911_v51, %v1766_v46 }
 0x1f9   :  { %v747_v47 = vpop.permute.xlu0 %746  ;;  %v927_v1 = vsel %vm528_vm5, %v919_v44, %v1778_v50 }
 0x1fa   :  { %v1962_v37 = vpop.permute.xlu1 %319  ;;  %v920_v33 = vsel %vm519_vm4, %v912_v42, %v747_v47  ;;  %v935_v41 = vsel %vm537_vm6, %v927_v1, %v1816_v10  ;;  %v621_v42 = vld [vmem:[#allocation2 + $0x130] sm:$0xff] }
 0x1fb   :  { %752 = vrot.lane.b32.xlu0 %v1818_v12, %s1423_s29  ;;  %v928_v35 = vsel %vm528_vm5, %v920_v33, %v1836_v57  ;;  %v943_v27 = vsel %vm546_vm7, %v935_v41, %v1828_v29 }
 0x1fd   :  { %v873_v54 = vpop.permute.xlu0 %872 }
 0x1fe   :  { %v1977_v14 = vpop.permute.xlu1 %257  ;;  %v951_v46 = vsel %vm555_vm8, %v943_v27, %v873_v54 }
 0x1ff   :  { %876 = vrot.lane.b32.xlu0 %v1774_v48, %s1419_s23  ;;  %1375 = vmatmul.mubr.msk.f32.vlgmr.msra.gmra.mxu1 %vm967_vm9, %v951_v46  ;;  %v495_v48 = vsel %vm21_vm0, %v1552_v45, %v1746_v38 }
 0x200   :  { %v504_v9 = vsel %vm501_vm2, %v495_v48, %v1776_v49 }
 0x201   :  { %v316_v50 = vpop.permute.xlu0 %315  ;;  %v513_v34 = vsel %vm510_vm3, %v504_v9, %v1900_v26 }
 0x202   :  { %v1983_v55 = vpop.permute.xlu1 %383  ;;  %v522_v61 = vsel %vm519_vm4, %v513_v34, %v346_v39 }
 0x203   :  { %690 = vrot.lane.b32.xlu0 %v1846_v2, %s1421_s25  ;;  %v531_v11 = vsel %vm528_vm5, %v522_v61, %v1788_v53 }
 0x205   :  { %v348_v10 = vpop.permute.xlu0 %347 }
 0x206   :  { %v1987_v57 = vpop.permute.xlu1 %259 }
 0x207   :  { %814 = vrot.lane.b32.xlu0 %v1794_v56, %s1417_s21 }
 0x209   :  { %v286_v29 = vpop.permute.xlu0 %285 }
 0x20a   :  { %v1991_v31 = vpop.permute.xlu1 %291  ;;  %v506_v34 = vsel %vm501_vm2, %v1850_v3, %v286_v29 }
 0x20b   :  { %722 = vrot.lane.b32.xlu0 %v1881_v36, %s1422_s0 }
 0x20d   :  { %v410_v16 = vpop.permute.xlu0 %409 }
 0x20e   :  { %v416_v18 = vpop.permute.xlu1 %415  ;;  %v540_v45 = vsel %vm537_vm6, %v531_v11, %v410_v16 }
 0x20f   :  { %846 = vrot.lane.b32.xlu0 %v1818_v12, %s1418_s22 }
 0x211   :  { %v442_v52 = vpop.permute.xlu0 %441 }
 0x212   :  { %v448_v28 = vpop.permute.xlu1 %447  ;;  %v549_v38 = vsel %vm546_vm7, %v540_v45, %v442_v52 }
 0x213   :  { %754 = vrot.lane.b32.xlu0 %v1838_v59, %s1423_s29 }
 0x215   :  { %v474_v49 = vpop.permute.xlu0 %473 }
 0x216   :  { %v558_v26 = vsel %vm555_vm8, %v549_v38, %v474_v49  ;;  %v480_v12 = vpop.permute.xlu1 %479 }
 0x217   :  { %878 = vrot.lane.b32.xlu0 %v1846_v2, %s1419_s23  ;;  %1365 = vmatprep.mubr.msk.f32.mxu0 %vm967_vm9, %v558_v26 }
 0x219   :  { %v749_v39 = vpop.permute.xlu0 %748 }
 0x21a   :  { %v921_v53 = vsel %vm519_vm4, %v1875_v20, %v749_v39  ;;  %v324_v2 = vpop.permute.xlu1 %323 }
 0x21b   :  { %786 = vrot.lane.b32.xlu0 %v1862_v7, %s1424_s30  ;;  %v2021_v59 = vsel %vm528_vm5, %v921_v53, %v1894_v0  ;;  %v496_v7 = vsel %vm21_vm0, %v1639_v5, %v1885_v60  ;;  %v637_v5 = vld [vmem:[#allocation2 + $0x132] sm:$0xff] }
 0x21c   :  { %v505_v0 = vsel %vm501_vm2, %v496_v7, %v1892_v63 }
 0x21d   :  { %v687_v25 = vpop.permute.xlu0 %686  ;;  %v514_v58 = vsel %vm510_vm3, %v505_v0, %v316_v50  ;;  %v498_v50 = vsel %vm21_vm0, %v1666_v13, %v1902_v19  ;;  %v499_v0 = vsel %vm21_vm0, %v1688_v17, %v1977_v14 }
 0x21e   :  { %v2027_v51 = vsel %vm501_vm2, %v898_v15, %v687_v25  ;;  %v523_v62 = vsel %vm519_vm4, %v514_v58, %v348_v10  ;;  %v356_v44 = vpop.permute.xlu1 %355 }
 0x21f   :  { %788 = vrot.lane.b32.xlu0 %v636_v43, %s1424_s30  ;;  %v629_v43 = vld [vmem:[#allocation2 + $0x131] sm:$0xff]  ;;  %v532_v1 = vsel %vm528_vm5, %v523_v62, %v1860_v8 }
 0x221   :  { %v811_v20 = vpop.permute.xlu0 %810 }
 0x222   :  { %v2036_v47 = vsel %vm537_vm6, %v928_v35, %v811_v20  ;;  %v388_v63 = vpop.permute.xlu1 %387  ;;  %v541_v35 = vsel %vm537_vm6, %v532_v1, %v1913_v24  ;;  %v507_v24 = vsel %vm501_vm2, %v498_v50, %v1907_v4 }
 0x223   :  { %820 = vrot.lane.b32.xlu0 %v621_v42, %s1417_s21  ;;  %v550_v27 = vsel %vm546_vm7, %v541_v35, %v1925_v32  ;;  %v516_v48 = vsel %vm510_vm3, %v507_v24, %v1962_v37 }
 0x225   :  { %v318_v33 = vpop.permute.xlu0 %317 }
 0x226   :  { %v2051_v46 = vpop.permute.xlu1 %688  ;;  %v515_v52 = vsel %vm510_vm3, %v506_v34, %v318_v33 }
 0x227   :  { %852 = vrot.lane.b32.xlu0 %v629_v43, %s1418_s22 }
 0x229   :  { %v350_v60 = vpop.permute.xlu0 %349 }
 0x22a   :  { %v813_v16 = vpop.permute.xlu1 %812  ;;  %v524_v13 = vsel %vm519_vm4, %v515_v52, %v350_v60  ;;  %v907_v52 = vsel %vm501_vm2, %v1945_v6, %v2051_v46 }
 0x22b   :  { %884 = vrot.lane.b32.xlu0 %v637_v5, %s1419_s23  ;;  %v533_v37 = vsel %vm528_vm5, %v524_v13, %v1936_v40 }
 0x22d   :  { %v476_v41 = vpop.permute.xlu0 %475 }
 0x22e   :  { %v559_v54 = vsel %vm555_vm8, %v550_v27, %v476_v41  ;;  %v2067_v19 = vpop.permute.xlu1 %720 }
 0x22f   :  { %1366 = vmatmul.mubr.msk.f32.gmra.mxu0 %vm967_vm9, %v559_v54 }
 0x231   :  { %v352_v8 = vpop.permute.xlu0 %351 }
 0x232   :  { %v525_v32 = vsel %vm519_vm4, %v516_v48, %v352_v8 }
 0x233   :  { %v534_v61 = vsel %vm528_vm5, %v525_v32, %v1983_v55  ;;  %v845_v55 = vpop.permute.xlu1 %844 }
 0x234   :  { %v543_v4 = vsel %vm537_vm6, %v534_v61, %v416_v18 }
 0x235   :  { %v290_v10 = vpop.permute.xlu0 %289  ;;  %v552_v38 = vsel %vm546_vm7, %v543_v4, %v448_v28  ;;  %v500_v28 = vsel %vm21_vm0, %v1722_v30, %v1987_v57  ;;  %v915_v4 = vsel %vm510_vm3, %v907_v52, %v2067_v19 }
 0x236   :  { %v561_v26 = vsel %vm555_vm8, %v552_v38, %v480_v12  ;;  %v509_v25 = vsel %vm501_vm2, %v500_v28, %v1991_v31  ;;  %v508_v58 = vsel %vm501_vm2, %v499_v0, %v290_v10 }
 0x237   :  { %v2079_v39 = vpop.permute.xlu1 %658  ;;  %v518_v42 = vsel %vm510_vm3, %v509_v25, %v324_v2 }
 0x238   :  { %v527_v7 = vsel %vm519_vm4, %v518_v42, %v356_v44 }
 0x239   :  { %v414_v9 = vpop.permute.xlu0 %413  ;;  %v536_v20 = vsel %vm528_vm5, %v527_v7, %v388_v63 }
 0x23a   :  { %v542_v45 = vsel %vm537_vm6, %v533_v37, %v414_v9  ;;  %v545_v30 = vsel %vm537_vm6, %v536_v20, %v1514_v21 }
 0x23b   :  { %v783_v15 = vpop.permute.xlu1 %782  ;;  %v554_v33 = vsel %vm546_vm7, %v545_v30, %v1516_v22 }
 0x23c   :  { %v563_v21 = vsel %vm555_vm8, %v554_v33, %v1518_v23  ;;  %v937_v23 = vsel %vm537_vm6, %v2021_v59, %v813_v16 }
 0x23d   :  { %v446_v11 = vpop.permute.xlu0 %445  ;;  %v945_v10 = vsel %vm546_vm7, %v937_v23, %v845_v55 }
 0x23e   :  { %v551_v3 = vsel %vm546_vm7, %v542_v45, %v446_v11 }
 0x23f   :  { %v2093_v62 = vpop.permute.xlu1 %660 }
 0x240   :  { %v901_v30 = vsel %vm21_vm0, %v1881_v36, %v2093_v62 }
 0x241   :  { %v478_v29 = vpop.permute.xlu0 %477 }
 0x242   :  { %v560_v49 = vsel %vm555_vm8, %v551_v3, %v478_v29 }
 0x243   :  { %1368 = vmatprep.mubr.msk.f32.mxu0 %vm967_vm9, %v560_v49  ;;  %v785_v1 = vpop.permute.xlu1 %784 }
 0x244   :  { %1369 = vmatmul.mubr.msk.f32.gmra.mxu0 %vm967_vm9, %v561_v26 }
 0x245   :  { %v322_v18 = vpop.permute.xlu0 %321 }
 0x246   :  { %v517_v57 = vsel %vm510_vm3, %v508_v58, %v322_v18  ;;  %v900_v18 = vsel %vm21_vm0, %v1794_v56, %v2079_v39 }
 0x247   :  { %v693_v63 = vpop.permute.xlu1 %692 }
 0x249   :  { %v354_v40 = vpop.permute.xlu0 %353 }
 0x24a   :  { %v526_v2 = vsel %vm519_vm4, %v517_v57, %v354_v40  ;;  %v909_v57 = vsel %vm501_vm2, %v901_v30, %v693_v63 }
 0x24b   :  { %v817_v27 = vpop.permute.xlu1 %816 }
 0x24d   :  { %v386_v53 = vpop.permute.xlu0 %385 }
 0x24e   :  { %v535_v44 = vsel %vm528_vm5, %v526_v2, %v386_v53 }
 0x24f   :  { %v725_v50 = vpop.permute.xlu1 %724 }
 0x251   :  { %v418_v12 = vpop.permute.xlu0 %417 }
 0x252   :  { %v544_v43 = vsel %vm537_vm6, %v535_v44, %v418_v12 }
 0x253   :  { %v849_v32 = vpop.permute.xlu1 %848 }
 0x255   :  { %v450_v31 = vpop.permute.xlu0 %449 }
 0x256   :  { %v553_v17 = vsel %vm546_vm7, %v544_v43, %v450_v31  ;;  %v917_v31 = vsel %vm510_vm3, %v909_v57, %v725_v50 }
 0x259   :  { %v482_v14 = vpop.permute.xlu0 %481 }
 0x25a   :  { %v562_v5 = vsel %vm555_vm8, %v553_v17, %v482_v14 }
 0x25b   :  { %1371 = vmatprep.mubr.msk.f32.mxu0 %vm967_vm9, %v562_v5 }
 0x25c   :  { %1372 = vmatmul.mubr.msk.f32.gmra.mxu0 %vm967_vm9, %v563_v21 }
 0x25d   :  { %v719_v60 = vpop.permute.xlu0 %718 }
 0x25e   :  { %v914_v45 = vsel %vm510_vm3, %v2027_v51, %v719_v60 }
 0x261   :  { %v843_v35 = vpop.permute.xlu0 %842 }
 0x262   :  { %v944_v22 = vsel %vm546_vm7, %v2036_v47, %v843_v35  ;;  %v757_v47 = vpop.permute.xlu1 %756 }
 0x263   :  { %v925_v44 = vsel %vm519_vm4, %v917_v31, %v757_v47 }
 0x265   :  { %v751_v41 = vpop.permute.xlu0 %750 }
 0x266   :  { %v881_v59 = vpop.permute.xlu1 %880  ;;  %v922_v3 = vsel %vm519_vm4, %v914_v45, %v751_v41 }
 0x267   :  { %v930_v6 = vsel %vm528_vm5, %v922_v3, %v783_v15 }
 0x269   :  { %v875_v54 = vpop.permute.xlu0 %874 }
 0x26a   :  { %v952_v8 = vsel %vm555_vm8, %v944_v22, %v875_v54  ;;  %v819_v38 = vpop.permute.xlu1 %818 }
 0x26b   :  { %1377 = vmatprep.mubr.msk.f32.mxu1 %vm967_vm9, %v952_v8 }
 0x26d   :  { %v753_v24 = vpop.permute.xlu0 %752 }
 0x26e   :  { %v923_v16 = vsel %vm519_vm4, %v915_v4, %v753_v24  ;;  %v851_v51 = vpop.permute.xlu1 %850 }
 0x26f   :  { %v931_v37 = vsel %vm528_vm5, %v923_v16, %v785_v1 }
 0x270   :  { %v939_v29 = vsel %vm537_vm6, %v931_v37, %v817_v27 }
 0x271   :  { %v877_v48 = vpop.permute.xlu0 %876  ;;  %v947_v19 = vsel %vm546_vm7, %v939_v29, %v849_v32 }
 0x272   :  { %v953_v9 = vsel %vm555_vm8, %v945_v10, %v877_v48  ;;  %v955_v28 = vsel %vm555_vm8, %v947_v19, %v881_v59  ;;  %v883_v39 = vpop.permute.xlu1 %882 }
 0x273   :  { %1378 = vmatmul.mubr.msk.f32.gmra.mxu1 %vm967_vm9, %v953_v9 }
 0x275   :  { %v691_v34 = vpop.permute.xlu0 %690 }
 0x276   :  { %v908_v53 = vsel %vm501_vm2, %v900_v18, %v691_v34 }
 0x279   :  { %v815_v61 = vpop.permute.xlu0 %814 }
 0x27a   :  { %v938_v46 = vsel %vm537_vm6, %v930_v6, %v815_v61 }
 0x27d   :  { %v723_v13 = vpop.permute.xlu0 %722 }
 0x27e   :  { %v916_v15 = vsel %vm510_vm3, %v908_v53, %v723_v13 }
 0x281   :  { %v847_v11 = vpop.permute.xlu0 %846 }
 0x282   :  { %v946_v49 = vsel %vm546_vm7, %v938_v46, %v847_v11 }
 0x285   :  { %v755_v55 = vpop.permute.xlu0 %754 }
 0x286   :  { %v924_v25 = vsel %vm519_vm4, %v916_v15, %v755_v55 }
 0x289   :  { %v879_v26 = vpop.permute.xlu0 %878 }
 0x28a   :  { %v954_v40 = vsel %vm555_vm8, %v946_v49, %v879_v26 }
 0x28b   :  { %1380 = vmatprep.mubr.msk.f32.mxu1 %vm967_vm9, %v954_v40 }
 0x28c   :  { %1381 = vmatmul.mubr.msk.f32.gmra.mxu1 %vm967_vm9, %v955_v28 }
 0x28d   :  { %v787_v42 = vpop.permute.xlu0 %786 }
 0x28e   :  { %v932_v7 = vsel %vm528_vm5, %v924_v25, %v787_v42 }
 0x28f   :  { %v940_v56 = vsel %vm537_vm6, %v932_v7, %v819_v38 }
 0x290   :  { %v948_v12 = vsel %vm546_vm7, %v940_v56, %v851_v51 }
 0x291   :  { %v789_v20 = vpop.permute.xlu0 %788  ;;  %v956_v0 = vsel %vm555_vm8, %v948_v12, %v883_v39 }
 0x292   :  { %1383 = vmatprep.mubr.msk.f32.mxu1 %vm967_vm9, %v956_v0  ;;  %v933_v43 = vsel %vm528_vm5, %v925_v44, %v789_v20 }
 0x295   :  { %v821_v58 = vpop.permute.xlu0 %820 }
 0x296   :  { %v941_v33 = vsel %vm537_vm6, %v933_v43, %v821_v58 }
 0x299   :  { %v853_v2 = vpop.permute.xlu0 %852 }
 0x29a   :  { %v949_v17 = vsel %vm546_vm7, %v941_v33, %v853_v2 }
 0x29d   :  { %v885_v14 = vpop.permute.xlu0 %884 }
 0x29e   :  { %v957_v1 = vsel %vm555_vm8, %v949_v17, %v885_v14 }
 0x29f   :  { %1384 = vmatmul.mubr.msk.f32.gmra.mxu1 %vm967_vm9, %v957_v1 }
 0x2b3   :  { %v1364_v5 = vpop.f32.mrf.mxu0 }
 0x2b4   :  { %v1199_v36 = vmul.f32 %v1364_v5, %v1364_v5  ;;  %v1162_v21 = vsel %vm21_vm0, %v1364_v5, 0.0 }
 0x2b5   :  { %v1082_v62 = vpop.f32.mrf.mxu0 }
 0x2b6   :  { %v1161_v60 = vsel %vm21_vm0, %v1082_v62, 0.0  ;;  %v1198_v63 = vmul.f32 %v1082_v62, %v1082_v62  ;;  %1254 = vxpose.xlu1.b32.start [1/16] (narrow) %v1082_v62, 8  ;;  %v1215_v41 = vsel %vm21_vm0, %v1199_v36, 0.0 }
 0x2b7   :  { %v1163_v35 = vadd.f32 %v1162_v21, %v1161_v60 }
 0x2b8   :  { %v1214_v27 = vsel %vm21_vm0, %v1198_v63, 0.0 }
 0x2b9   :  { %v1216_v22 = vadd.f32 %v1215_v41, %v1214_v27 }
 0x2ba   :  { %1255 = vxpose.xlu1.b32.cont [2/16] (narrow) %v1364_v5, 8 }
 0x2bf   :  { %v1376_v19 = vpop.f32.mrf.mxu1 }
 0x2c0   :  { %v1207_v57 = vmul.f32 %v1376_v19, %v1376_v19  ;;  %v1178_v43 = vsel %vm21_vm0, %v1376_v19, 0.0 }
 0x2c1   :  { %v1122_v49 = vpop.f32.mrf.mxu1 }
 0x2c2   :  { %v1206_v39 = vmul.f32 %v1122_v49, %v1122_v49  ;;  %v1176_v58 = vsel %vm21_vm0, %v1122_v49, 0.0  ;;  %v1231_v14 = vsel %vm21_vm0, %v1207_v57, 0.0 }
 0x2c4   :  { %v1229_v31 = vsel %vm21_vm0, %v1206_v39, 0.0 }
 0x2ef   :  { %v1367_v54 = vpop.f32.mrf.mxu0 }
 0x2f0   :  { %v1201_v50 = vmul.f32 %v1367_v54, %v1367_v54  ;;  %v1166_v48 = vsel %vm21_vm0, %v1367_v54, 0.0 }
 0x2f1   :  { %v1092_v8 = vpop.f32.mrf.mxu0 }
 0x2f2   :  { %v1164_v24 = vsel %vm21_vm0, %v1092_v8, 0.0  ;;  %v1200_v23 = vmul.f32 %v1092_v8, %v1092_v8  ;;  %1256 = vxpose.xlu1.b32.cont [3/16] (narrow) %v1092_v8, 8  ;;  %v1219_v47 = vsel %vm21_vm0, %v1201_v50, 0.0 }
 0x2f3   :  { %v1165_v10 = vadd.f32 %v1164_v24, %v1163_v35 }
 0x2f4   :  { %v1217_v32 = vsel %vm21_vm0, %v1200_v23, 0.0 }
 0x2f5   :  { %v1218_v9 = vadd.f32 %v1217_v32, %v1216_v22  ;;  %v1167_v34 = vadd.f32 %v1166_v48, %v1165_v10 }
 0x2f6   :  { %1257 = vxpose.xlu1.b32.cont [4/16] (narrow) %v1367_v54, 8 }
 0x2f7   :  { %v1220_v61 = vadd.f32 %v1219_v47, %v1218_v9 }
 0x304   :  { %v1370_v52 = vpop.f32.mrf.mxu0 }
 0x305   :  { %v1203_v4 = vmul.f32 %v1370_v52, %v1370_v52  ;;  %v1170_v37 = vsel %vm21_vm0, %v1370_v52, 0.0 }
 0x306   :  { %v1102_v13 = vpop.f32.mrf.mxu0 }
 0x307   :  { %v1168_v59 = vsel %vm21_vm0, %v1102_v13, 0.0  ;;  %v1202_v16 = vmul.f32 %v1102_v13, %v1102_v13  ;;  %1258 = vxpose.xlu1.b32.cont [5/16] (narrow) %v1102_v13, 8  ;;  %v1223_v29 = vsel %vm21_vm0, %v1203_v4, 0.0 }
 0x308   :  { %v1169_v11 = vadd.f32 %v1168_v59, %v1167_v34 }
 0x309   :  { %v1221_v45 = vsel %vm21_vm0, %v1202_v16, 0.0 }
 0x30a   :  { %v1222_v38 = vadd.f32 %v1221_v45, %v1220_v61  ;;  %v1171_v3 = vadd.f32 %v1170_v37, %v1169_v11 }
 0x30b   :  { %1259 = vxpose.xlu1.b32.cont [6/16] (narrow) %v1370_v52, 8 }
 0x30c   :  { %v1224_v55 = vadd.f32 %v1223_v29, %v1222_v38 }
 0x31c   :  { %v1373_v6 = vpop.f32.mrf.mxu0 }
 0x31d   :  { %v1205_v15 = vmul.f32 %v1373_v6, %v1373_v6  ;;  %v1174_v42 = vsel %vm21_vm0, %v1373_v6, 0.0 }
 0x31e   :  { %v1112_v46 = vpop.f32.mrf.mxu0 }
 0x31f   :  { %1260 = vxpose.xlu1.b32.cont [7/16] (narrow) %v1112_v46, 8  ;;  %v1204_v51 = vmul.f32 %v1112_v46, %v1112_v46  ;;  %v1172_v40 = vsel %vm21_vm0, %v1112_v46, 0.0  ;;  %v1227_v12 = vsel %vm21_vm0, %v1205_v15, 0.0 }
 0x320   :  { %v1173_v28 = vadd.f32 %v1172_v40, %v1171_v3 }
 0x321   :  { %v1225_v53 = vsel %vm21_vm0, %v1204_v51, 0.0 }
 0x322   :  { %v1226_v25 = vadd.f32 %v1225_v53, %v1224_v55  ;;  %v1175_v56 = vadd.f32 %v1174_v42, %v1173_v28 }
 0x323   :  { %1261 = vxpose.xlu1.b32.cont [8/16] (narrow) %v1373_v6, 8 }
 0x324   :  { %v1228_v0 = vadd.f32 %v1227_v12, %v1226_v25  ;;  %v1177_v30 = vadd.f32 %v1176_v58, %v1175_v56 }
 0x326   :  { %v1230_v44 = vadd.f32 %v1229_v31, %v1228_v0  ;;  %v1179_v17 = vadd.f32 %v1178_v43, %v1177_v30 }
 0x327   :  { %1262 = vxpose.xlu1.b32.cont [9/16] (narrow) %v1122_v49, 8 }
 0x328   :  { %v1232_v36 = vadd.f32 %v1231_v14, %v1230_v44 }
 0x32b   :  { %1263 = vxpose.xlu1.b32.cont [10/16] (narrow) %v1376_v19, 8 }
 0x333   :  { %v1379_v26 = vpop.f32.mrf.mxu1 }
 0x334   :  { %v1209_v62 = vmul.f32 %v1379_v26, %v1379_v26  ;;  %v1182_v63 = vsel %vm21_vm0, %v1379_v26, 0.0 }
 0x335   :  { %v1132_v18 = vpop.f32.mrf.mxu1 }
 0x336   :  { %1264 = vxpose.xlu1.b32.cont [11/16] (narrow) %v1132_v18, 8  ;;  %v1208_v2 = vmul.f32 %v1132_v18, %v1132_v18  ;;  %v1180_v33 = vsel %vm21_vm0, %v1132_v18, 0.0  ;;  %v1235_v27 = vsel %vm21_vm0, %v1209_v62, 0.0 }
 0x337   :  { %v1181_v5 = vadd.f32 %v1180_v33, %v1179_v17 }
 0x338   :  { %v1233_v1 = vsel %vm21_vm0, %v1208_v2, 0.0 }
 0x339   :  { %v1234_v60 = vadd.f32 %v1233_v1, %v1232_v36  ;;  %v1183_v41 = vadd.f32 %v1182_v63, %v1181_v5 }
 0x33a   :  { %1265 = vxpose.xlu1.b32.cont [12/16] (narrow) %v1379_v26, 8 }
 0x33b   :  { %v1236_v8 = vadd.f32 %v1235_v27, %v1234_v60 }
 0x34c   :  { %v1382_v7 = vpop.f32.mrf.mxu1 }
 0x34d   :  { %v1211_v50 = vmul.f32 %v1382_v7, %v1382_v7  ;;  %v1186_v10 = vsel %vm21_vm0, %v1382_v7, 0.0 }
 0x34e   :  { %v1142_v20 = vpop.f32.mrf.mxu1 }
 0x34f   :  { %1266 = vxpose.xlu1.b32.cont [13/16] (narrow) %v1142_v20, 8  ;;  %v1210_v21 = vmul.f32 %v1142_v20, %v1142_v20  ;;  %v1184_v35 = vsel %vm21_vm0, %v1142_v20, 0.0  ;;  %v1239_v9 = vsel %vm21_vm0, %v1211_v50, 0.0 }
 0x350   :  { %v1185_v54 = vadd.f32 %v1184_v35, %v1183_v41 }
 0x351   :  { %v1237_v22 = vsel %vm21_vm0, %v1210_v21, 0.0 }
 0x352   :  { %v1238_v24 = vadd.f32 %v1237_v22, %v1236_v8  ;;  %v1187_v32 = vadd.f32 %v1186_v10, %v1185_v54 }
 0x353   :  { %1267 = vxpose.xlu1.b32.cont [14/16] (narrow) %v1382_v7, 8 }
 0x354   :  { %v1240_v13 = vadd.f32 %v1239_v9, %v1238_v24 }
 0x35f   :  { %v1385_v23 = vpop.f32.mrf.mxu1 }
 0x360   :  { %v1213_v34 = vmul.f32 %v1385_v23, %v1385_v23  ;;  %v1190_v4 = vsel %vm21_vm0, %v1385_v23, 0.0 }
 0x361   :  { %v1152_v48 = vpop.f32.mrf.mxu1 }
 0x362   :  { %v1188_v47 = vsel %vm21_vm0, %v1152_v48, 0.0  ;;  %v1212_v61 = vmul.f32 %v1152_v48, %v1152_v48  ;;  %1268 = vxpose.xlu1.b32.cont [15/16] (narrow) %v1152_v48, 8  ;;  %v1243_v37 = vsel %vm21_vm0, %v1213_v34, 0.0 }
 0x363   :  { %v1189_v52 = vadd.f32 %v1188_v47, %v1187_v32 }
 0x364   :  { %v1241_v59 = vsel %vm21_vm0, %v1212_v61, 0.0 }
 0x365   :  { %v1191_v16 = vadd.f32 %v1190_v4, %v1189_v52  ;;  %v1242_v11 = vadd.f32 %v1241_v59, %v1240_v13 }
 0x366   :  { %1269 = vxpose.xlu1.b32.end [16/16] (narrow) %v1385_v23, 8 }
 0x367   :  { %v1192_v45 = vrot.slane %v1191_v16, 4  ;;  %v1244_v38 = vadd.f32 %v1243_v37, %v1242_v11 }
 0x369   :  { %v1193_v3 = vadd.f32 %v1192_v45, %v1191_v16  ;;  %v1245_v29 = vrot.slane %v1244_v38, 4 }
 0x36b   :  { %v1194_v55 = vrot.slane %v1193_v3, 2  ;;  %v1246_v6 = vadd.f32 %v1245_v29, %v1244_v38 }
 0x36d   :  { %v1195_v46 = vadd.f32 %v1194_v55, %v1193_v3  ;;  %v1247_v19 = vrot.slane %v1246_v6, 2 }
 0x36f   :  { %v1196_v49 = vrot.slane %v1195_v46, 1  ;;  %v1248_v26 = vadd.f32 %v1247_v19, %v1246_v6 }
 0x371   :  { %v1249_v18 = vrot.slane %v1248_v26, 1  ;;  %v1197_v51 = vadd.f32 %v1196_v49, %v1195_v46 }
 0x373   :  { %v1250_v40 = vadd.f32 %v1249_v18, %v1248_v26 }
 0x375   :  { %v1252_v53 = vsel %vm1251_vm10, %v1197_v51, %v1250_v40 }
 0x376   :  { %1253 = vst.msk [vmem:[%s2208_s5] sm:$0x3] %vm23_vm1, %v1252_v53 }
 0x3a6   :  { %v1270_v28 = vpop.trf.xlu1 }
 0x3a7   :  { %1286 = vst.msk [vmem:[%s2209_s4] sm:$0xff] %vm555_vm8, %v1270_v28  ;;  %1288 = vrot.lane.b32.xlu0 %v1270_v28, %s1419_s23 }
 0x419   :  { %v1289_v15 = vpop.permute.xlu0 %1288 }
 0x41a   :  { %1318 = vst.msk [vmem:[%s2209_s4 + $0x8] sm:$0xff] %vm555_vm8, %v1289_v15 }

</bundles_post_ra>
